<compile_context>
chip_gen: v7x
topology: tpu7x:2x2x1
jax: 0.10.0
libtpu: 0.0.40
codegen_flags: <defaults>
</compile_context>

<pallas_src>
import functools

import jax
import jax.numpy as jnp
from jax.experimental import pallas as pl
from jax.experimental.pallas import tpu as pltpu

NEG_INF = -1e30     # python float (a jnp scalar here would be a captured const)
BN_EPS = 1e-5
LANE = 128          # padded feature width for lane-dense outputs


# ----------------------------- Pallas kernels ------------------------------ #

def _linear_kernel(x_ref, w_ref, b_ref, o_ref):
    o_ref[...] = (
        jnp.dot(x_ref[...], w_ref[...], preferred_element_type=jnp.float32)
        + b_ref[...]
    )


def linear_padded(x, w, b):
    """x [N, Fin] @ w [Fin, Fout_pad] + b, Fout_pad is lane-dense (128)."""
    n, fin = x.shape
    fout = w.shape[1]
    return pl.pallas_call(
        _linear_kernel,
        grid=(1,),
        in_specs=[
            pl.BlockSpec((n, fin), lambda i: (0, 0)),
            pl.BlockSpec((fin, fout), lambda i: (0, 0)),
            pl.BlockSpec((1, fout), lambda i: (0, 0)),
        ],
        out_specs=pl.BlockSpec((n, fout), lambda i: (0, 0)),
        out_shape=jax.ShapeDtypeStruct((n, fout), jnp.float32),
    )(x, w, b.reshape(1, fout))


def _gat_layer_kernel(*refs, heads, out_ch, residual, batch_norm, has_embed):
    """Fused: [optional embedding linear] -> GATConv -> BN -> ELU -> residual.

    PyG GATConv(concat=True, negative_slope=0.2, add_self_loops=True), dropout
    layers are identity (eval mode).  BN = batch statistics, biased variance.
    """
    if has_embed:
        (xin_ref, ew_ref, eb_ref, w_ref, asrct_ref, adst_ref, adj_ref,
         bias_ref, gamma_ref, beta_ref, o_ref) = refs
        # embedding_h (+ identity in_feat_dropout); x is also h_in for residual
        x = (jnp.dot(xin_ref[...], ew_ref[...],
                     preferred_element_type=jnp.float32) + eb_ref[...])
    else:
        (x_ref, w_ref, asrct_ref, adst_ref, adj_ref,
         bias_ref, gamma_ref, beta_ref, o_ref) = refs
        x = x_ref[...]                                               # [N, F]

    xw = jnp.dot(x, w_ref[...], preferred_element_type=jnp.float32)  # [N, F]
    # alpha_dst[i, h] = <W_h x_i, att_dst_h>
    alpha_dst = jnp.dot(x, adst_ref[...],
                        preferred_element_type=jnp.float32)          # [N, H]
    # alpha_src as a [H, N] row block: contract the feature axes directly
    # (NT matmul) instead of DMAing a transposed copy of x.
    alpha_src_row = jax.lax.dot_general(
        asrct_ref[...], x, (((1,), (1,)), ((), ())),
        preferred_element_type=jnp.float32)                          # [H, N]

    adj = adj_ref[...].astype(jnp.float32)                           # int8 -> f32 mask

    bias = bias_ref[...]
    gamma = gamma_ref[...]
    beta = beta_ref[...]

    # Clear once so the lane-padding columns of the output are exactly zero.
    o_ref[...] = jnp.zeros_like(o_ref)

    for h in range(heads):
        lo, hi = h * out_ch, (h + 1) * out_ch
        # e[i, j] = leaky_relu(alpha_src[j] + alpha_dst[i]) on edge j -> i
        e = alpha_dst[:, h:h + 1] + alpha_src_row[h:h + 1, :]        # [N, N]
        e = jnp.where(e > 0, e, 0.2 * e)                             # leaky_relu(0.2)
        e = jnp.where(adj > 0, e, NEG_INF)                           # single mask
        e = e - jnp.max(e, axis=1, keepdims=True)
        p = jnp.exp(e)            # masked entries underflow to exactly 0
        # one reciprocal per row, then multiply (instead of a [N, N] divide)
        attn = p * (1.0 / jnp.sum(p, axis=1, keepdims=True))
        hgat = (jnp.dot(attn, xw[:, lo:hi],
                        preferred_element_type=jnp.float32)
                + bias[:, lo:hi])                                    # [N, C]
        # BN / ELU / residual epilogue while the slab is resident (BN is
        # per-feature, so per-head-slab statistics are exact).
        if batch_norm:
            mean = jnp.mean(hgat, axis=0, keepdims=True)
            var = jnp.mean(jnp.square(hgat - mean), axis=0, keepdims=True)
            hgat = ((hgat - mean) * jax.lax.rsqrt(var + BN_EPS)
                    * gamma[:, lo:hi] + beta[:, lo:hi])
        act = jnp.where(hgat > 0, hgat, jnp.exp(hgat) - 1.0)         # ELU(1.0)
        if residual:
            act = x[:, lo:hi] + act
        o_ref[:, lo:hi] = act


def gat_layer(x, layer, adj_i8, *, residual, batch_norm, embed=None):
    """One fused network layer.  `embed=(emb_w, emb_b)` fuses the input
    embedding linear into the first layer's kernel."""
    n = x.shape[0]
    heads, out_ch = layer["heads"], layer["out_ch"]
    kern = functools.partial(_gat_layer_kernel, heads=heads, out_ch=out_ch,
                             residual=residual, batch_norm=batch_norm,
                             has_embed=embed is not None)
    args = [x]
    if embed is not None:
        ew, eb = embed
        args += [ew, eb.reshape(1, -1)]
    args += [layer["w"], layer["a_src_t"], layer["a_dst"], adj_i8,
             layer["bias"].reshape(1, -1), layer["gamma"].reshape(1, -1),
             layer["beta"].reshape(1, -1)]
    in_specs = [pl.BlockSpec(a.shape, lambda i: (0, 0)) for a in args]
    # TODO(synk): for large N, row-tile the grid over destination nodes
    # (adj BlockSpec (tm, N), "parallel" semantics for v7x's 2 TCs) with a
    # two-pass cross-tile BatchNorm; whole-block is fine at these toy shapes.
    return pl.pallas_call(
        kern,
        grid=(1,),
        in_specs=in_specs,
        out_specs=pl.BlockSpec((n, LANE), lambda i: (0, 0)),
        out_shape=jax.ShapeDtypeStruct((n, LANE), jnp.float32),
        compiler_params=pltpu.CompilerParams(
            dimension_semantics=("arbitrary",)),
    )(*args)


# ----------------------------- model assembly ------------------------------ #

def init_gat_layer(key, fin_pad, fin_live, heads, out_ch):
    k1, k2, k3 = jax.random.split(key, 3)
    hc = heads * out_ch
    w = 0.1 * jax.random.normal(k1, (fin_live, hc), jnp.float32)   # lin (no bias)
    att_src = 0.1 * jax.random.normal(k2, (heads, out_ch), jnp.float32)
    att_dst = 0.1 * jax.random.normal(k3, (heads, out_ch), jnp.float32)
    # a_*[:, h] = W[:, h*C:(h+1)*C] @ att_*[h]   (param-setup glue)
    w3 = w.reshape(fin_live, heads, out_ch)
    a_src = jnp.einsum("fhc,hc->fh", w3, att_src)                  # [Fin, H]
    a_dst = jnp.einsum("fhc,hc->fh", w3, att_dst)
    # zero-pad to lane-dense shapes (padding rows/cols contribute exactly 0)
    w_pad = jnp.zeros((fin_pad, LANE), jnp.float32).at[:fin_live, :hc].set(w)
    a_src_t = jnp.zeros((heads, fin_pad), jnp.float32).at[:, :fin_live].set(a_src.T)
    a_dst_p = jnp.zeros((fin_pad, heads), jnp.float32).at[:fin_live, :].set(a_dst)
    bias = jnp.zeros((LANE,), jnp.float32)
    gamma = jnp.zeros((LANE,), jnp.float32).at[:hc].set(1.0)
    beta = jnp.zeros((LANE,), jnp.float32)
    return dict(w=w_pad, a_src_t=a_src_t, a_dst=a_dst_p, bias=bias,
                gamma=gamma, beta=beta, heads=heads, out_ch=out_ch)


def init_params(key, in_dim, hidden, heads, out_dim, n_classes, n_layers):
    keys = jax.random.split(key, n_layers + 2)
    hh = hidden * heads
    emb_w = 0.1 * jax.random.normal(keys[0], (in_dim, hh), jnp.float32)
    emb_w_pad = jnp.zeros((in_dim, LANE), jnp.float32).at[:, :hh].set(emb_w)
    emb_b = jnp.zeros((LANE,), jnp.float32)
    mlp_w = 0.1 * jax.random.normal(keys[1], (out_dim, n_classes), jnp.float32)
    mlp_w_pad = jnp.zeros((LANE, LANE), jnp.float32).at[:out_dim, :n_classes].set(mlp_w)
    mlp_b = jnp.zeros((LANE,), jnp.float32)
    layers = []
    for li in range(n_layers - 1):
        layers.append(init_gat_layer(keys[2 + li], LANE, hh, heads, hidden))
    layers.append(init_gat_layer(keys[2 + n_layers - 1], LANE, hh, 1, out_dim))
    return dict(emb_w=emb_w_pad, emb_b=emb_b, mlp_w=mlp_w_pad, mlp_b=mlp_b,
                layers=layers, n_classes=n_classes)


def gat_net_forward(params, h_raw, adj_i8, residual=True, batch_norm=True):
    layers = params["layers"]
    # Layer 0 fuses the input embedding (in_feat_dropout = identity, eval).
    h = gat_layer(h_raw, layers[0], adj_i8, residual=residual,
                  batch_norm=batch_norm,
                  embed=(params["emb_w"], params["emb_b"]))
    for lyr in layers[1:]:
        h = gat_layer(h, lyr, adj_i8, residual=residual, batch_norm=batch_norm)
    logits = linear_padded(h, params["mlp_w"], params["mlp_b"])   # [N, 128]
    return logits[:, :params["n_classes"]]                        # wrapper-side slice


# ---------------------------------- main ----------------------------------- #

if __name__ == "__main__":
    N, IN_DIM, HIDDEN, HEADS = 64, 16, 8, 4
    OUT_DIM, N_CLASSES, N_LAYERS, E = 32, 4, 2, 256

    key = jax.random.PRNGKey(0)
    k_feat, k_src, k_dst, k_param = jax.random.split(key, 4)

    h = jax.random.normal(k_feat, (N, IN_DIM), jnp.float32)
    src = jax.random.randint(k_src, (E,), 0, N)
    dst = jax.random.randint(k_dst, (E,), 0, N)
    edge_index = jnp.stack([src, dst])          # [2, E], PyG convention

    # dense int8 adjacency mask (edge j -> i), with self-loops added
    adj = jnp.zeros((N, N), jnp.int8).at[dst, src].set(1)
    adj = adj.at[jnp.arange(N), jnp.arange(N)].set(1)

    params = init_params(k_param, IN_DIM, HIDDEN, HEADS, OUT_DIM,
                         N_CLASSES, N_LAYERS)

    out = gat_net_forward(params, h, adj, residual=True, batch_norm=True)
    out = jax.block_until_ready(out)
    assert out.shape == (N, N_CLASSES)
    assert bool(jnp.all(jnp.isfinite(out)))
    print("KERNEL_OK")
</pallas_src>

<mosaic_0001>
module attributes {stable_mosaic.version = 11 : i64} {
  func.func @_gat_layer_kernel(%arg0: i32, %arg1: memref<64x16xf32, #tpu.memory_space<vmem>>, %arg2: memref<16x128xf32, #tpu.memory_space<vmem>>, %arg3: memref<1x128xf32, #tpu.memory_space<vmem>>, %arg4: memref<128x128xf32, #tpu.memory_space<vmem>>, %arg5: memref<4x128xf32, #tpu.memory_space<vmem>>, %arg6: memref<128x4xf32, #tpu.memory_space<vmem>>, %arg7: memref<64x64xi8, #tpu.memory_space<vmem>>, %arg8: memref<1x128xf32, #tpu.memory_space<vmem>>, %arg9: memref<1x128xf32, #tpu.memory_space<vmem>>, %arg10: memref<1x128xf32, #tpu.memory_space<vmem>>, %arg11: memref<64x128xf32, #tpu.memory_space<vmem>>) attributes {dimension_semantics = [#tpu.dimension_semantics<arbitrary>], iteration_bounds = array<i64: 1>, scalar_prefetch = 0 : i64, scratch_operands = 0 : i64, tpu.core_type = #tpu.core_type<tc>, window_params = [{pipeline_mode = #tpu.pipeline_mode<synchronous>, transform_indices = @transform_0, window_bounds = array<i64: 64, 16>}, {pipeline_mode = #tpu.pipeline_mode<synchronous>, transform_indices = @transform_1, window_bounds = array<i64: 16, 128>}, {pipeline_mode = #tpu.pipeline_mode<synchronous>, transform_indices = @transform_2, window_bounds = array<i64: 1, 128>}, {pipeline_mode = #tpu.pipeline_mode<synchronous>, transform_indices = @transform_3, window_bounds = array<i64: 128, 128>}, {pipeline_mode = #tpu.pipeline_mode<synchronous>, transform_indices = @transform_4, window_bounds = array<i64: 4, 128>}, {pipeline_mode = #tpu.pipeline_mode<synchronous>, transform_indices = @transform_5, window_bounds = array<i64: 128, 4>}, {pipeline_mode = #tpu.pipeline_mode<synchronous>, transform_indices = @transform_6, window_bounds = array<i64: 64, 64>}, {pipeline_mode = #tpu.pipeline_mode<synchronous>, transform_indices = @transform_7, window_bounds = array<i64: 1, 128>}, {pipeline_mode = #tpu.pipeline_mode<synchronous>, transform_indices = @transform_8, window_bounds = array<i64: 1, 128>}, {pipeline_mode = #tpu.pipeline_mode<synchronous>, transform_indices = @transform_9, window_bounds = array<i64: 1, 128>}, {pipeline_mode = #tpu.pipeline_mode<synchronous>, transform_indices = @transform_10, window_bounds = array<i64: 64, 128>}]} {
    %c0 = arith.constant 0 : index
    %c0_0 = arith.constant 0 : index
    %0 = vector.load %arg1[%c0, %c0_0] : memref<64x16xf32, #tpu.memory_space<vmem>>, vector<64x16xf32>
    %c0_1 = arith.constant 0 : index
    %c0_2 = arith.constant 0 : index
    %1 = vector.load %arg2[%c0_1, %c0_2] : memref<16x128xf32, #tpu.memory_space<vmem>>, vector<16x128xf32>
    %cst = arith.constant dense<0.000000e+00> : vector<64x128xf32>
    %2 = tpu.matmul %0, %1, %cst {dimension_numbers = #tpu.dot_dimension_numbers<[1], [0], [0], [1], [0, 0, 1, 1], [], []>} : vector<64x16xf32>, vector<16x128xf32>, vector<64x128xf32> -> vector<64x128xf32>
    %c0_3 = arith.constant 0 : index
    %c0_4 = arith.constant 0 : index
    %3 = vector.load %arg3[%c0_3, %c0_4] : memref<1x128xf32, #tpu.memory_space<vmem>>, vector<1x128xf32>
    %4 = vector.broadcast %3 : vector<1x128xf32> to vector<64x128xf32>
    %5 = arith.addf %2, %4 : vector<64x128xf32>
    %c0_5 = arith.constant 0 : index
    %c0_6 = arith.constant 0 : index
    %6 = vector.load %arg4[%c0_5, %c0_6] : memref<128x128xf32, #tpu.memory_space<vmem>>, vector<128x128xf32>
    %cst_7 = arith.constant dense<0.000000e+00> : vector<64x128xf32>
    %7 = tpu.matmul %5, %6, %cst_7 {dimension_numbers = #tpu.dot_dimension_numbers<[1], [0], [0], [1], [0, 0, 1, 1], [], []>} : vector<64x128xf32>, vector<128x128xf32>, vector<64x128xf32> -> vector<64x128xf32>
    %c0_8 = arith.constant 0 : index
    %c0_9 = arith.constant 0 : index
    %8 = vector.load %arg6[%c0_8, %c0_9] : memref<128x4xf32, #tpu.memory_space<vmem>>, vector<128x4xf32>
    %cst_10 = arith.constant dense<0.000000e+00> : vector<64x4xf32>
    %9 = tpu.matmul %5, %8, %cst_10 {dimension_numbers = #tpu.dot_dimension_numbers<[1], [0], [0], [1], [0, 0, 1, 1], [], []>} : vector<64x128xf32>, vector<128x4xf32>, vector<64x4xf32> -> vector<64x4xf32>
    %c0_11 = arith.constant 0 : index
    %c0_12 = arith.constant 0 : index
    %10 = vector.load %arg5[%c0_11, %c0_12] : memref<4x128xf32, #tpu.memory_space<vmem>>, vector<4x128xf32>
    %cst_13 = arith.constant dense<0.000000e+00> : vector<4x64xf32>
    %11 = tpu.matmul %10, %5, %cst_13 {dimension_numbers = #tpu.dot_dimension_numbers<[1], [1], [0], [0], [0, 0, 1, 0], [], []>} : vector<4x128xf32>, vector<64x128xf32>, vector<4x64xf32> -> vector<4x64xf32>
    %c0_14 = arith.constant 0 : index
    %c0_15 = arith.constant 0 : index
    %12 = vector.load %arg7[%c0_14, %c0_15] : memref<64x64xi8, #tpu.memory_space<vmem>>, vector<64x64xi8>
    %13 = arith.sitofp %12 : vector<64x64xi8> to vector<64x64xf32>
    %c0_16 = arith.constant 0 : index
    %c0_17 = arith.constant 0 : index
    %14 = vector.load %arg8[%c0_16, %c0_17] : memref<1x128xf32, #tpu.memory_space<vmem>>, vector<1x128xf32>
    %c0_18 = arith.constant 0 : index
    %c0_19 = arith.constant 0 : index
    %15 = vector.load %arg9[%c0_18, %c0_19] : memref<1x128xf32, #tpu.memory_space<vmem>>, vector<1x128xf32>
    %c0_20 = arith.constant 0 : index
    %c0_21 = arith.constant 0 : index
    %16 = vector.load %arg10[%c0_20, %c0_21] : memref<1x128xf32, #tpu.memory_space<vmem>>, vector<1x128xf32>
    %cst_22 = arith.constant 0.000000e+00 : f32
    %17 = vector.broadcast %cst_22 : f32 to vector<64x128xf32>
    %c0_23 = arith.constant 0 : index
    %c0_24 = arith.constant 0 : index
    %18 = vector.load %arg11[%c0_23, %c0_24] : memref<64x128xf32, #tpu.memory_space<vmem>>, vector<64x128xf32>
    tpu.vector_store %arg11[%c0_23, %c0_24], %17 {strides = array<i32>} : memref<64x128xf32, #tpu.memory_space<vmem>>, vector<64x128xf32>,
    %19 = vector.extract_strided_slice %9 {offsets = [0, 0], sizes = [64, 1], strides = [1, 1]} : vector<64x4xf32> to vector<64x1xf32>
    %20 = vector.extract_strided_slice %11 {offsets = [0, 0], sizes = [1, 64], strides = [1, 1]} : vector<4x64xf32> to vector<1x64xf32>
    %21 = vector.broadcast %19 : vector<64x1xf32> to vector<64x64xf32>
    %22 = vector.broadcast %20 : vector<1x64xf32> to vector<64x64xf32>
    %23 = arith.addf %21, %22 : vector<64x64xf32>
    %cst_25 = arith.constant 0.000000e+00 : f32
    %24 = vector.broadcast %cst_25 : f32 to vector<64x64xf32>
    %25 = arith.cmpf ogt, %23, %24 : vector<64x64xf32>
    %cst_26 = arith.constant 2.000000e-01 : f32
    %26 = vector.broadcast %cst_26 : f32 to vector<64x64xf32>
    %27 = arith.mulf %26, %23 : vector<64x64xf32>
    %28 = arith.select %25, %23, %27 : vector<64x64xi1>, vector<64x64xf32>
    %cst_27 = arith.constant 0.000000e+00 : f32
    %29 = vector.broadcast %cst_27 : f32 to vector<64x64xf32>
    %30 = arith.cmpf ogt, %13, %29 : vector<64x64xf32>
    %cst_28 = arith.constant -1.000000e+30 : f32
    %31 = vector.broadcast %cst_28 : f32 to vector<64x64xf32>
    %32 = arith.select %30, %28, %31 : vector<64x64xi1>, vector<64x64xf32>
    %cst_29 = arith.constant dense<0xFF800000> : vector<64xf32>
    %33 = vector.multi_reduction <maximumf>, %32, %cst_29 [1] : vector<64x64xf32> to vector<64xf32>
    %34 = vector.shape_cast %33 : vector<64xf32> to vector<64x1xf32>
    %35 = vector.broadcast %34 : vector<64x1xf32> to vector<64x64xf32>
    %36 = arith.subf %32, %35 : vector<64x64xf32>
    %37 = math.exp %36 : vector<64x64xf32>
    %cst_30 = arith.constant dense<0.000000e+00> : vector<64xf32>
    %38 = vector.multi_reduction <add>, %37, %cst_30 [1] : vector<64x64xf32> to vector<64xf32>
    %39 = vector.shape_cast %38 : vector<64xf32> to vector<64x1xf32>
    %cst_31 = arith.constant 1.000000e+00 : f32
    %40 = vector.broadcast %cst_31 : f32 to vector<64x1xf32>
    %41 = arith.divf %40, %39 : vector<64x1xf32>
    %42 = vector.broadcast %41 : vector<64x1xf32> to vector<64x64xf32>
    %43 = arith.mulf %37, %42 : vector<64x64xf32>
    %44 = vector.extract_strided_slice %7 {offsets = [0, 0], sizes = [64, 8], strides = [1, 1]} : vector<64x128xf32> to vector<64x8xf32>
    %cst_32 = arith.constant dense<0.000000e+00> : vector<64x8xf32>
    %45 = tpu.matmul %43, %44, %cst_32 {dimension_numbers = #tpu.dot_dimension_numbers<[1], [0], [0], [1], [0, 0, 1, 1], [], []>} : vector<64x64xf32>, vector<64x8xf32>, vector<64x8xf32> -> vector<64x8xf32>
    %46 = vector.extract_strided_slice %14 {offsets = [0, 0], sizes = [1, 8], strides = [1, 1]} : vector<1x128xf32> to vector<1x8xf32>
    %47 = vector.broadcast %46 : vector<1x8xf32> to vector<64x8xf32>
    %48 = arith.addf %45, %47 : vector<64x8xf32>
    %cst_33 = arith.constant dense<0.000000e+00> : vector<8xf32>
    %49 = vector.multi_reduction <add>, %48, %cst_33 [0] : vector<64x8xf32> to vector<8xf32>
    %50 = vector.shape_cast %49 : vector<8xf32> to vector<1x8xf32>
    %cst_34 = arith.constant 6.400000e+01 : f32
    %51 = vector.broadcast %cst_34 : f32 to vector<1x8xf32>
    %52 = arith.divf %50, %51 : vector<1x8xf32>
    %53 = vector.broadcast %52 : vector<1x8xf32> to vector<64x8xf32>
    %54 = arith.subf %48, %53 : vector<64x8xf32>
    %55 = arith.mulf %54, %54 : vector<64x8xf32>
    %cst_35 = arith.constant dense<0.000000e+00> : vector<8xf32>
    %56 = vector.multi_reduction <add>, %55, %cst_35 [0] : vector<64x8xf32> to vector<8xf32>
    %57 = vector.shape_cast %56 : vector<8xf32> to vector<1x8xf32>
    %cst_36 = arith.constant 6.400000e+01 : f32
    %58 = vector.broadcast %cst_36 : f32 to vector<1x8xf32>
    %59 = arith.divf %57, %58 : vector<1x8xf32>
    %60 = vector.broadcast %52 : vector<1x8xf32> to vector<64x8xf32>
    %61 = arith.subf %48, %60 : vector<64x8xf32>
    %cst_37 = arith.constant 9.99999974E-6 : f32
    %62 = vector.broadcast %cst_37 : f32 to vector<1x8xf32>
    %63 = arith.addf %59, %62 : vector<1x8xf32>
    %64 = math.rsqrt %63 : vector<1x8xf32>
    %65 = vector.broadcast %64 : vector<1x8xf32> to vector<64x8xf32>
    %66 = arith.mulf %61, %65 : vector<64x8xf32>
    %67 = vector.extract_strided_slice %15 {offsets = [0, 0], sizes = [1, 8], strides = [1, 1]} : vector<1x128xf32> to vector<1x8xf32>
    %68 = vector.broadcast %67 : vector<1x8xf32> to vector<64x8xf32>
    %69 = arith.mulf %66, %68 : vector<64x8xf32>
    %70 = vector.extract_strided_slice %16 {offsets = [0, 0], sizes = [1, 8], strides = [1, 1]} : vector<1x128xf32> to vector<1x8xf32>
    %71 = vector.broadcast %70 : vector<1x8xf32> to vector<64x8xf32>
    %72 = arith.addf %69, %71 : vector<64x8xf32>
    %cst_38 = arith.constant 0.000000e+00 : f32
    %73 = vector.broadcast %cst_38 : f32 to vector<64x8xf32>
    %74 = arith.cmpf ogt, %72, %73 : vector<64x8xf32>
    %75 = math.exp %72 : vector<64x8xf32>
    %cst_39 = arith.constant 1.000000e+00 : f32
    %76 = vector.broadcast %cst_39 : f32 to vector<64x8xf32>
    %77 = arith.subf %75, %76 : vector<64x8xf32>
    %78 = arith.select %74, %72, %77 : vector<64x8xi1>, vector<64x8xf32>
    %79 = vector.extract_strided_slice %5 {offsets = [0, 0], sizes = [64, 8], strides = [1, 1]} : vector<64x128xf32> to vector<64x8xf32>
    %80 = arith.addf %79, %78 : vector<64x8xf32>
    %c0_40 = arith.constant 0 : index
    %c0_41 = arith.constant 0 : index
    %81 = vector.load %arg11[%c0_40, %c0_41] : memref<64x128xf32, #tpu.memory_space<vmem>>, vector<64x8xf32>
    tpu.vector_store %arg11[%c0_40, %c0_41], %80 {strides = array<i32>} : memref<64x128xf32, #tpu.memory_space<vmem>>, vector<64x8xf32>,
    %82 = vector.extract_strided_slice %9 {offsets = [0, 1], sizes = [64, 1], strides = [1, 1]} : vector<64x4xf32> to vector<64x1xf32>
    %83 = vector.extract_strided_slice %11 {offsets = [1, 0], sizes = [1, 64], strides = [1, 1]} : vector<4x64xf32> to vector<1x64xf32>
    %84 = vector.broadcast %82 : vector<64x1xf32> to vector<64x64xf32>
    %85 = vector.broadcast %83 : vector<1x64xf32> to vector<64x64xf32>
    %86 = arith.addf %84, %85 : vector<64x64xf32>
    %cst_42 = arith.constant 0.000000e+00 : f32
    %87 = vector.broadcast %cst_42 : f32 to vector<64x64xf32>
    %88 = arith.cmpf ogt, %86, %87 : vector<64x64xf32>
    %cst_43 = arith.constant 2.000000e-01 : f32
    %89 = vector.broadcast %cst_43 : f32 to vector<64x64xf32>
    %90 = arith.mulf %89, %86 : vector<64x64xf32>
    %91 = arith.select %88, %86, %90 : vector<64x64xi1>, vector<64x64xf32>
    %cst_44 = arith.constant 0.000000e+00 : f32
    %92 = vector.broadcast %cst_44 : f32 to vector<64x64xf32>
    %93 = arith.cmpf ogt, %13, %92 : vector<64x64xf32>
    %cst_45 = arith.constant -1.000000e+30 : f32
    %94 = vector.broadcast %cst_45 : f32 to vector<64x64xf32>
    %95 = arith.select %93, %91, %94 : vector<64x64xi1>, vector<64x64xf32>
    %cst_46 = arith.constant dense<0xFF800000> : vector<64xf32>
    %96 = vector.multi_reduction <maximumf>, %95, %cst_46 [1] : vector<64x64xf32> to vector<64xf32>
    %97 = vector.shape_cast %96 : vector<64xf32> to vector<64x1xf32>
    %98 = vector.broadcast %97 : vector<64x1xf32> to vector<64x64xf32>
    %99 = arith.subf %95, %98 : vector<64x64xf32>
    %100 = math.exp %99 : vector<64x64xf32>
    %cst_47 = arith.constant dense<0.000000e+00> : vector<64xf32>
    %101 = vector.multi_reduction <add>, %100, %cst_47 [1] : vector<64x64xf32> to vector<64xf32>
    %102 = vector.shape_cast %101 : vector<64xf32> to vector<64x1xf32>
    %cst_48 = arith.constant 1.000000e+00 : f32
    %103 = vector.broadcast %cst_48 : f32 to vector<64x1xf32>
    %104 = arith.divf %103, %102 : vector<64x1xf32>
    %105 = vector.broadcast %104 : vector<64x1xf32> to vector<64x64xf32>
    %106 = arith.mulf %100, %105 : vector<64x64xf32>
    %107 = vector.extract_strided_slice %7 {offsets = [0, 8], sizes = [64, 8], strides = [1, 1]} : vector<64x128xf32> to vector<64x8xf32>
    %cst_49 = arith.constant dense<0.000000e+00> : vector<64x8xf32>
    %108 = tpu.matmul %106, %107, %cst_49 {dimension_numbers = #tpu.dot_dimension_numbers<[1], [0], [0], [1], [0, 0, 1, 1], [], []>} : vector<64x64xf32>, vector<64x8xf32>, vector<64x8xf32> -> vector<64x8xf32>
    %109 = vector.extract_strided_slice %14 {offsets = [0, 8], sizes = [1, 8], strides = [1, 1]} : vector<1x128xf32> to vector<1x8xf32>
    %110 = vector.broadcast %109 : vector<1x8xf32> to vector<64x8xf32>
    %111 = arith.addf %108, %110 : vector<64x8xf32>
    %cst_50 = arith.constant dense<0.000000e+00> : vector<8xf32>
    %112 = vector.multi_reduction <add>, %111, %cst_50 [0] : vector<64x8xf32> to vector<8xf32>
    %113 = vector.shape_cast %112 : vector<8xf32> to vector<1x8xf32>
    %cst_51 = arith.constant 6.400000e+01 : f32
    %114 = vector.broadcast %cst_51 : f32 to vector<1x8xf32>
    %115 = arith.divf %113, %114 : vector<1x8xf32>
    %116 = vector.broadcast %115 : vector<1x8xf32> to vector<64x8xf32>
    %117 = arith.subf %111, %116 : vector<64x8xf32>
    %118 = arith.mulf %117, %117 : vector<64x8xf32>
    %cst_52 = arith.constant dense<0.000000e+00> : vector<8xf32>
    %119 = vector.multi_reduction <add>, %118, %cst_52 [0] : vector<64x8xf32> to vector<8xf32>
    %120 = vector.shape_cast %119 : vector<8xf32> to vector<1x8xf32>
    %cst_53 = arith.constant 6.400000e+01 : f32
    %121 = vector.broadcast %cst_53 : f32 to vector<1x8xf32>
    %122 = arith.divf %120, %121 : vector<1x8xf32>
    %123 = vector.broadcast %115 : vector<1x8xf32> to vector<64x8xf32>
    %124 = arith.subf %111, %123 : vector<64x8xf32>
    %cst_54 = arith.constant 9.99999974E-6 : f32
    %125 = vector.broadcast %cst_54 : f32 to vector<1x8xf32>
    %126 = arith.addf %122, %125 : vector<1x8xf32>
    %127 = math.rsqrt %126 : vector<1x8xf32>
    %128 = vector.broadcast %127 : vector<1x8xf32> to vector<64x8xf32>
    %129 = arith.mulf %124, %128 : vector<64x8xf32>
    %130 = vector.extract_strided_slice %15 {offsets = [0, 8], sizes = [1, 8], strides = [1, 1]} : vector<1x128xf32> to vector<1x8xf32>
    %131 = vector.broadcast %130 : vector<1x8xf32> to vector<64x8xf32>
    %132 = arith.mulf %129, %131 : vector<64x8xf32>
    %133 = vector.extract_strided_slice %16 {offsets = [0, 8], sizes = [1, 8], strides = [1, 1]} : vector<1x128xf32> to vector<1x8xf32>
    %134 = vector.broadcast %133 : vector<1x8xf32> to vector<64x8xf32>
    %135 = arith.addf %132, %134 : vector<64x8xf32>
    %cst_55 = arith.constant 0.000000e+00 : f32
    %136 = vector.broadcast %cst_55 : f32 to vector<64x8xf32>
    %137 = arith.cmpf ogt, %135, %136 : vector<64x8xf32>
    %138 = math.exp %135 : vector<64x8xf32>
    %cst_56 = arith.constant 1.000000e+00 : f32
    %139 = vector.broadcast %cst_56 : f32 to vector<64x8xf32>
    %140 = arith.subf %138, %139 : vector<64x8xf32>
    %141 = arith.select %137, %135, %140 : vector<64x8xi1>, vector<64x8xf32>
    %142 = vector.extract_strided_slice %5 {offsets = [0, 8], sizes = [64, 8], strides = [1, 1]} : vector<64x128xf32> to vector<64x8xf32>
    %143 = arith.addf %142, %141 : vector<64x8xf32>
    %c0_57 = arith.constant 0 : index
    %c8 = arith.constant 8 : index
    %144 = vector.load %arg11[%c0_57, %c8] : memref<64x128xf32, #tpu.memory_space<vmem>>, vector<64x8xf32>
    tpu.vector_store %arg11[%c0_57, %c8], %143 {strides = array<i32>} : memref<64x128xf32, #tpu.memory_space<vmem>>, vector<64x8xf32>,
    %145 = vector.extract_strided_slice %9 {offsets = [0, 2], sizes = [64, 1], strides = [1, 1]} : vector<64x4xf32> to vector<64x1xf32>
    %146 = vector.extract_strided_slice %11 {offsets = [2, 0], sizes = [1, 64], strides = [1, 1]} : vector<4x64xf32> to vector<1x64xf32>
    %147 = vector.broadcast %145 : vector<64x1xf32> to vector<64x64xf32>
    %148 = vector.broadcast %146 : vector<1x64xf32> to vector<64x64xf32>
    %149 = arith.addf %147, %148 : vector<64x64xf32>
    %cst_58 = arith.constant 0.000000e+00 : f32
    %150 = vector.broadcast %cst_58 : f32 to vector<64x64xf32>
    %151 = arith.cmpf ogt, %149, %150 : vector<64x64xf32>
    %cst_59 = arith.constant 2.000000e-01 : f32
    %152 = vector.broadcast %cst_59 : f32 to vector<64x64xf32>
    %153 = arith.mulf %152, %149 : vector<64x64xf32>
    %154 = arith.select %151, %149, %153 : vector<64x64xi1>, vector<64x64xf32>
    %cst_60 = arith.constant 0.000000e+00 : f32
    %155 = vector.broadcast %cst_60 : f32 to vector<64x64xf32>
    %156 = arith.cmpf ogt, %13, %155 : vector<64x64xf32>
    %cst_61 = arith.constant -1.000000e+30 : f32
    %157 = vector.broadcast %cst_61 : f32 to vector<64x64xf32>
    %158 = arith.select %156, %154, %157 : vector<64x64xi1>, vector<64x64xf32>
    %cst_62 = arith.constant dense<0xFF800000> : vector<64xf32>
    %159 = vector.multi_reduction <maximumf>, %158, %cst_62 [1] : vector<64x64xf32> to vector<64xf32>
    %160 = vector.shape_cast %159 : vector<64xf32> to vector<64x1xf32>
    %161 = vector.broadcast %160 : vector<64x1xf32> to vector<64x64xf32>
    %162 = arith.subf %158, %161 : vector<64x64xf32>
    %163 = math.exp %162 : vector<64x64xf32>
    %cst_63 = arith.constant dense<0.000000e+00> : vector<64xf32>
    %164 = vector.multi_reduction <add>, %163, %cst_63 [1] : vector<64x64xf32> to vector<64xf32>
    %165 = vector.shape_cast %164 : vector<64xf32> to vector<64x1xf32>
    %cst_64 = arith.constant 1.000000e+00 : f32
    %166 = vector.broadcast %cst_64 : f32 to vector<64x1xf32>
    %167 = arith.divf %166, %165 : vector<64x1xf32>
    %168 = vector.broadcast %167 : vector<64x1xf32> to vector<64x64xf32>
    %169 = arith.mulf %163, %168 : vector<64x64xf32>
    %170 = vector.extract_strided_slice %7 {offsets = [0, 16], sizes = [64, 8], strides = [1, 1]} : vector<64x128xf32> to vector<64x8xf32>
    %cst_65 = arith.constant dense<0.000000e+00> : vector<64x8xf32>
    %171 = tpu.matmul %169, %170, %cst_65 {dimension_numbers = #tpu.dot_dimension_numbers<[1], [0], [0], [1], [0, 0, 1, 1], [], []>} : vector<64x64xf32>, vector<64x8xf32>, vector<64x8xf32> -> vector<64x8xf32>
    %172 = vector.extract_strided_slice %14 {offsets = [0, 16], sizes = [1, 8], strides = [1, 1]} : vector<1x128xf32> to vector<1x8xf32>
    %173 = vector.broadcast %172 : vector<1x8xf32> to vector<64x8xf32>
    %174 = arith.addf %171, %173 : vector<64x8xf32>
    %cst_66 = arith.constant dense<0.000000e+00> : vector<8xf32>
    %175 = vector.multi_reduction <add>, %174, %cst_66 [0] : vector<64x8xf32> to vector<8xf32>
    %176 = vector.shape_cast %175 : vector<8xf32> to vector<1x8xf32>
    %cst_67 = arith.constant 6.400000e+01 : f32
    %177 = vector.broadcast %cst_67 : f32 to vector<1x8xf32>
    %178 = arith.divf %176, %177 : vector<1x8xf32>
    %179 = vector.broadcast %178 : vector<1x8xf32> to vector<64x8xf32>
    %180 = arith.subf %174, %179 : vector<64x8xf32>
    %181 = arith.mulf %180, %180 : vector<64x8xf32>
    %cst_68 = arith.constant dense<0.000000e+00> : vector<8xf32>
    %182 = vector.multi_reduction <add>, %181, %cst_68 [0] : vector<64x8xf32> to vector<8xf32>
    %183 = vector.shape_cast %182 : vector<8xf32> to vector<1x8xf32>
    %cst_69 = arith.constant 6.400000e+01 : f32
    %184 = vector.broadcast %cst_69 : f32 to vector<1x8xf32>
    %185 = arith.divf %183, %184 : vector<1x8xf32>
    %186 = vector.broadcast %178 : vector<1x8xf32> to vector<64x8xf32>
    %187 = arith.subf %174, %186 : vector<64x8xf32>
    %cst_70 = arith.constant 9.99999974E-6 : f32
    %188 = vector.broadcast %cst_70 : f32 to vector<1x8xf32>
    %189 = arith.addf %185, %188 : vector<1x8xf32>
    %190 = math.rsqrt %189 : vector<1x8xf32>
    %191 = vector.broadcast %190 : vector<1x8xf32> to vector<64x8xf32>
    %192 = arith.mulf %187, %191 : vector<64x8xf32>
    %193 = vector.extract_strided_slice %15 {offsets = [0, 16], sizes = [1, 8], strides = [1, 1]} : vector<1x128xf32> to vector<1x8xf32>
    %194 = vector.broadcast %193 : vector<1x8xf32> to vector<64x8xf32>
    %195 = arith.mulf %192, %194 : vector<64x8xf32>
    %196 = vector.extract_strided_slice %16 {offsets = [0, 16], sizes = [1, 8], strides = [1, 1]} : vector<1x128xf32> to vector<1x8xf32>
    %197 = vector.broadcast %196 : vector<1x8xf32> to vector<64x8xf32>
    %198 = arith.addf %195, %197 : vector<64x8xf32>
    %cst_71 = arith.constant 0.000000e+00 : f32
    %199 = vector.broadcast %cst_71 : f32 to vector<64x8xf32>
    %200 = arith.cmpf ogt, %198, %199 : vector<64x8xf32>
    %201 = math.exp %198 : vector<64x8xf32>
    %cst_72 = arith.constant 1.000000e+00 : f32
    %202 = vector.broadcast %cst_72 : f32 to vector<64x8xf32>
    %203 = arith.subf %201, %202 : vector<64x8xf32>
    %204 = arith.select %200, %198, %203 : vector<64x8xi1>, vector<64x8xf32>
    %205 = vector.extract_strided_slice %5 {offsets = [0, 16], sizes = [64, 8], strides = [1, 1]} : vector<64x128xf32> to vector<64x8xf32>
    %206 = arith.addf %205, %204 : vector<64x8xf32>
    %c0_73 = arith.constant 0 : index
    %c16 = arith.constant 16 : index
    %207 = vector.load %arg11[%c0_73, %c16] : memref<64x128xf32, #tpu.memory_space<vmem>>, vector<64x8xf32>
    tpu.vector_store %arg11[%c0_73, %c16], %206 {strides = array<i32>} : memref<64x128xf32, #tpu.memory_space<vmem>>, vector<64x8xf32>,
    %208 = vector.extract_strided_slice %9 {offsets = [0, 3], sizes = [64, 1], strides = [1, 1]} : vector<64x4xf32> to vector<64x1xf32>
    %209 = vector.extract_strided_slice %11 {offsets = [3, 0], sizes = [1, 64], strides = [1, 1]} : vector<4x64xf32> to vector<1x64xf32>
    %210 = vector.broadcast %208 : vector<64x1xf32> to vector<64x64xf32>
    %211 = vector.broadcast %209 : vector<1x64xf32> to vector<64x64xf32>
    %212 = arith.addf %210, %211 : vector<64x64xf32>
    %cst_74 = arith.constant 0.000000e+00 : f32
    %213 = vector.broadcast %cst_74 : f32 to vector<64x64xf32>
    %214 = arith.cmpf ogt, %212, %213 : vector<64x64xf32>
    %cst_75 = arith.constant 2.000000e-01 : f32
    %215 = vector.broadcast %cst_75 : f32 to vector<64x64xf32>
    %216 = arith.mulf %215, %212 : vector<64x64xf32>
    %217 = arith.select %214, %212, %216 : vector<64x64xi1>, vector<64x64xf32>
    %cst_76 = arith.constant 0.000000e+00 : f32
    %218 = vector.broadcast %cst_76 : f32 to vector<64x64xf32>
    %219 = arith.cmpf ogt, %13, %218 : vector<64x64xf32>
    %cst_77 = arith.constant -1.000000e+30 : f32
    %220 = vector.broadcast %cst_77 : f32 to vector<64x64xf32>
    %221 = arith.select %219, %217, %220 : vector<64x64xi1>, vector<64x64xf32>
    %cst_78 = arith.constant dense<0xFF800000> : vector<64xf32>
    %222 = vector.multi_reduction <maximumf>, %221, %cst_78 [1] : vector<64x64xf32> to vector<64xf32>
    %223 = vector.shape_cast %222 : vector<64xf32> to vector<64x1xf32>
    %224 = vector.broadcast %223 : vector<64x1xf32> to vector<64x64xf32>
    %225 = arith.subf %221, %224 : vector<64x64xf32>
    %226 = math.exp %225 : vector<64x64xf32>
    %cst_79 = arith.constant dense<0.000000e+00> : vector<64xf32>
    %227 = vector.multi_reduction <add>, %226, %cst_79 [1] : vector<64x64xf32> to vector<64xf32>
    %228 = vector.shape_cast %227 : vector<64xf32> to vector<64x1xf32>
    %cst_80 = arith.constant 1.000000e+00 : f32
    %229 = vector.broadcast %cst_80 : f32 to vector<64x1xf32>
    %230 = arith.divf %229, %228 : vector<64x1xf32>
    %231 = vector.broadcast %230 : vector<64x1xf32> to vector<64x64xf32>
    %232 = arith.mulf %226, %231 : vector<64x64xf32>
    %233 = vector.extract_strided_slice %7 {offsets = [0, 24], sizes = [64, 8], strides = [1, 1]} : vector<64x128xf32> to vector<64x8xf32>
    %cst_81 = arith.constant dense<0.000000e+00> : vector<64x8xf32>
    %234 = tpu.matmul %232, %233, %cst_81 {dimension_numbers = #tpu.dot_dimension_numbers<[1], [0], [0], [1], [0, 0, 1, 1], [], []>} : vector<64x64xf32>, vector<64x8xf32>, vector<64x8xf32> -> vector<64x8xf32>
    %235 = vector.extract_strided_slice %14 {offsets = [0, 24], sizes = [1, 8], strides = [1, 1]} : vector<1x128xf32> to vector<1x8xf32>
    %236 = vector.broadcast %235 : vector<1x8xf32> to vector<64x8xf32>
    %237 = arith.addf %234, %236 : vector<64x8xf32>
    %cst_82 = arith.constant dense<0.000000e+00> : vector<8xf32>
    %238 = vector.multi_reduction <add>, %237, %cst_82 [0] : vector<64x8xf32> to vector<8xf32>
    %239 = vector.shape_cast %238 : vector<8xf32> to vector<1x8xf32>
    %cst_83 = arith.constant 6.400000e+01 : f32
    %240 = vector.broadcast %cst_83 : f32 to vector<1x8xf32>
    %241 = arith.divf %239, %240 : vector<1x8xf32>
    %242 = vector.broadcast %241 : vector<1x8xf32> to vector<64x8xf32>
    %243 = arith.subf %237, %242 : vector<64x8xf32>
    %244 = arith.mulf %243, %243 : vector<64x8xf32>
    %cst_84 = arith.constant dense<0.000000e+00> : vector<8xf32>
    %245 = vector.multi_reduction <add>, %244, %cst_84 [0] : vector<64x8xf32> to vector<8xf32>
    %246 = vector.shape_cast %245 : vector<8xf32> to vector<1x8xf32>
    %cst_85 = arith.constant 6.400000e+01 : f32
    %247 = vector.broadcast %cst_85 : f32 to vector<1x8xf32>
    %248 = arith.divf %246, %247 : vector<1x8xf32>
    %249 = vector.broadcast %241 : vector<1x8xf32> to vector<64x8xf32>
    %250 = arith.subf %237, %249 : vector<64x8xf32>
    %cst_86 = arith.constant 9.99999974E-6 : f32
    %251 = vector.broadcast %cst_86 : f32 to vector<1x8xf32>
    %252 = arith.addf %248, %251 : vector<1x8xf32>
    %253 = math.rsqrt %252 : vector<1x8xf32>
    %254 = vector.broadcast %253 : vector<1x8xf32> to vector<64x8xf32>
    %255 = arith.mulf %250, %254 : vector<64x8xf32>
    %256 = vector.extract_strided_slice %15 {offsets = [0, 24], sizes = [1, 8], strides = [1, 1]} : vector<1x128xf32> to vector<1x8xf32>
    %257 = vector.broadcast %256 : vector<1x8xf32> to vector<64x8xf32>
    %258 = arith.mulf %255, %257 : vector<64x8xf32>
    %259 = vector.extract_strided_slice %16 {offsets = [0, 24], sizes = [1, 8], strides = [1, 1]} : vector<1x128xf32> to vector<1x8xf32>
    %260 = vector.broadcast %259 : vector<1x8xf32> to vector<64x8xf32>
    %261 = arith.addf %258, %260 : vector<64x8xf32>
    %cst_87 = arith.constant 0.000000e+00 : f32
    %262 = vector.broadcast %cst_87 : f32 to vector<64x8xf32>
    %263 = arith.cmpf ogt, %261, %262 : vector<64x8xf32>
    %264 = math.exp %261 : vector<64x8xf32>
    %cst_88 = arith.constant 1.000000e+00 : f32
    %265 = vector.broadcast %cst_88 : f32 to vector<64x8xf32>
    %266 = arith.subf %264, %265 : vector<64x8xf32>
    %267 = arith.select %263, %261, %266 : vector<64x8xi1>, vector<64x8xf32>
    %268 = vector.extract_strided_slice %5 {offsets = [0, 24], sizes = [64, 8], strides = [1, 1]} : vector<64x128xf32> to vector<64x8xf32>
    %269 = arith.addf %268, %267 : vector<64x8xf32>
    %c0_89 = arith.constant 0 : index
    %c24 = arith.constant 24 : index
    %270 = vector.load %arg11[%c0_89, %c24] : memref<64x128xf32, #tpu.memory_space<vmem>>, vector<64x8xf32>
    tpu.vector_store %arg11[%c0_89, %c24], %269 {strides = array<i32>} : memref<64x128xf32, #tpu.memory_space<vmem>>, vector<64x8xf32>,
    return
  }
  func.func @transform_0(%arg0: i32) -> (i32, i32) {
    %c0_i32 = arith.constant 0 : i32
    %c0_i32_0 = arith.constant 0 : i32
    %c0_i32_1 = arith.constant 0 : i32
    return %c0_i32, %c0_i32_0 : i32, i32
  }
  func.func @transform_1(%arg0: i32) -> (i32, i32) {
    %c0_i32 = arith.constant 0 : i32
    %c0_i32_0 = arith.constant 0 : i32
    %c0_i32_1 = arith.constant 0 : i32
    return %c0_i32, %c0_i32_0 : i32, i32
  }
  func.func @transform_2(%arg0: i32) -> (i32, i32) {
    %c0_i32 = arith.constant 0 : i32
    %c0_i32_0 = arith.constant 0 : i32
    %c0_i32_1 = arith.constant 0 : i32
    return %c0_i32, %c0_i32_0 : i32, i32
  }
  func.func @transform_3(%arg0: i32) -> (i32, i32) {
    %c0_i32 = arith.constant 0 : i32
    %c0_i32_0 = arith.constant 0 : i32
    %c0_i32_1 = arith.constant 0 : i32
    return %c0_i32, %c0_i32_0 : i32, i32
  }
  func.func @transform_4(%arg0: i32) -> (i32, i32) {
    %c0_i32 = arith.constant 0 : i32
    %c0_i32_0 = arith.constant 0 : i32
    %c0_i32_1 = arith.constant 0 : i32
    return %c0_i32, %c0_i32_0 : i32, i32
  }
  func.func @transform_5(%arg0: i32) -> (i32, i32) {
    %c0_i32 = arith.constant 0 : i32
    %c0_i32_0 = arith.constant 0 : i32
    %c0_i32_1 = arith.constant 0 : i32
    return %c0_i32, %c0_i32_0 : i32, i32
  }
  func.func @transform_6(%arg0: i32) -> (i32, i32) {
    %c0_i32 = arith.constant 0 : i32
    %c0_i32_0 = arith.constant 0 : i32
    %c0_i32_1 = arith.constant 0 : i32
    return %c0_i32, %c0_i32_0 : i32, i32
  }
  func.func @transform_7(%arg0: i32) -> (i32, i32) {
    %c0_i32 = arith.constant 0 : i32
    %c0_i32_0 = arith.constant 0 : i32
    %c0_i32_1 = arith.constant 0 : i32
    return %c0_i32, %c0_i32_0 : i32, i32
  }
  func.func @transform_8(%arg0: i32) -> (i32, i32) {
    %c0_i32 = arith.constant 0 : i32
    %c0_i32_0 = arith.constant 0 : i32
    %c0_i32_1 = arith.constant 0 : i32
    return %c0_i32, %c0_i32_0 : i32, i32
  }
  func.func @transform_9(%arg0: i32) -> (i32, i32) {
    %c0_i32 = arith.constant 0 : i32
    %c0_i32_0 = arith.constant 0 : i32
    %c0_i32_1 = arith.constant 0 : i32
    return %c0_i32, %c0_i32_0 : i32, i32
  }
  func.func @transform_10(%arg0: i32) -> (i32, i32) {
    %c0_i32 = arith.constant 0 : i32
    %c0_i32_0 = arith.constant 0 : i32
    %c0_i32_1 = arith.constant 0 : i32
    return %c0_i32, %c0_i32_0 : i32, i32
  }
}

</mosaic_0001>

<bundles_post_ra>
// kernel: tpu_custom_call.1
= control target key start
LH: loop header
LB: loop body
LE: loop exit
PB: predicated region body
PF: predicated region fallthrough
CT: control target
= control target key end

     0   :  { %vm53_vm0 = vcmask 130048   ;;  %s5114_s0 = inlined_call_operand.vmem [shape: f32[64,16], index: 0, kind: input, shape index: {}]   ;;  %s5115_s1 = inlined_call_operand.vmem [shape: f32[16,128], index: 1, kind: input, shape index: {}]   ;;  %s5116_s2 = inlined_call_operand.vmem [shape: f32[1,128], index: 2, kind: input, shape index: {}]   ;;  %s5117_s3 = inlined_call_operand.vmem [shape: f32[128,128], index: 3, kind: input, shape index: {}]   ;;  %s5118_s4 = inlined_call_operand.vmem [shape: f32[4,128], index: 4, kind: input, shape index: {}]   ;;  %s5119_s5 = inlined_call_operand.vmem [shape: f32[128,4], index: 5, kind: input, shape index: {}]   ;;  %s5120_s6 = inlined_call_operand.vmem [shape: s8[64,64], index: 6, kind: input, shape index: {}]   ;;  %s5121_s7 = inlined_call_operand.vmem [shape: f32[1,128], index: 7, kind: input, shape index: {}]   ;;  %s5122_s8 = inlined_call_operand.vmem [shape: f32[1,128], index: 8, kind: input, shape index: {}]   ;;  %s5123_s9 = inlined_call_operand.vmem [shape: f32[1,128], index: 9, kind: input, shape index: {}]   ;;  %s5124_s10 = inlined_call_operand.hbm [shape: f32[64,128], index: 10, kind: output, shape index: {}]  }
   0x1   :  { %v44_v0 = vld [vmem:[%s5115_s1] sm:$0xff]  ;;  %v45_v1 = vld [vmem:[%s5115_s1 + $0x8] sm:$0xff]  ;;  %v38_v5 = vld [vmem:[%s5114_s0 + $0x10] sm:$0xff] }
   0x2   :  { %v36_v2 = vld [vmem:[%s5114_s0] sm:$0xff]  ;;  %v2998_v3 = vpack.c.bf16 %v45_v1, %v44_v0  ;;  %v37_v4 = vld [vmem:[%s5114_s0 + $0x8] sm:$0xff]  ;;  %v185_v9 = vld [vmem:[%s5117_s3 + $0x10] sm:$0xff] }
   0x3   :  { %2767 = vmatprep.mubr.msk.f32.mxu0 %vm53_vm0, %v36_v2  ;;  %v183_v6 = vld [vmem:[%s5117_s3] sm:$0xff]  ;;  %v184_v7 = vld [vmem:[%s5117_s3 + $0x8] sm:$0xff]  ;;  %v186_v10 = vld [vmem:[%s5117_s3 + $0x18] sm:$0xff] }
   0x4   :  { %2999 = vmatprep.subr.bf16.mxu0 %v2998_v3  ;;  %v3002_v8 = vpack.c.bf16 %v184_v7, %v183_v6  ;;  %v304_v11 = vld [vmem:[%s5119_s5] sm:$0xff]  ;;  %v3006_v12 = vpack.c.bf16 %v186_v10, %v185_v9  ;;  %v305_v13 = vld [vmem:[%s5119_s5 + $0x8] sm:$0xff]  ;;  %v306_v17 = vld [vmem:[%s5119_s5 + $0x10] sm:$0xff] }
   0x5   :  { %3001 = vmatpush3.bf16.msra.mxu0 %v2998_v3  ;;  %v187_v14 = vld [vmem:[%s5117_s3 + $0x20] sm:$0xff]  ;;  %v188_v15 = vld [vmem:[%s5117_s3 + $0x28] sm:$0xff]  ;;  %v3034_v16 = vpack.c.bf16 %v305_v13, %v304_v11  ;;  %v307_v18 = vld [vmem:[%s5119_s5 + $0x18] sm:$0xff] }
   0x6   :  { %3003 = vmatprep.subr.bf16.mxu1 %v3002_v8  ;;  %v39_v19 = vld [vmem:[%s5114_s0 + $0x18] sm:$0xff]  ;;  %v3010_v20 = vpack.c.bf16 %v188_v15, %v187_v14  ;;  %v40_v21 = vld [vmem:[%s5114_s0 + $0x20] sm:$0xff]  ;;  %v3038_v22 = vpack.c.bf16 %v307_v18, %v306_v17  ;;  %v189_v23 = vld [vmem:[%s5117_s3 + $0x30] sm:$0xff] }
   0x7   :  { %3005 = vmatpush3.bf16.msra.mxu1 %v3002_v8  ;;  %3035 = vmatprep.subr.bf16.mxu0 %v3034_v16  ;;  %v190_v24 = vld [vmem:[%s5117_s3 + $0x38] sm:$0xff]  ;;  %v308_v25 = vld [vmem:[%s5119_s5 + $0x20] sm:$0xff]  ;;  %v309_v26 = vld [vmem:[%s5119_s5 + $0x28] sm:$0xff] }
   0x8   :  { %2768 = vmatmul.mubr.msk.f32.vlgmr.msra.gmra.mrb[0].mxu0 %vm53_vm0, %v37_v4  ;;  %3007 = vmatprep.subr.bf16.mxu1 %v3006_v12  ;;  %v41_v27 = vld [vmem:[%s5114_s0 + $0x28] sm:$0xff]  ;;  %v42_v28 = vld [vmem:[%s5114_s0 + $0x30] sm:$0xff]  ;;  %v3014_v29 = vpack.c.bf16 %v190_v24, %v189_v23  ;;  %v191_v30 = vld [vmem:[%s5117_s3 + $0x40] sm:$0xff]  ;;  %v3042_v32 = vpack.c.bf16 %v309_v26, %v308_v25 }
   0x9   :  { %2770 = vmatprep.mubr.msk.f32.mxu0 %vm53_vm0, %v38_v5  ;;  %3037 = vmatpush3.bf16.msra.mxu0 %v3034_v16  ;;  %v192_v31 = vld [vmem:[%s5117_s3 + $0x48] sm:$0xff]  ;;  %v310_v33 = vld [vmem:[%s5119_s5 + $0x30] sm:$0xff]  ;;  %v311_v34 = vld [vmem:[%s5119_s5 + $0x38] sm:$0xff] }
   0xa   :  { %3039 = vmatprep.subr.bf16.mxu0 %v3038_v22 }
   0xb   :  { %3009 = vmatpush3.bf16.msra.mxu1 %v3006_v12 }
   0xc   :  { %2771 = vmatmul.mubr.msk.f32.gmra.mrb[2].mxu0 %vm53_vm0, %v39_v19  ;;  %3011 = vmatprep.subr.bf16.mxu1 %v3010_v20 }
   0xd   :  { %2773 = vmatprep.mubr.msk.f32.mxu0 %vm53_vm0, %v40_v21 }
   0xe   :  { %15 = vsyncpa [#allocation3], 0  ;;  %3041 = vmatpush3.bf16.msra.mxu0 %v3038_v22  ;;  %v43_v35 = vld [vmem:[%s5114_s0 + $0x38] sm:$0xff]  ;;  %v3018_v36 = vpack.c.bf16 %v192_v31, %v191_v30  ;;  %v3046_v37 = vpack.c.bf16 %v311_v34, %v310_v33  ;;  %v312_v38 = vld [vmem:[%s5119_s5 + $0x40] sm:$0xff]  ;;  %v3472_v59 = vmov 0.0|0.0   ;;  %v3473_v60 = vmov 0.0  }
   0xf   :  { %3013 = vmatpush3.bf16.msra.mxu1 %v3010_v20  ;;  %v313_v39 = vld [vmem:[%s5119_s5 + $0x48] sm:$0xff]  ;;  %3043 = vmatprep.subr.bf16.mxu0 %v3042_v32  ;;  %v193_v40 = vld [vmem:[%s5117_s3 + $0x50] sm:$0xff]  ;;  %v194_v41 = vld [vmem:[%s5117_s3 + $0x58] sm:$0xff]  ;;  %517 = vst [vmem:[#allocation2] sm:$0xff] %v3473_v60  ;;  %v3474_v61 = vmov 1   ;;  %v3475_v62 = vmov 0  }
  0x10   :  { %2774 = vmatmul.mubr.msk.f32.gmra.mrb[4].mxu0 %vm53_vm0, %v41_v27  ;;  %3015 = vmatprep.subr.bf16.mxu1 %v3014_v29  ;;  %v3050_v42 = vpack.c.bf16 %v313_v39, %v312_v38  ;;  %v3022_v43 = vpack.c.bf16 %v194_v41, %v193_v40  ;;  %v314_v44 = vld [vmem:[%s5119_s5 + $0x50] sm:$0xff]  ;;  %v315_v45 = vld [vmem:[%s5119_s5 + $0x58] sm:$0xff]  ;;  %v195_v46 = vld [vmem:[%s5117_s3 + $0x60] sm:$0xff]  ;;  %518 = vst [vmem:[#allocation2 + $0x8] sm:$0xff] %v3473_v60  ;;  %vm3476_vm1 = vmmov 0   ;;  %v3478_v30 = vmov 2  }
  0x11   :  { %2776 = vmatprep.mubr.msk.f32.mxu0 %vm53_vm0, %v42_v28  ;;  %v196_v47 = vld [vmem:[%s5117_s3 + $0x68] sm:$0xff]  ;;  %v3054_v48 = vpack.c.bf16 %v315_v45, %v314_v44  ;;  %v316_v50 = vld [vmem:[%s5119_s5 + $0x60] sm:$0xff]  ;;  %v197_v52 = vld [vmem:[%s5117_s3 + $0x70] sm:$0xff]  ;;  %519 = vst [vmem:[#allocation2 + $0x10] sm:$0xff] %v3473_v60  ;;  %3158 = vset.pattern.permute.xlu1 %v3474_v61  ;;  %s3480_s13 = smov 112   ;;  %vm617_vm5 = vcmask 523264  }
  0x12   :  { %3045 = vmatpush3.bf16.msra.mxu0 %v3042_v32  ;;  %v3026_v49 = vpack.c.bf16 %v196_v47, %v195_v46  ;;  %v317_v51 = vld [vmem:[%s5119_s5 + $0x68] sm:$0xff]  ;;  %v198_v53 = vld [vmem:[%s5117_s3 + $0x78] sm:$0xff]  ;;  %v318_v56 = vld [vmem:[%s5119_s5 + $0x70] sm:$0xff]  ;;  %520 = vst [vmem:[#allocation2 + $0x18] sm:$0xff] %v3473_v60  ;;  %3157 = vset.pattern.permute.xlu0 %v3475_v62  ;;  %s3484_s22 = smov 24   ;;  %s3485_s23 = smov [#allocation2]  }
  0x13   :  { %3017 = vmatpush3.bf16.msra.mxu1 %v3014_v29  ;;  %3047 = vmatprep.subr.bf16.mxu0 %v3046_v37  ;;  %v3058_v54 = vpack.c.bf16 %v317_v51, %v316_v50  ;;  %v3030_v55 = vpack.c.bf16 %v198_v53, %v197_v52  ;;  %v319_v57 = vld [vmem:[%s5119_s5 + $0x78] sm:$0xff]  ;;  %521 = vst [vmem:[#allocation2 + $0x20] sm:$0xff] %v3473_v60  ;;  %522 = vst [vmem:[#allocation2 + $0x28] sm:$0xff] %v3473_v60  ;;  %v2556_v63 = vld [vmem:[%s5116_s2] ss:$0 sm:$0xff]  ;;  %v3477_v29 = vmov 3  }
  0x14   :  { %2777 = vmatmul.mubr.msk.f32.gmra.mrb[6].mxu0 %vm53_vm0, %v43_v35  ;;  %3019 = vmatprep.subr.bf16.mxu1 %v3018_v36  ;;  %v3062_v58 = vpack.c.bf16 %v319_v57, %v318_v56  ;;  %523 = vst [vmem:[#allocation2 + $0x30] sm:$0xff] %v3473_v60  ;;  %524 = vst [vmem:[#allocation2 + $0x38] sm:$0xff] %v3473_v60  ;;  %v425_v20 = vld [vmem:[%s5118_s4] sm:$0xf]  ;;  %s3479_s4 = smov 120   ;;  %s2545_s24 = sshll.u32 %s3485_s23, 4  ;;  %s2546_s24 = int_to_ptr.vmem [resolvable:$true] %s2545_s24 }
  0x15   :  { %v3792_v51 = vld [vmem:[%s5120_s6] sm:$0xff]  ;;  %s3448_s1 = scalar_lea.vmem %s2546_s24, 1024  ;;  %p3453_p1 = scmp.lt.s32.totalorder %s2546_s24, %s2546_s24 }
  0x16   :  { %3049 = vmatpush3.bf16.msra.mxu0 %v3046_v37  ;;  %p3449_p0 = scmp.ne.s32.totalorder %s2546_s24, %s3448_s1  ;;  %p3454_p2 = scmp.lt.s32.totalorder %s3448_s1, %s3448_s1 }
  0x17   :  { %3021 = vmatpush3.bf16.msra.mxu1 %v3018_v36  ;;  %3051 = vmatprep.subr.bf16.mxu0 %v3050_v42 }
  0x18   :  { %3023 = vmatprep.subr.bf16.mxu1 %v3022_v43  ;;  %p3455_p3 = por %p3454_p2, %p3453_p1 }
  0x1a   :  { %3053 = vmatpush3.bf16.msra.mxu0 %v3050_v42  ;;  %p3456_p4 = pnand %p3455_p3, %p3449_p0 }
  0x1b   :  { %3025 = vmatpush3.bf16.msra.mxu1 %v3022_v43  ;;  %3055 = vmatprep.subr.bf16.mxu0 %v3054_v48 }
  0x1c   :  { %3027 = vmatprep.subr.bf16.mxu1 %v3026_v49 }
  0x1e   :  { %3057 = vmatpush3.bf16.msra.mxu0 %v3054_v48 }
  0x1f   :  { %3029 = vmatpush3.bf16.msra.mxu1 %v3026_v49  ;;  %3059 = vmatprep.subr.bf16.mxu0 %v3058_v54  ;;  %v565_v49 = vlaneseq }
  0x20   :  { %3031 = vmatprep.subr.bf16.mxu1 %v3030_v55 }
  0x21   :  { %v566_v50 = vshrl.u32 %v565_v49, 7 }
  0x22   :  { %3061 = vmatpush3.bf16.msra.mxu0 %v3058_v54  ;;  %v499_v54 = vunpack.c.1.s8 %v3792_v51 }
  0x23   :  { %3033 = vmatpush3.bf16.msra.mxu1 %v3030_v55  ;;  %3063 = vmatprep.subr.bf16.mxu0 %v3062_v58  ;;  %v567_v52 = vsub.s32 0, %v566_v50  ;;  %v1039_v53 = vsub.s32 1, %v566_v50  ;;  %v1556_v57 = vsub.s32 2, %v566_v50 }
  0x24   :  { %3066 = vmatprep.subr.bf16.mxu1 %v3472_v59 }
  0x26   :  { %3065 = vmatpush3.bf16.msra.mxu0 %v3062_v58  ;;  %v2065_v58 = vsub.s32 3, %v566_v50 }
  0xdb   :  { %v2769_v0 = vpop.f32.mrb[0].mxu0 }
  0xdc   :  { %v3681_v1 = vadd.f32 %v2769_v0, %v2556_v63  ;;  %v144_v2 = vpop.f32.mrb[1].mxu0 }
  0xdd   :  { %v3683_v3 = vadd.f32 %v2556_v63, %v144_v2 }
  0xdf   :  { %2811 = vmatprep.mubr.f32.mxu1 %v3683_v3  ;;  %2855 = vmatprep.mubr.f32.mxu0 %v3683_v3  ;;  %v3067_v4 = vpack.c.bf16 %v3681_v1, %v3683_v3  ;;  %v2772_v5 = vpop.f32.mrb[2].mxu0 }
  0xe0   :  { %2812 = vmatmul.mubr.f32.vlgmr.msra.gmra.mrb[0].mxu1 %v3681_v1  ;;  %2856 = vmatmul.mubr.f32.vlgmr.msra.gmra.mrb[8].mxu0 %v3681_v1  ;;  %v3691_v6 = vadd.f32 %v2772_v5, %v2556_v63  ;;  %v154_v7 = vpop.f32.mrb[3].mxu0 }
  0xe1   :  { %3068 = vmatpush3.bf16.xpose.msra.mxu1 %v3067_v4  ;;  %v3693_v8 = vadd.f32 %v2556_v63, %v154_v7 }
  0xe2   :  { %3069 = vmatprep.subr.bf16.mxu1 %v3472_v59 }
  0xe3   :  { %2814 = vmatprep.mubr.f32.mxu1 %v3693_v8  ;;  %2858 = vmatprep.mubr.f32.mxu0 %v3693_v8  ;;  %v2775_v9 = vpop.f32.mrb[4].mxu0  ;;  %v3070_v12 = vpack.c.bf16 %v3691_v6, %v3693_v8 }
  0xe4   :  { %2815 = vmatmul.mubr.f32.gmra.mrb[2].mxu1 %v3691_v6  ;;  %2859 = vmatmul.mubr.f32.gmra.mrb[10].mxu0 %v3691_v6  ;;  %v3699_v10 = vadd.f32 %v2775_v9, %v2556_v63  ;;  %v164_v11 = vpop.f32.mrb[5].mxu0 }
  0xe5   :  { %v3703_v13 = vadd.f32 %v2556_v63, %v164_v11 }
  0xe7   :  { %2817 = vmatprep.mubr.f32.mxu1 %v3703_v13  ;;  %2861 = vmatprep.mubr.f32.mxu0 %v3703_v13  ;;  %v2778_v14 = vpop.f32.mrb[6].mxu0  ;;  %v3073_v18 = vpack.c.bf16 %v3699_v10, %v3703_v13 }
  0xe8   :  { %2818 = vmatmul.mubr.f32.gmra.mrb[4].mxu1 %v3699_v10  ;;  %2862 = vmatmul.mubr.f32.gmra.mrb[12].mxu0 %v3699_v10  ;;  %v3709_v15 = vadd.f32 %v2778_v14, %v2556_v63  ;;  %v174_v16 = vpop.f32.mrb[7].mxu0 }
  0xe9   :  { %3071 = vmatpush3.bf16.xpose.msra.mxu1 %v3070_v12  ;;  %v3711_v17 = vadd.f32 %v2556_v63, %v174_v16  ;;  %v498_v12 = vunpack.c.0.s8 %v3792_v51 }
  0xea   :  { %3072 = vmatprep.subr.bf16.mxu1 %v3472_v59 }
  0xeb   :  { %2864 = vmatprep.mubr.f32.mxu0 %v3711_v17  ;;  %2820 = vmatprep.mubr.f32.mxu1 %v3711_v17  ;;  %v3076_v19 = vpack.c.bf16 %v3709_v15, %v3711_v17 }
  0xec   :  { %2865 = vmatmul.mubr.f32.gmra.mrb[14].mxu0 %v3709_v15  ;;  %2821 = vmatmul.mubr.f32.gmra.mrb[6].mxu1 %v3709_v15 }
  0xed   :  { %2883 = vmatprep.mubr.msk.f32.mxu1 %vm3476_vm1, %v3473_v60 }
  0xf1   :  { %3074 = vmatpush3.bf16.xpose.msra.mxu1 %v3073_v18 }
  0xf2   :  { %3075 = vmatprep.subr.bf16.mxu1 %v3472_v59  ;;  %v507_v59 = vcvt.s32.f32 %v499_v54 }
  0xf4   :  { %vm602_vm2 = vcmp.gt.f32.partialorder %v507_v59, 0.0 }
  0xf9   :  { %3077 = vmatpush3.bf16.xpose.msra.mxu1 %v3076_v19 }
 0x100   :  { %2884 = vmatmul.mubr.f32.vlgmr.msra.gmra.mrb[8].mxu1 %v425_v20 }
 0x1b3   :  { %v2813_v21 = vpop.f32.mrb[0].mxu1  ;;  %v2857_v22 = vpop.f32.mrb[8].mxu0 }
 0x1b4   :  { %1010 = vperm.xlu1 %3158, %v2857_v22   ;;  %532 = vperm.xlu0 %3157, %v2857_v22   ;;  %v265_v23 = vpop.f32.mrb[1].mxu1  ;;  %v386_v24 = vpop.f32.mrb[9].mxu0 }
 0x1b5   :  { %v3078_v25 = vpack.c.bf16 %v2813_v21, %v265_v23  ;;  %v3724_v26 = vpack.i.bf16 %v2813_v21, %v265_v23 }
 0x1b7   :  { %3079 = vmatprep.subr.bf16.mxu0 %v3078_v25  ;;  %v2816_v27 = vpop.f32.mrb[2].mxu1  ;;  %v2860_v28 = vpop.f32.mrb[10].mxu0 }
 0x1b8   :  { %3160 = vset.pattern.permute.xlu1 %v3477_v29  ;;  %3159 = vset.pattern.permute.xlu0 %v3478_v30  ;;  %v275_v31 = vpop.f32.mrb[3].mxu1  ;;  %v396_v32 = vpop.f32.mrb[11].mxu0 }
 0x1b9   :  { %3081 = vmatpush3.bf16.msra.mxu0 %v3078_v25  ;;  %2036 = vperm.xlu1 %3160, %v2857_v22   ;;  %v3728_v33 = vpack.i.bf16 %v2816_v27, %v275_v31  ;;  %v3082_v34 = vpack.c.bf16 %v2816_v27, %v275_v31  ;;  %v3818_v25 = vcvt.s32.f32 %v498_v12 }
 0x1ba   :  { %1527 = vperm.xlu0 %3159, %v2857_v22  }
 0x1bb   :  { %3083 = vmatprep.subr.bf16.mxu0 %v3082_v34  ;;  %v2863_v35 = vpop.f32.mrb[12].mxu0  ;;  %v2819_v36 = vpop.f32.mrb[4].mxu1  ;;  %vm601_vm8 = vcmp.gt.f32.partialorder %v3818_v25, 0.0 }
 0x1bc   :  { %v285_v37 = vpop.f32.mrb[5].mxu1  ;;  %v3730_v38 = vpop.f32.mrb[13].mxu0 }
 0x1bd   :  { %3163 = vset.pattern.permute.xlu1 %v3478_v30  ;;  %3085 = vmatpush3.bf16.msra.mxu0 %v3082_v34  ;;  %v3086_v39 = vpack.c.bf16 %v2819_v36, %v285_v37  ;;  %v3733_v40 = vpack.i.bf16 %v2819_v36, %v285_v37 }
 0x1be   :  { %3161 = vset.pattern.permute.xlu0 %v3475_v62  ;;  %1523 = vperm.xlu1 %3163, %v386_v24  }
 0x1bf   :  { %527 = vperm.xlu0 %3161, %v386_v24   ;;  %3087 = vmatprep.subr.bf16.mxu0 %v3086_v39  ;;  %v3736_v41 = vpop.f32.mrb[14].mxu0  ;;  %v2822_v42 = vpop.f32.mrb[6].mxu1 }
 0x1c0   :  { %v3738_v43 = vpop.f32.mrb[15].mxu0  ;;  %v295_v44 = vpop.f32.mrb[7].mxu1 }
 0x1c1   :  { %3089 = vmatpush3.bf16.msra.mxu0 %v3086_v39  ;;  %v3740_v45 = vpack.i.bf16 %v2822_v42, %v295_v44  ;;  %v3090_v46 = vpack.c.bf16 %v2822_v42, %v295_v44 }
 0x1c2   :  { %3164 = vset.pattern.permute.xlu1 %v3477_v29 }
 0x1c3   :  { %3162 = vset.pattern.permute.xlu0 %v3474_v61  ;;  %2032 = vperm.xlu1 %3164, %v386_v24  }
 0x1c4   :  { %1006 = vperm.xlu0 %3162, %v386_v24   ;;  %3091 = vmatprep.subr.bf16.mxu0 %v3090_v46 }
 0x1c5   :  { %3093 = vmatpush3.bf16.msra.mxu0 %v3090_v46 }
 0x1c7   :  { %3175 = vset.pattern.permute.xlu1 %v3475_v62 }
 0x1c8   :  { %3166 = vrot.lane.b32.xlu0 %v3724_v26, %s3479_s4  ;;  %542 = vperm.xlu1 %3175, %v2860_v28  }
 0x1cc   :  { %3171 = vrot.lane.b32.xlu0 %v3724_v26, %s3480_s13  ;;  %3176 = vset.pattern.permute.xlu1 %v3478_v30 }
 0x1cd   :  { %1535 = vperm.xlu1 %3176, %v2860_v28  }
 0x1d0   :  { %1018 = vperm.xlu0 %3162, %v2860_v28  }
 0x1d1   :  { %3177 = vset.pattern.permute.xlu1 %v3477_v29 }
 0x1d2   :  { %2044 = vperm.xlu1 %3177, %v2860_v28  }
 0x1d3   :  { %v492_v47 = vpop.f32.mrb[8].mxu1 }
 0x1d4   :  { %3180 = vset.pattern.permute.xlu0 %v3478_v30  ;;  %v2885_v48 = vpop.f32.mrb[9].mxu1  ;;  %v3795_v55 = vrot.slane %v492_v47, %v567_v52  ;;  %v3797_v56 = vrot.slane %v492_v47, %v1039_v53  ;;  %v3801_v0 = vrot.slane %v492_v47, %v1556_v57  ;;  %v3803_v2 = vrot.slane %v492_v47, %v2065_v58 }
 0x1d5   :  { %1531 = vperm.xlu0 %3180, %v396_v32  }
 0x1d6   :  { %3178 = vset.pattern.permute.xlu1 %v3475_v62 }
 0x1d7   :  { %537 = vperm.xlu1 %3178, %v396_v32  }
 0x1d9   :  { %3181 = vset.pattern.permute.xlu0 %v3477_v29 }
 0x1da   :  { %2040 = vperm.xlu0 %3181, %v396_v32  }
 0x1db   :  { %3179 = vset.pattern.permute.xlu1 %v3474_v61 }
 0x1dc   :  { %1014 = vperm.xlu1 %3179, %v396_v32  }
 0x1de   :  { %3188 = vset.pattern.permute.xlu0 %v3474_v61 }
 0x1df   :  { %1026 = vperm.xlu0 %3188, %v2863_v35  }
 0x1e0   :  { %3183 = vrot.lane.b32.xlu1 %v3728_v33, %s3479_s4 }
 0x1e1   :  { %3187 = vset.pattern.permute.xlu1 %v3475_v62 }
 0x1e3   :  { %3189 = vset.pattern.permute.xlu0 %v3478_v30 }
 0x1e4   :  { %1543 = vperm.xlu0 %3189, %v2863_v35   ;;  %552 = vperm.xlu1 %3187, %v2863_v35  }
 0x1e8   :  { %3191 = vset.pattern.permute.xlu0 %v3475_v62  ;;  %3190 = vset.pattern.permute.xlu1 %v3477_v29 }
 0x1e9   :  { %547 = vperm.xlu0 %3191, %v3730_v38   ;;  %2052 = vperm.xlu1 %3190, %v2863_v35  }
 0x1ed   :  { %3196 = vrot.lane.b32.xlu0 %v3733_v40, %s3479_s4  ;;  %3192 = vset.pattern.permute.xlu1 %v3474_v61 }
 0x1ee   :  { %1022 = vperm.xlu1 %3192, %v3730_v38   ;;  %3201 = vset.pattern.permute.xlu0 %v3474_v61 }
 0x1f1   :  { %1034 = vperm.xlu0 %3201, %v3736_v41  }
 0x1f2   :  { %3193 = vset.pattern.permute.xlu1 %v3478_v30 }
 0x1f3   :  { %1539 = vperm.xlu1 %3193, %v3730_v38  }
 0x1f5   :  { %3204 = vset.pattern.permute.xlu0 %v3475_v62 }
 0x1f6   :  { %557 = vperm.xlu0 %3204, %v3738_v43  }
 0x1f7   :  { %3194 = vset.pattern.permute.xlu1 %v3477_v29 }
 0x1f8   :  { %2048 = vperm.xlu1 %3194, %v3730_v38   ;;  %v501_v38 = vunpack.c.3.s8 %v3792_v51 }
 0x1fa   :  { %3206 = vset.pattern.permute.xlu0 %v3478_v30  ;;  %v3840_v49 = vcvt.s32.f32 %v501_v38 }
 0x1fb   :  { %1547 = vperm.xlu0 %3206, %v3738_v43  }
 0x1fc   :  { %3200 = vset.pattern.permute.xlu1 %v3475_v62  ;;  %vm604_vm12 = vcmp.gt.f32.partialorder %v3840_v49, 0.0 }
 0x1fd   :  { %562 = vperm.xlu1 %3200, %v3736_v41  }
 0x1ff   :  { %3207 = vset.pattern.permute.xlu0 %v3477_v29 }
 0x200   :  { %2056 = vperm.xlu0 %3207, %v3738_v43  }
 0x201   :  { %3202 = vset.pattern.permute.xlu1 %v3478_v30 }
 0x202   :  { %1551 = vperm.xlu1 %3202, %v3736_v41  }
 0x206   :  { %3203 = vset.pattern.permute.xlu1 %v3477_v29 }
 0x207   :  { %2060 = vperm.xlu1 %3203, %v3736_v41  }
 0x20b   :  { %3205 = vset.pattern.permute.xlu1 %v3474_v61 }
 0x20c   :  { %1030 = vperm.xlu1 %3205, %v3738_v43  }
 0x210   :  { %3209 = vrot.lane.b32.xlu1 %v3740_v45, %s3479_s4 }
 0x233   :  { %v1011_v60 = vpop.permute.xlu1 %1010  ;;  %v533_v61 = vpop.permute.xlu0 %532 }
 0x234   :  { %v1042_v62 = vadd.f32 %v3797_v56, %v1011_v60  ;;  %v570_v63 = vadd.f32 %v3795_v55, %v533_v61 }
 0x236   :  { %v1058_v4 = vmul.f32 0.2, %v1042_v62  ;;  %v586_v5 = vmul.f32 0.2, %v570_v63  ;;  %vm1050_vm3 = vcmp.gt.f32.partialorder %v1042_v62, 0.0  ;;  %vm578_vm4 = vcmp.gt.f32.partialorder %v570_v63, 0.0 }
 0x238   :  { %v2037_v7 = vpop.permute.xlu1 %2036  ;;  %v1066_v9 = vsel %vm1050_vm3, %v1042_v62, %v1058_v4  ;;  %v594_v11 = vsel %vm578_vm4, %v570_v63, %v586_v5 }
 0x239   :  { %v2068_v14 = vadd.f32 %v3803_v2, %v2037_v7  ;;  %v1528_v16 = vpop.permute.xlu0 %1527  ;;  %v3808_v18 = vsel %vm602_vm2, %v1066_v9, -1e+30  ;;  %v3811_v19 = vsel %vm602_vm2, %v594_v11, -1e+30 }
 0x23a   :  { %v1559_v20 = vadd.f32 %v3801_v0, %v1528_v16  ;;  %v1084_v21 = vsel %vm617_vm5, %v3808_v18, -inf  ;;  %v621_v22 = vsel %vm617_vm5, %v3811_v19, -inf }
 0x23b   :  { %v2084_v23 = vmul.f32 0.2, %v2068_v14  ;;  %1085 = vmax.xlane.f32.xlu1 %v1084_v21  ;;  %622 = vmax.xlane.f32.xlu0 %v621_v22  ;;  %vm2076_vm6 = vcmp.gt.f32.partialorder %v2068_v14, 0.0 }
 0x23c   :  { %v1575_v24 = vmul.f32 0.2, %v1559_v20  ;;  %vm1567_vm7 = vcmp.gt.f32.partialorder %v1559_v20, 0.0 }
 0x23d   :  { %v1524_v27 = vpop.permute.xlu1 %1523  ;;  %v2092_v30 = vsel %vm2076_vm6, %v2068_v14, %v2084_v23 }
 0x23e   :  { %v528_v28 = vpop.permute.xlu0 %527  ;;  %v1583_v29 = vsel %vm1567_vm7, %v1559_v20, %v1575_v24  ;;  %v1558_v31 = vadd.f32 %v3801_v0, %v1524_v27  ;;  %v3829_v37 = vsel %vm602_vm2, %v2092_v30, -1e+30 }
 0x23f   :  { %v569_v32 = vadd.f32 %v3795_v55, %v528_v28  ;;  %v3823_v34 = vsel %vm602_vm2, %v1583_v29, -1e+30  ;;  %v2110_v47 = vsel %vm617_vm5, %v3829_v37, -inf }
 0x240   :  { %v1601_v35 = vsel %vm617_vm5, %v3823_v34, -inf  ;;  %v1574_v41 = vmul.f32 0.2, %v1558_v31  ;;  %vm1566_vm10 = vcmp.gt.f32.partialorder %v1558_v31, 0.0 }
 0x241   :  { %v585_v36 = vmul.f32 0.2, %v569_v32  ;;  %1602 = vmax.xlane.f32.xlu1 %v1601_v35  ;;  %vm577_vm9 = vcmp.gt.f32.partialorder %v569_v32, 0.0 }
 0x242   :  { %v2033_v39 = vpop.permute.xlu1 %2032  ;;  %v1582_v58 = vsel %vm1566_vm10, %v1558_v31, %v1574_v41  ;;  %v500_v41 = vunpack.c.2.s8 %v3792_v51 }
 0x243   :  { %v2067_v42 = vadd.f32 %v3803_v2, %v2033_v39  ;;  %v1007_v43 = vpop.permute.xlu0 %1006  ;;  %v593_v44 = vsel %vm577_vm9, %v569_v32, %v585_v36  ;;  %v3856_v11 = vsel %vm601_vm8, %v1582_v58, -1e+30 }
 0x244   :  { %v1041_v46 = vadd.f32 %v3797_v56, %v1007_v43  ;;  %v3838_v48 = vsel %vm601_vm8, %v593_v44, -1e+30  ;;  %v1598_v24 = vsel %vm617_vm5, %v3856_v11, -inf  ;;  %v508_v51 = vcvt.s32.f32 %v500_v41 }
 0x245   :  { %2111 = vmax.xlane.f32.xlu1 %v2110_v47  ;;  %v2083_v52 = vmul.f32 0.2, %v2067_v42  ;;  %v618_v57 = vsel %vm617_vm5, %v3838_v48, -inf  ;;  %vm2075_vm13 = vcmp.gt.f32.partialorder %v2067_v42, 0.0 }
 0x246   :  { %v1057_v50 = vmul.f32 0.2, %v1041_v46  ;;  %vm1049_vm11 = vcmp.gt.f32.partialorder %v1041_v46, 0.0  ;;  %vm603_vm3 = vcmp.gt.f32.partialorder %v508_v51, 0.0 }
 0x247   :  { %v3167_v53 = vpop.permute.xlu0 %3166  ;;  %v543_v54 = vpop.permute.xlu1 %542  ;;  %v2091_v21 = vsel %vm2075_vm13, %v2067_v42, %v2083_v52 }
 0x248   :  { %v3169_v59 = vunpack.i.h.bf16 %v3167_v53  ;;  %v3168_v60 = vunpack.i.l.bf16 %v3167_v53  ;;  %v572_v61 = vadd.f32 %v3795_v55, %v543_v54  ;;  %v1065_v62 = vsel %vm1049_vm11, %v1041_v46, %v1057_v50 }
 0x249   :  { %619 = vmax.xlane.f32.xlu1 %v618_v57  ;;  %v3847_v63 = vsel %vm601_vm8, %v1065_v62, -1e+30  ;;  %v3870_v30 = vsel %vm601_vm8, %v2091_v21, -1e+30 }
 0x24a   :  { %v588_v4 = vmul.f32 0.2, %v572_v61  ;;  %v1081_v5 = vsel %vm617_vm5, %v3847_v63, -inf  ;;  %v3852_v7 = vpack.c.bf16 %v3169_v59, %v3168_v60  ;;  %vm580_vm14 = vcmp.gt.f32.partialorder %v572_v61, 0.0 }
 0x24b   :  { %v3172_v9 = vpop.permute.xlu0 %3171  ;;  %1082 = vmax.xlane.f32.xlu0 %v1081_v5  ;;  %v2107_v39 = vsel %vm617_vm5, %v3870_v30, -inf }
 0x24c   :  { %v3174_v12 = vunpack.i.h.bf16 %v3172_v9  ;;  %v3173_v14 = vunpack.i.l.bf16 %v3172_v9  ;;  %3095 = vmatprep.subr.bf16.mxu0 %v3852_v7  ;;  %v1536_v16 = vpop.permute.xlu1 %1535  ;;  %v596_v20 = vsel %vm580_vm14, %v572_v61, %v588_v4 }
 0x24d   :  { %v1561_v22 = vadd.f32 %v3801_v0, %v1536_v16  ;;  %v3862_v23 = vsel %vm604_vm12, %v596_v20, -1e+30  ;;  %v3903_v16 = vld [vmem:[%s5120_s6 + $0x8] sm:$0xff]  ;;  %s3481_s6 = smov 104  }
 0x24e   :  { %v3110_v27 = vpack.c.bf16 %v3174_v12, %v3173_v14  ;;  %v627_v28 = vsel %vm617_vm5, %v3862_v23, -inf }
 0x24f   :  { %v1019_v29 = vpop.permute.xlu0 %1018  ;;  %1599 = vmax.xlane.f32.xlu0 %v1598_v24  ;;  %628 = vmax.xlane.f32.xlu1 %v627_v28  ;;  %v1577_v31 = vmul.f32 0.2, %v1561_v22  ;;  %vm1569_vm15 = vcmp.gt.f32.partialorder %v1561_v22, 0.0 }
 0x250   :  { %v1044_v32 = vadd.f32 %v3797_v56, %v1019_v29  ;;  %3111 = vmatprep.subr.bf16.mxu1 %v3110_v27 }
 0x251   :  { %3113 = vmatpush3.bf16.msra.mxu1 %v3110_v27  ;;  %v2045_v35 = vpop.permute.xlu1 %2044  ;;  %v1585_v44 = vsel %vm1569_vm15, %v1561_v22, %v1577_v31  ;;  %v503_v27 = vunpack.c.1.s8 %v3903_v16 }
 0x252   :  { %v1060_v36 = vmul.f32 0.2, %v1044_v32  ;;  %v2070_v38 = vadd.f32 %v3803_v2, %v2045_v35  ;;  %vm1052_vm0 = vcmp.gt.f32.partialorder %v1044_v32, 0.0  ;;  %v3886_v53 = vsel %vm604_vm12, %v1585_v44, -1e+30 }
 0x253   :  { %2108 = vmax.xlane.f32.xlu0 %v2107_v39  ;;  %v1607_v60 = vsel %vm617_vm5, %v3886_v53, -inf }
 0x254   :  { %v2086_v25 = vmul.f32 0.2, %v2070_v38  ;;  %v1532_v42 = vpop.permute.xlu0 %1531  ;;  %v1068_v43 = vsel %vm1052_vm0, %v1044_v32, %v1060_v36  ;;  %vm2078_vm1 = vcmp.gt.f32.partialorder %v2070_v38, 0.0 }
 0x255   :  { %v3879_v46 = vsel %vm604_vm12, %v1068_v43, -1e+30  ;;  %v1560_v54 = vadd.f32 %v3801_v0, %v1532_v42  ;;  %v502_v42 = vunpack.c.0.s8 %v3903_v16 }
 0x256   :  { %v538_v47 = vpop.permute.xlu1 %537  ;;  %v1090_v50 = vsel %vm617_vm5, %v3879_v46, -inf  ;;  %v2094_v57 = vsel %vm2078_vm1, %v2070_v38, %v2086_v25  ;;  %v511_v25 = vcvt.s32.f32 %v503_v27 }
 0x257   :  { %v571_v52 = vadd.f32 %v3795_v55, %v538_v47  ;;  %1091 = vmax.xlane.f32.xlu1 %v1090_v50  ;;  %v3893_v4 = vsel %vm604_vm12, %v2094_v57, -1e+30  ;;  %v1576_v5 = vmul.f32 0.2, %v1560_v54  ;;  %vm1568_vm4 = vcmp.gt.f32.partialorder %v1560_v54, 0.0 }
 0x258   :  { %v2116_v22 = vsel %vm617_vm5, %v3893_v4, -inf  ;;  %vm606_vm10 = vcmp.gt.f32.partialorder %v511_v25, 0.0 }
 0x259   :  { %v587_v58 = vmul.f32 0.2, %v571_v52  ;;  %v2041_v59 = vpop.permute.xlu0 %2040  ;;  %vm579_vm2 = vcmp.gt.f32.partialorder %v571_v52, 0.0  ;;  %v1584_v32 = vsel %vm1568_vm4, %v1560_v54, %v1576_v5 }
 0x25a   :  { %v2069_v9 = vadd.f32 %v3803_v2, %v2041_v59  ;;  %v3919_v41 = vsel %vm603_vm3, %v1584_v32, -1e+30 }
 0x25b   :  { %1608 = vmax.xlane.f32.xlu1 %v1607_v60  ;;  %v1015_v61 = vpop.permute.xlu1 %1014  ;;  %v595_v62 = vsel %vm579_vm2, %v571_v52, %v587_v58  ;;  %v1604_v54 = vsel %vm617_vm5, %v3919_v41, -inf  ;;  %v510_v58 = vcvt.s32.f32 %v502_v42 }
 0x25c   :  { %v1043_v12 = vadd.f32 %v3797_v56, %v1015_v61  ;;  %v3898_v14 = vsel %vm603_vm3, %v595_v62, -1e+30  ;;  %v2085_v28 = vmul.f32 0.2, %v2069_v9  ;;  %vm2077_vm7 = vcmp.gt.f32.partialorder %v2069_v9, 0.0 }
 0x25d   :  { %v624_v20 = vsel %vm617_vm5, %v3898_v14, -inf  ;;  %vm605_vm13 = vcmp.gt.f32.partialorder %v510_v58, 0.0 }
 0x25e   :  { %v1059_v49 = vmul.f32 0.2, %v1043_v12  ;;  %v1027_v21 = vpop.permute.xlu0 %1026  ;;  %625 = vmax.xlane.f32.xlu0 %v624_v20  ;;  %vm1051_vm6 = vcmp.gt.f32.partialorder %v1043_v12, 0.0  ;;  %v2093_v50 = vsel %vm2077_vm7, %v2069_v9, %v2085_v28 }
 0x25f   :  { %2117 = vmax.xlane.f32.xlu1 %v2116_v22  ;;  %v3909_v24 = vpop.permute.xlu1 %3183  ;;  %v1046_v29 = vadd.f32 %v3797_v56, %v1027_v21  ;;  %v3927_v57 = vsel %vm603_vm3, %v2093_v50, -1e+30 }
 0x260   :  { %v1067_v31 = vsel %vm1051_vm6, %v1043_v12, %v1059_v49  ;;  %v2113_v51 = vsel %vm617_vm5, %v3927_v57, -inf }
 0x261   :  { %v3914_v35 = vsel %vm603_vm3, %v1067_v31, -1e+30  ;;  %v1062_v43 = vmul.f32 0.2, %v1046_v29  ;;  %vm1054_vm8 = vcmp.gt.f32.partialorder %v1046_v29, 0.0 }
 0x262   :  { %v1087_v36 = vsel %vm617_vm5, %v3914_v35, -inf }
 0x263   :  { %v1544_v38 = vpop.permute.xlu0 %1543  ;;  %v553_v39 = vpop.permute.xlu1 %552  ;;  %1088 = vmax.xlane.f32.xlu0 %v1087_v36  ;;  %v1070_v5 = vsel %vm1054_vm8, %v1046_v29, %v1062_v43 }
 0x264   :  { %v1563_v44 = vadd.f32 %v3801_v0, %v1544_v38  ;;  %v574_v47 = vadd.f32 %v3795_v55, %v553_v39  ;;  %v3939_v22 = vsel %vm606_vm10, %v1070_v5, -1e+30 }
 0x265   :  { %v1096_v38 = vsel %vm617_vm5, %v3939_v22, -inf }
 0x266   :  { %v590_v52 = vmul.f32 0.2, %v574_v47  ;;  %vm582_vm9 = vcmp.gt.f32.partialorder %v574_v47, 0.0  ;;  %v1579_v59 = vmul.f32 0.2, %v1563_v44  ;;  %vm1571_vm11 = vcmp.gt.f32.partialorder %v1563_v44, 0.0 }
 0x267   :  { %1605 = vmax.xlane.f32.xlu0 %v1604_v54 }
 0x268   :  { %v548_v60 = vpop.permute.xlu0 %547  ;;  %v2053_v61 = vpop.permute.xlu1 %2052  ;;  %v598_v62 = vsel %vm582_vm9, %v574_v47, %v590_v52  ;;  %v1587_v28 = vsel %vm1571_vm11, %v1563_v44, %v1579_v59 }
 0x269   :  { %v573_v12 = vadd.f32 %v3795_v55, %v548_v60  ;;  %v2072_v9 = vadd.f32 %v3803_v2, %v2053_v61  ;;  %v3932_v20 = vsel %vm606_vm10, %v598_v62, -1e+30  ;;  %v3950_v42 = vsel %vm606_vm10, %v1587_v28, -1e+30 }
 0x26a   :  { %v633_v49 = vsel %vm617_vm5, %v3932_v20, -inf  ;;  %v1613_v50 = vsel %vm617_vm5, %v3950_v42, -inf }
 0x26b   :  { %v589_v21 = vmul.f32 0.2, %v573_v12  ;;  %2114 = vmax.xlane.f32.xlu0 %v2113_v51  ;;  %634 = vmax.xlane.f32.xlu1 %v633_v49  ;;  %vm581_vm12 = vcmp.gt.f32.partialorder %v573_v12, 0.0  ;;  %v2088_v27 = vmul.f32 0.2, %v2072_v9  ;;  %vm2080_vm14 = vcmp.gt.f32.partialorder %v2072_v9, 0.0 }
 0x26d   :  { %v1023_v29 = vpop.permute.xlu1 %1022  ;;  %v597_v31 = vsel %vm581_vm12, %v573_v12, %v589_v21  ;;  %v2096_v44 = vsel %vm2080_vm14, %v2072_v9, %v2088_v27  ;;  %v505_v21 = vunpack.c.3.s8 %v3903_v16 }
 0x26e   :  { %v1045_v32 = vadd.f32 %v3797_v56, %v1023_v29  ;;  %v3943_v36 = vsel %vm605_vm13, %v597_v31, -1e+30  ;;  %v3959_v60 = vsel %vm606_vm10, %v2096_v44, -1e+30 }
 0x26f   :  { %v630_v39 = vsel %vm617_vm5, %v3943_v36, -inf  ;;  %1097 = vmax.xlane.f32.xlu1 %v1096_v38  ;;  %v2122_v5 = vsel %vm617_vm5, %v3959_v60, -inf  ;;  %v3976_v38 = vcvt.s32.f32 %v505_v21 }
 0x270   :  { %v1061_v43 = vmul.f32 0.2, %v1045_v32  ;;  %631 = vmax.xlane.f32.xlu0 %v630_v39  ;;  %vm1053_vm15 = vcmp.gt.f32.partialorder %v1045_v32, 0.0 }
 0x271   :  { %vm608_vm3 = vcmp.gt.f32.partialorder %v3976_v38, 0.0 }
 0x272   :  { %v1540_v47 = vpop.permute.xlu1 %1539  ;;  %v1069_v52 = vsel %vm1053_vm15, %v1045_v32, %v1061_v43 }
 0x273   :  { %v1562_v54 = vadd.f32 %v3801_v0, %v1540_v47  ;;  %1614 = vmax.xlane.f32.xlu1 %v1613_v50  ;;  %v3956_v59 = vsel %vm605_vm13, %v1069_v52, -1e+30  ;;  %v3991_v50 = vpop.permute.xlu0 %3196 }
 0x274   :  { %v1093_v61 = vsel %vm617_vm5, %v3956_v59, -inf }
 0x275   :  { %v1578_v62 = vmul.f32 0.2, %v1562_v54  ;;  %1094 = vmax.xlane.f32.xlu0 %v1093_v61  ;;  %vm1570_vm0 = vcmp.gt.f32.partialorder %v1562_v54, 0.0 }
 0x277   :  { %v2049_v12 = vpop.permute.xlu1 %2048  ;;  %2123 = vmax.xlane.f32.xlu1 %v2122_v5  ;;  %v1586_v9 = vsel %vm1570_vm0, %v1562_v54, %v1578_v62  ;;  %v1035_v54 = vpop.permute.xlu0 %1034 }
 0x278   :  { %v2071_v51 = vadd.f32 %v3803_v2, %v2049_v12  ;;  %v3967_v49 = vsel %vm605_vm13, %v1586_v9, -1e+30  ;;  %v504_v12 = vunpack.c.2.s8 %v3903_v16 }
 0x279   :  { %v1610_v25 = vsel %vm617_vm5, %v3967_v49, -inf }
 0x27a   :  { %v2087_v27 = vmul.f32 0.2, %v2071_v51  ;;  %1611 = vmax.xlane.f32.xlu0 %v1610_v25  ;;  %vm2079_vm1 = vcmp.gt.f32.partialorder %v2071_v51, 0.0 }
 0x27b   :  { %v558_v62 = vpop.permute.xlu0 %557 }
 0x27c   :  { %v563_v28 = vpop.permute.xlu1 %562  ;;  %v2095_v29 = vsel %vm2079_vm1, %v2071_v51, %v2087_v27  ;;  %v575_v5 = vadd.f32 %v3795_v55, %v558_v62  ;;  %v512_v27 = vcvt.s32.f32 %v504_v12 }
 0x27d   :  { %v576_v31 = vadd.f32 %v3795_v55, %v563_v28  ;;  %v3974_v32 = vsel %vm605_vm13, %v2095_v29, -1e+30  ;;  %v1048_v28 = vadd.f32 %v3797_v56, %v1035_v54  ;;  %vm849_vm13 = vcmask 64512  }
 0x27e   :  { %v2119_v39 = vsel %vm617_vm5, %v3974_v32, -inf  ;;  %v591_v25 = vmul.f32 0.2, %v575_v5  ;;  %vm583_vm4 = vcmp.gt.f32.partialorder %v575_v5, 0.0  ;;  %vm607_vm6 = vcmp.gt.f32.partialorder %v512_v27, 0.0 }
 0x27f   :  { %v592_v43 = vmul.f32 0.2, %v576_v31  ;;  %2120 = vmax.xlane.f32.xlu0 %v2119_v39  ;;  %vm584_vm2 = vcmp.gt.f32.partialorder %v576_v31, 0.0  ;;  %v1548_v51 = vpop.permute.xlu0 %1547  ;;  %v1064_v39 = vmul.f32 0.2, %v1048_v28  ;;  %vm1056_vm8 = vcmp.gt.f32.partialorder %v1048_v28, 0.0 }
 0x281   :  { %v600_v44 = vsel %vm584_vm2, %v576_v31, %v592_v43  ;;  %v1552_v52 = vpop.permute.xlu1 %1551  ;;  %v599_v31 = vsel %vm583_vm4, %v575_v5, %v591_v25  ;;  %v1072_v12 = vsel %vm1056_vm8, %v1048_v28, %v1064_v39 }
 0x282   :  { %v3983_v47 = vsel %vm608_vm3, %v600_v44, -1e+30  ;;  %v1565_v55 = vadd.f32 %v3801_v0, %v1552_v52  ;;  %v4000_v16 = vsel %vm607_vm6, %v599_v31, -1e+30 }
 0x283   :  { %v639_v58 = vsel %vm617_vm5, %v3983_v47, -inf  ;;  %v2057_v43 = vpop.permute.xlu0 %2056  ;;  %v636_v5 = vsel %vm617_vm5, %v4000_v16, -inf }
 0x284   :  { %640 = vmax.xlane.f32.xlu1 %v639_v58  ;;  %v2073_v58 = vadd.f32 %v3803_v2, %v2057_v43  ;;  %vm1573_vm10 = vcmp.gt.f32.partialorder %v1565_v55, 0.0 }
 0x286   :  { %v2061_v61 = vpop.permute.xlu1 %2060  ;;  %v2089_v52 = vmul.f32 0.2, %v2073_v58  ;;  %vm2081_vm11 = vcmp.gt.f32.partialorder %v2073_v58, 0.0 }
 0x287   :  { %v2074_v54 = vadd.f32 %v3803_v2, %v2061_v61 }
 0x289   :  { %v2090_v25 = vmul.f32 0.2, %v2074_v54  ;;  %vm2082_vm12 = vcmp.gt.f32.partialorder %v2074_v54, 0.0 }
 0x28b   :  { %v1031_v9 = vpop.permute.xlu1 %1030  ;;  %v2098_v31 = vsel %vm2082_vm12, %v2074_v54, %v2090_v25 }
 0x28c   :  { %v1047_v21 = vadd.f32 %v3797_v56, %v1031_v9  ;;  %v1581_v56 = vmul.f32 0.2, %v1565_v55  ;;  %v4011_v9 = vsel %vm608_vm3, %v1072_v12, -1e+30 }
 0x28d   :  { %v1102_v61 = vsel %vm617_vm5, %v4011_v9, -inf }
 0x28e   :  { %v1063_v29 = vmul.f32 0.2, %v1047_v21  ;;  %vm1055_vm7 = vcmp.gt.f32.partialorder %v1047_v21, 0.0 }
 0x290   :  { %v1071_v62 = vsel %vm1055_vm7, %v1047_v21, %v1063_v29  ;;  %v1589_v21 = vsel %vm1573_vm10, %v1565_v55, %v1581_v56  ;;  %v4039_v56 = vpop.permute.xlu1 %3209 }
 0x291   :  { %v4022_v29 = vsel %vm608_vm3, %v1589_v21, -1e+30 }
 0x292   :  { %v1619_v43 = vsel %vm617_vm5, %v4022_v29, -inf }
 0x295   :  { %3219 = vrot.lane.b32.xlu0 %v3728_v33, %s3480_s13  ;;  %3214 = vrot.lane.b32.xlu1 %v3724_v26, %s3481_s6  ;;  %v1564_v26 = vadd.f32 %v3801_v0, %v1548_v51  ;;  %v4007_v0 = vsel %vm607_vm6, %v1071_v62, -1e+30 }
 0x296   :  { %v1099_v2 = vsel %vm617_vm5, %v4007_v0, -inf }
 0x297   :  { %v1580_v44 = vmul.f32 0.2, %v1564_v26  ;;  %vm1572_vm9 = vcmp.gt.f32.partialorder %v1564_v26, 0.0 }
 0x299   :  { %v1588_v51 = vsel %vm1572_vm9, %v1564_v26, %v1580_v44  ;;  %v2097_v26 = vsel %vm2081_vm11, %v2073_v58, %v2089_v52  ;;  %v4033_v44 = vsel %vm608_vm3, %v2098_v31, -1e+30 }
 0x29a   :  { %v4018_v28 = vsel %vm607_vm6, %v1588_v51, -1e+30  ;;  %v4029_v55 = vsel %vm607_vm6, %v2097_v26, -1e+30  ;;  %v2128_v58 = vsel %vm617_vm5, %v4033_v44, -inf }
 0x29b   :  { %v1616_v39 = vsel %vm617_vm5, %v4018_v28, -inf  ;;  %v2125_v62 = vsel %vm617_vm5, %v4029_v55, -inf }
 0x2b4   :  { %637 = vmax.xlane.f32.xlu0 %v636_v5 }
 0x2b8   :  { %1100 = vmax.xlane.f32.xlu0 %v1099_v2 }
 0x2b9   :  { %1103 = vmax.xlane.f32.xlu1 %v1102_v61 }
 0x2bc   :  { %1617 = vmax.xlane.f32.xlu0 %v1616_v39 }
 0x2bd   :  { %1620 = vmax.xlane.f32.xlu1 %v1619_v43 }
 0x2c0   :  { %2126 = vmax.xlane.f32.xlu0 %v2125_v62 }
 0x2c1   :  { %2129 = vmax.xlane.f32.xlu1 %v2128_v58 }
 0x2c8   :  { %v1086_v54 = vpop.xlane.xlu1 %1085  ;;  %v623_v12 = vpop.xlane.xlu0 %622 }
 0x2c9   :  { %v1106_v27 = vsub.f32 %v3808_v18, %v1086_v54  ;;  %v643_v5 = vsub.f32 %v3811_v19, %v623_v12 }
 0x2cb   :  { %v652_v52 = vmul.f32 1.442695, %v643_v5  ;;  %v1115_v38 = vmul.f32 1.442695, %v1106_v27 }
 0x2cd   :  { %3248 = vpow2.f32 %v652_v52 }
 0x2ce   :  { %v1603_v51 = vpop.xlane.xlu1 %1602  ;;  %3250 = vpow2.f32 %v1115_v38 }
 0x2cf   :  { %v1623_v25 = vsub.f32 %v3823_v34, %v1603_v51 }
 0x2d1   :  { %v1632_v21 = vmul.f32 1.442695, %v1623_v25 }
 0x2d2   :  { %v2112_v2 = vpop.xlane.xlu1 %2111 }
 0x2d3   :  { %v2132_v61 = vsub.f32 %v3829_v37, %v2112_v2  ;;  %3252 = vpow2.f32 %v1632_v21 }
 0x2d5   :  { %v2141_v26 = vmul.f32 1.442695, %v2132_v61 }
 0x2d6   :  { %v620_v31 = vpop.xlane.xlu1 %619 }
 0x2d7   :  { %3254 = vpow2.f32 %v2141_v26  ;;  %v642_v39 = vsub.f32 %v3838_v48, %v620_v31  ;;  %v4046_v18 = vpop.eup %3248 }
 0x2d8   :  { %v1083_v19 = vpop.xlane.xlu0 %1082  ;;  %v669_v34 = vsel %vm617_vm5, %v4046_v18, 0.0  ;;  %v4051_v58 = vpop.eup %3250 }
 0x2d9   :  { %v650_v43 = vmul.f32 1.442695, %v642_v39  ;;  %v1105_v62 = vsub.f32 %v3847_v63, %v1083_v19  ;;  %670 = vadd.xlane.f32.xlu1 %v669_v34  ;;  %v1132_v5 = vsel %vm617_vm5, %v4051_v58, 0.0 }
 0x2db   :  { %3256 = vpow2.f32 %v650_v43  ;;  %v1113_v37 = vmul.f32 1.442695, %v1105_v62 }
 0x2dc   :  { %v1600_v54 = vpop.xlane.xlu0 %1599  ;;  %v629_v12 = vpop.xlane.xlu1 %628 }
 0x2dd   :  { %3258 = vpow2.f32 %v1113_v37  ;;  %v1622_v27 = vsub.f32 %v3856_v11, %v1600_v54  ;;  %v645_v48 = vsub.f32 %v3862_v23, %v629_v12  ;;  %v4057_v52 = vpop.eup %3252  ;;  %1133 = vadd.xlane.f32.xlu1 %v1132_v5 }
 0x2de   :  { %v1649_v2 = vsel %vm617_vm5, %v4057_v52, 0.0 }
 0x2df   :  { %v1630_v63 = vmul.f32 1.442695, %v1622_v27  ;;  %v656_v38 = vmul.f32 1.442695, %v645_v48 }
 0x2e0   :  { %v2109_v51 = vpop.xlane.xlu0 %2108 }
 0x2e1   :  { %v4059_v25 = vpop.eup %3254  ;;  %3260 = vpow2.f32 %v1630_v63  ;;  %v2131_v21 = vsub.f32 %v3870_v30, %v2109_v51  ;;  %1650 = vadd.xlane.f32.xlu1 %v1649_v2 }
 0x2e2   :  { %3262 = vpow2.f32 %v656_v38  ;;  %v2158_v11 = vsel %vm617_vm5, %v4059_v25, 0.0 }
 0x2e3   :  { %v2139_v23 = vmul.f32 1.442695, %v2131_v21  ;;  %2159 = vadd.xlane.f32.xlu0 %v2158_v11 }
 0x2e4   :  { %v1092_v61 = vpop.xlane.xlu1 %1091 }
 0x2e5   :  { %v4066_v26 = vpop.eup %3256  ;;  %3264 = vpow2.f32 %v2139_v23  ;;  %v1108_v31 = vsub.f32 %v3879_v46, %v1092_v61 }
 0x2e6   :  { %v666_v39 = vsel %vm617_vm5, %v4066_v26, 0.0 }
 0x2e7   :  { %v4071_v30 = vpop.eup %3258  ;;  %v1119_v19 = vmul.f32 1.442695, %v1108_v31  ;;  %667 = vadd.xlane.f32.xlu0 %v666_v39 }
 0x2e8   :  { %v1609_v43 = vpop.xlane.xlu1 %1608  ;;  %v1129_v34 = vsel %vm617_vm5, %v4071_v30, 0.0 }
 0x2e9   :  { %3266 = vpow2.f32 %v1119_v19  ;;  %v1625_v62 = vsub.f32 %v3886_v53, %v1609_v43 }
 0x2eb   :  { %v4076_v37 = vpop.eup %3260  ;;  %v1636_v54 = vmul.f32 1.442695, %v1625_v62  ;;  %1130 = vadd.xlane.f32.xlu0 %v1129_v34  ;;  %v626_v12 = vpop.xlane.xlu0 %625 }
 0x2ec   :  { %v4078_v46 = vpop.eup %3262  ;;  %v644_v27 = vsub.f32 %v3898_v14, %v626_v12  ;;  %v2118_v48 = vpop.xlane.xlu1 %2117  ;;  %v1646_v38 = vsel %vm617_vm5, %v4076_v37, 0.0 }
 0x2ed   :  { %3268 = vpow2.f32 %v1636_v54  ;;  %v2134_v5 = vsub.f32 %v3893_v4, %v2118_v48  ;;  %v675_v63 = vsel %vm617_vm5, %v4078_v46, 0.0 }
 0x2ee   :  { %v654_v53 = vmul.f32 1.442695, %v644_v27  ;;  %676 = vadd.xlane.f32.xlu1 %v675_v63 }
 0x2ef   :  { %v4086_v51 = vpop.eup %3264  ;;  %v2145_v21 = vmul.f32 1.442695, %v2134_v5  ;;  %1647 = vadd.xlane.f32.xlu0 %v1646_v38 }
 0x2f0   :  { %3270 = vpow2.f32 %v654_v53  ;;  %v1089_v2 = vpop.xlane.xlu0 %1088  ;;  %v2155_v4 = vsel %vm617_vm5, %v4086_v51, 0.0 }
 0x2f1   :  { %3272 = vpow2.f32 %v2145_v21  ;;  %v1107_v14 = vsub.f32 %v3914_v35, %v1089_v2 }
 0x2f3   :  { %v4091_v11 = vpop.eup %3266  ;;  %v1117_v23 = vmul.f32 1.442695, %v1107_v14  ;;  %2156 = vadd.xlane.f32.xlu0 %v2155_v4 }
 0x2f4   :  { %v1606_v61 = vpop.xlane.xlu0 %1605  ;;  %v1138_v31 = vsel %vm617_vm5, %v4091_v11, 0.0 }
 0x2f5   :  { %3274 = vpow2.f32 %v1117_v23  ;;  %v1624_v39 = vsub.f32 %v3919_v41, %v1606_v61  ;;  %1139 = vadd.xlane.f32.xlu1 %v1138_v31 }
 0x2f7   :  { %v4096_v19 = vpop.eup %3268  ;;  %v1634_v43 = vmul.f32 1.442695, %v1624_v39 }
 0x2f8   :  { %v2115_v62 = vpop.xlane.xlu0 %2114  ;;  %v1655_v35 = vsel %vm617_vm5, %v4096_v19, 0.0  ;;  %v635_v34 = vpop.xlane.xlu1 %634 }
 0x2f9   :  { %3276 = vpow2.f32 %v1634_v43  ;;  %v2133_v54 = vsub.f32 %v3927_v57, %v2115_v62  ;;  %1656 = vadd.xlane.f32.xlu1 %v1655_v35  ;;  %v647_v12 = vsub.f32 %v3932_v20, %v635_v34 }
 0x2fa   :  { %v4102_v27 = vpop.eup %3270 }
 0x2fb   :  { %v4104_v48 = vpop.eup %3272  ;;  %v2143_v41 = vmul.f32 1.442695, %v2133_v54  ;;  %v660_v5 = vmul.f32 1.442695, %v647_v12  ;;  %v672_v63 = vsel %vm617_vm5, %v4102_v27, 0.0 }
 0x2fc   :  { %673 = vadd.xlane.f32.xlu0 %v672_v63  ;;  %v2164_v53 = vsel %vm617_vm5, %v4104_v48, 0.0  ;;  %v1098_v38 = vpop.xlane.xlu1 %1097 }
 0x2fd   :  { %3278 = vpow2.f32 %v2143_v41  ;;  %v632_v21 = vpop.xlane.xlu0 %631  ;;  %2165 = vadd.xlane.f32.xlu1 %v2164_v53  ;;  %v1110_v57 = vsub.f32 %v3939_v22, %v1098_v38 }
 0x2fe   :  { %v646_v20 = vsub.f32 %v3943_v36, %v632_v21  ;;  %3280 = vpow2.f32 %v660_v5 }
 0x2ff   :  { %v4112_v2 = vpop.eup %3274  ;;  %v1123_v14 = vmul.f32 1.442695, %v1110_v57 }
 0x300   :  { %v658_v4 = vmul.f32 1.442695, %v646_v20  ;;  %v1615_v23 = vpop.xlane.xlu1 %1614  ;;  %v1135_v61 = vsel %vm617_vm5, %v4112_v2, 0.0 }
 0x301   :  { %v1627_v31 = vsub.f32 %v3950_v42, %v1615_v23  ;;  %1136 = vadd.xlane.f32.xlu0 %v1135_v61 }
 0x302   :  { %3282 = vpow2.f32 %v658_v4  ;;  %v1095_v39 = vpop.xlane.xlu0 %1094 }
 0x303   :  { %v4117_v43 = vpop.eup %3276  ;;  %3284 = vpow2.f32 %v1123_v14  ;;  %v1640_v22 = vmul.f32 1.442695, %v1627_v31  ;;  %v1109_v36 = vsub.f32 %v3956_v59, %v1095_v39 }
 0x304   :  { %v2124_v62 = vpop.xlane.xlu1 %2123  ;;  %v1652_v35 = vsel %vm617_vm5, %v4117_v43, 0.0 }
 0x305   :  { %v1121_v34 = vmul.f32 1.442695, %v1109_v36  ;;  %v2136_v54 = vsub.f32 %v3959_v60, %v2124_v62  ;;  %1653 = vadd.xlane.f32.xlu1 %v1652_v35  ;;  %3286 = vpow2.f32 %v1640_v22 }
 0x307   :  { %v4123_v12 = vpop.eup %3278  ;;  %3288 = vpow2.f32 %v1121_v34  ;;  %v2149_v42 = vmul.f32 1.442695, %v2136_v54  ;;  %v1612_v41 = vpop.xlane.xlu0 %1611 }
 0x308   :  { %v1626_v5 = vsub.f32 %v3967_v49, %v1612_v41  ;;  %v2161_v63 = vsel %vm617_vm5, %v4123_v12, 0.0  ;;  %v4128_v59 = vpop.eup %3280 }
 0x309   :  { %2162 = vadd.xlane.f32.xlu1 %v2161_v63  ;;  %3290 = vpow2.f32 %v2149_v42  ;;  %v681_v21 = vsel %vm617_vm5, %v4128_v59, 0.0 }
 0x30a   :  { %v1638_v53 = vmul.f32 1.442695, %v1626_v5 }
 0x30c   :  { %v4130_v38 = vpop.eup %3282  ;;  %3292 = vpow2.f32 %v1638_v53  ;;  %v2121_v60 = vpop.xlane.xlu0 %2120 }
 0x30d   :  { %v4134_v57 = vpop.eup %3284  ;;  %v2135_v20 = vsub.f32 %v3974_v32, %v2121_v60  ;;  %v678_v49 = vsel %vm617_vm5, %v4130_v38, 0.0  ;;  %682 = vadd.xlane.f32.xlu1 %v681_v21 }
 0x30e   :  { %679 = vadd.xlane.f32.xlu0 %v678_v49  ;;  %v1144_v61 = vsel %vm617_vm5, %v4134_v57, 0.0 }
 0x30f   :  { %v2147_v14 = vmul.f32 1.442695, %v2135_v20  ;;  %v4139_v4 = vpop.eup %3286 }
 0x310   :  { %v3220_v23 = vpop.permute.xlu0 %3219  ;;  %v1661_v54 = vsel %vm617_vm5, %v4139_v4, 0.0 }
 0x311   :  { %v4143_v31 = vpop.eup %3288  ;;  %3294 = vpow2.f32 %v2147_v14  ;;  %v3222_v39 = vunpack.i.h.bf16 %v3220_v23  ;;  %v3221_v22 = vunpack.i.l.bf16 %v3220_v23  ;;  %1145 = vadd.xlane.f32.xlu1 %v1144_v61  ;;  %v641_v36 = vpop.xlane.xlu1 %640 }
 0x312   :  { %v649_v32 = vsub.f32 %v3983_v47, %v641_v36  ;;  %v1141_v62 = vsel %vm617_vm5, %v4143_v31, 0.0 }
 0x313   :  { %v3114_v35 = vpack.c.bf16 %v3222_v39, %v3221_v22  ;;  %1142 = vadd.xlane.f32.xlu0 %v1141_v62  ;;  %v4150_v42 = vpop.eup %3290 }
 0x314   :  { %v664_v34 = vmul.f32 1.442695, %v649_v32  ;;  %v2170_v5 = vsel %vm617_vm5, %v4150_v42, 0.0 }
 0x315   :  { %3115 = vmatprep.subr.bf16.mxu1 %v3114_v35  ;;  %1662 = vadd.xlane.f32.xlu1 %v1661_v54  ;;  %v4166_v49 = vpop.permute.xlu1 %3214 }
 0x316   :  { %v4152_v41 = vpop.eup %3292  ;;  %3296 = vpow2.f32 %v664_v34  ;;  %3117 = vmatpush3.bf16.msra.mxu1 %v3114_v35 }
 0x317   :  { %v1658_v47 = vsel %vm617_vm5, %v4152_v41, 0.0 }
 0x318   :  { %1659 = vadd.xlane.f32.xlu0 %v1658_v47 }
 0x319   :  { %2171 = vadd.xlane.f32.xlu1 %v2170_v5 }
 0x31b   :  { %v4158_v63 = vpop.eup %3294 }
 0x31c   :  { %v2167_v53 = vsel %vm617_vm5, %v4158_v63, 0.0 }
 0x31d   :  { %2168 = vadd.xlane.f32.xlu0 %v2167_v53 }
 0x320   :  { %v4162_v60 = vpop.eup %3296 }
 0x321   :  { %v687_v21 = vsel %vm617_vm5, %v4162_v60, 0.0 }
 0x322   :  { %688 = vadd.xlane.f32.xlu1 %v687_v21 }
 0x341   :  { %v638_v20 = vpop.xlane.xlu0 %637 }
 0x342   :  { %v648_v14 = vsub.f32 %v4000_v16, %v638_v20 }
 0x344   :  { %v662_v23 = vmul.f32 1.442695, %v648_v14 }
 0x345   :  { %v1101_v36 = vpop.xlane.xlu0 %1100 }
 0x346   :  { %3298 = vpow2.f32 %v662_v23  ;;  %v1104_v61 = vpop.xlane.xlu1 %1103  ;;  %v1111_v35 = vsub.f32 %v4007_v0, %v1101_v36 }
 0x347   :  { %v1112_v39 = vsub.f32 %v4011_v9, %v1104_v61 }
 0x348   :  { %v1125_v16 = vmul.f32 1.442695, %v1111_v35 }
 0x349   :  { %v1127_v22 = vmul.f32 1.442695, %v1112_v39  ;;  %v1618_v39 = vpop.xlane.xlu0 %1617 }
 0x34a   :  { %v1621_v32 = vpop.xlane.xlu1 %1620 }
 0x34b   :  { %3300 = vpow2.f32 %v1127_v22  ;;  %v1629_v62 = vsub.f32 %v4022_v29, %v1621_v32 }
 0x34d   :  { %v1644_v34 = vmul.f32 1.442695, %v1629_v62  ;;  %v2127_v22 = vpop.xlane.xlu0 %2126 }
 0x34e   :  { %v2130_v54 = vpop.xlane.xlu1 %2129 }
 0x34f   :  { %3302 = vpow2.f32 %v1644_v34  ;;  %v2138_v47 = vsub.f32 %v4033_v44, %v2130_v54  ;;  %v1628_v54 = vsub.f32 %v4018_v28, %v1618_v39 }
 0x350   :  { %v4173_v5 = vpop.eup %3298 }
 0x351   :  { %v2153_v53 = vmul.f32 1.442695, %v2138_v47  ;;  %v684_v9 = vsel %vm617_vm5, %v4173_v5, 0.0 }
 0x352   :  { %685 = vadd.xlane.f32.xlu0 %v684_v9 }
 0x353   :  { %3304 = vpow2.f32 %v2153_v53  ;;  %v2137_v53 = vsub.f32 %v4029_v55, %v2127_v22  ;;  %v3199_v55 = vunpack.i.h.bf16 %v3991_v50  ;;  %v3198_v22 = vunpack.i.l.bf16 %v3991_v50 }
 0x354   :  { %3306 = vpow2.f32 %v1125_v16  ;;  %v1642_v16 = vmul.f32 1.442695, %v1628_v54  ;;  %v3211_v54 = vunpack.i.l.bf16 %v4039_v56 }
 0x355   :  { %v4177_v21 = vpop.eup %3300 }
 0x356   :  { %v1150_v0 = vsel %vm617_vm5, %v4177_v21, 0.0 }
 0x357   :  { %1151 = vadd.xlane.f32.xlu1 %v1150_v0 }
 0x359   :  { %v4181_v29 = vpop.eup %3302 }
 0x35a   :  { %v1667_v44 = vsel %vm617_vm5, %v4181_v29, 0.0 }
 0x35b   :  { %1668 = vadd.xlane.f32.xlu1 %v1667_v44 }
 0x35d   :  { %v4185_v20 = vpop.eup %3304 }
 0x35e   :  { %v2176_v14 = vsel %vm617_vm5, %v4185_v20, 0.0  ;;  %v4189_v23 = vpop.eup %3306 }
 0x35f   :  { %2177 = vadd.xlane.f32.xlu1 %v2176_v14  ;;  %v1147_v61 = vsel %vm617_vm5, %v4189_v23, 0.0  ;;  %v3186_v14 = vunpack.i.h.bf16 %v3909_v24 }
 0x363   :  { %1148 = vadd.xlane.f32.xlu1 %v1147_v61  ;;  %v3185_v61 = vunpack.i.l.bf16 %v3909_v24 }
 0x366   :  { %v671_v36 = vpop.xlane.xlu1 %670 }
 0x367   :  { %3308 = vrcp.f32 %v671_v36  ;;  %v2151_v36 = vmul.f32 1.442695, %v2137_v53 }
 0x368   :  { %3229 = vrot.lane.b32.xlu0 %v3733_v40, %s3480_s13 }
 0x36a   :  { %v4201_v62 = vpop.xlane.xlu1 %1133 }
 0x36c   :  { %3234 = vrot.lane.b32.xlu0 %v3733_v40, %s3481_s6 }
 0x36e   :  { %v4208_v47 = vpop.xlane.xlu1 %1650 }
 0x370   :  { %v4197_v32 = vpop.xlane.xlu0 %2159  ;;  %3239 = vrot.lane.b32.xlu0 %v3740_v45, %s3480_s13 }
 0x371   :  { %v3309_v9 = vpop.eup %3308 }
 0x372   :  { %v707_v28 = vmul.f32 %v3309_v9, %v4046_v18  ;;  %v3212_v18 = vunpack.i.h.bf16 %v4039_v56  ;;  %v3217_v9 = vunpack.i.h.bf16 %v4166_v49 }
 0x374   :  { %v668_v35 = vpop.xlane.xlu0 %667  ;;  %3224 = vrot.lane.b32.xlu1 %v3728_v33, %s3481_s6 }
 0x375   :  { %3310 = vrcp.f32 %v668_v35  ;;  %v3098_v35 = vpack.c.bf16 %v3186_v14, %v3185_v61  ;;  %v3106_v14 = vpack.c.bf16 %v3212_v18, %v3211_v54 }
 0x378   :  { %v4205_v34 = vpop.xlane.xlu0 %1130 }
 0x37b   :  { %v677_v0 = vpop.xlane.xlu1 %676 }
 0x37c   :  { %v1648_v40 = vpop.xlane.xlu0 %1647 }
 0x37d   :  { %3312 = vrcp.f32 %v1648_v40  ;;  %v3102_v40 = vpack.c.bf16 %v3199_v55, %v3198_v22 }
 0x37e   :  { %3314 = vpow2.f32 %v1642_v16 }
 0x37f   :  { %v3311_v44 = vpop.eup %3310  ;;  %3316 = vpow2.f32 %v2151_v36 }
 0x380   :  { %v706_v33 = vmul.f32 %v3311_v44, %v4066_v26  ;;  %v4222_v24 = vpop.xlane.xlu0 %2156  ;;  %3318 = vrcp.f32 %v677_v0  ;;  %v3216_v44 = vunpack.i.l.bf16 %v4166_v49 }
 0x382   :  { %2902 = vmatprep.mubr.msk.f32.mxu0 %vm617_vm5, %v706_v33  ;;  %v4216_v39 = vpop.xlane.xlu1 %1139  ;;  %v4240_v61 = vpack.c.bf16 %v3217_v9, %v3216_v44 }
 0x383   :  { %2903 = vmatmul.mubr.msk.f32.vlgmr.msra.gmra.mrb[16].mxu0 %vm617_vm5, %v707_v28 }
 0x384   :  { %3097 = vmatpush3.bf16.msra.mxu0 %v3852_v7 }
 0x385   :  { %3099 = vmatprep.subr.bf16.mxu0 %v3098_v35 }
 0x386   :  { %v4226_v16 = vpop.xlane.xlu1 %1656 }
 0x387   :  { %v3313_v26 = vpop.eup %3312 }
 0x388   :  { %3101 = vmatpush3.bf16.msra.mxu0 %v3098_v35  ;;  %v1686_v50 = vmul.f32 %v3313_v26, %v4076_v37  ;;  %v4230_v7 = vpop.eup %3314 }
 0x389   :  { %3103 = vmatprep.subr.bf16.mxu0 %v3102_v40  ;;  %v674_v53 = vpop.xlane.xlu0 %673  ;;  %v1664_v37 = vsel %vm617_vm5, %v4230_v7, 0.0  ;;  %v4238_v0 = vpop.eup %3316 }
 0x38a   :  { %2958 = vmatprep.mubr.msk.f32.mxu1 %vm617_vm5, %v1686_v50  ;;  %3320 = vrcp.f32 %v674_v53  ;;  %v4234_v56 = vpop.xlane.xlu1 %2165  ;;  %v2173_v49 = vsel %vm617_vm5, %v4238_v0, 0.0  ;;  %v3319_v36 = vpop.eup %3318 }
 0x38b   :  { %v709_v35 = vmul.f32 %v3319_v36, %v4078_v46  ;;  %v4260_v46 = vld [vmem:[%s5121_s7] ss:$0 sm:$0xff] }
 0x38c   :  { %3105 = vmatpush3.bf16.msra.mxu0 %v3102_v40  ;;  %1209 = vrot.lane.b32.xlu1 %v4260_v46, %s3479_s4 }
 0x38d   :  { %3107 = vmatprep.subr.bf16.mxu0 %v3106_v14 }
 0x38e   :  { %v1137_v26 = vpop.xlane.xlu0 %1136 }
 0x38f   :  { %1665 = vadd.xlane.f32.xlu0 %v1664_v37 }
 0x390   :  { %3109 = vmatpush3.bf16.msra.mxu0 %v3106_v14  ;;  %2227 = vrot.lane.b32.xlu1 %v4260_v46, %s3481_s6 }
 0x391   :  { %3127 = vmatprep.subr.bf16.mxu0 %v4240_v61 }
 0x392   :  { %v1654_v33 = vpop.xlane.xlu1 %1653 }
 0x393   :  { %2174 = vadd.xlane.f32.xlu0 %v2173_v49 }
 0x394   :  { %v3321_v28 = vpop.eup %3320 }
 0x395   :  { %v708_v55 = vmul.f32 %v3321_v28, %v4102_v27 }
 0x396   :  { %v4246_v22 = vpop.xlane.xlu1 %2162 }
 0x397   :  { %2905 = vmatprep.mubr.msk.f32.mxu0 %vm617_vm5, %v708_v55 }
 0x398   :  { %2906 = vmatmul.mubr.msk.f32.gmra.mrb[18].mxu0 %vm617_vm5, %v709_v35 }
 0x39a   :  { %v683_v18 = vpop.xlane.xlu1 %682 }
 0x39b   :  { %v680_v54 = vpop.xlane.xlu0 %679  ;;  %3322 = vrcp.f32 %v683_v18 }
 0x39c   :  { %3324 = vrcp.f32 %v680_v54 }
 0x39d   :  { %3326 = vrcp.f32 %v4205_v34 }
 0x39e   :  { %v1146_v27 = vpop.xlane.xlu1 %1145 }
 0x3a5   :  { %v3323_v40 = vpop.eup %3322 }
 0x3a6   :  { %v3325_v50 = vpop.eup %3324  ;;  %v711_v53 = vmul.f32 %v3323_v40, %v4128_v59  ;;  %v1143_v59 = vpop.xlane.xlu0 %1142 }
 0x3a7   :  { %v710_v9 = vmul.f32 %v3325_v50, %v4130_v38  ;;  %v1663_v38 = vpop.xlane.xlu1 %1662  ;;  %v3327_v40 = vpop.eup %3326 }
 0x3a9   :  { %2908 = vmatprep.mubr.msk.f32.mxu0 %vm617_vm5, %v710_v9  ;;  %3244 = vrot.lane.b32.xlu0 %v3740_v45, %s3481_s6 }
 0x3aa   :  { %2909 = vmatmul.mubr.msk.f32.gmra.mrb[20].mxu0 %vm617_vm5, %v711_v53  ;;  %v1660_v45 = vpop.xlane.xlu0 %1659 }
 0x3ab   :  { %v4268_v44 = vpop.xlane.xlu1 %2171 }
 0x3ad   :  { %1718 = vrot.lane.b32.xlu0 %v4260_v46, %s3480_s13 }
 0x3ae   :  { %v4270_v14 = vpop.xlane.xlu0 %2168 }
 0x3af   :  { %v689_v37 = vpop.xlane.xlu1 %688 }
 0x3b0   :  { %3328 = vrcp.f32 %v689_v37  ;;  %v1169_v37 = vmul.f32 %v3327_v40, %v4071_v30 }
 0x3ba   :  { %v3329_v50 = vpop.eup %3328 }
 0x3bb   :  { %v713_v9 = vmul.f32 %v3329_v50, %v4162_v60 }
 0x3df   :  { %v686_v49 = vpop.xlane.xlu0 %685 }
 0x3e0   :  { %3330 = vrcp.f32 %v686_v49 }
 0x3e1   :  { %3332 = vrcp.f32 %v4201_v62 }
 0x3e2   :  { %3334 = vrcp.f32 %v1137_v26 }
 0x3e3   :  { %v3230_v36 = vpop.permute.xlu0 %3229  ;;  %3336 = vrcp.f32 %v4208_v47 }
 0x3e4   :  { %v3232_v28 = vunpack.i.h.bf16 %v3230_v36  ;;  %v3231_v55 = vunpack.i.l.bf16 %v3230_v36  ;;  %v1152_v35 = vpop.xlane.xlu1 %1151  ;;  %3338 = vrcp.f32 %v1654_v33 }
 0x3e5   :  { %3340 = vrcp.f32 %v4216_v39 }
 0x3e6   :  { %v3118_v18 = vpack.c.bf16 %v3232_v28, %v3231_v55  ;;  %3342 = vrcp.f32 %v1143_v59 }
 0x3e7   :  { %v4276_v54 = vpop.permute.xlu0 %3234  ;;  %3344 = vrcp.f32 %v4226_v16 }
 0x3e8   :  { %3119 = vmatprep.subr.bf16.mxu1 %v3118_v18  ;;  %v4278_v34 = vpop.xlane.xlu1 %1668  ;;  %3346 = vrcp.f32 %v1660_v45 }
 0x3e9   :  { %3121 = vmatpush3.bf16.msra.mxu1 %v3118_v18  ;;  %3348 = vrcp.f32 %v1146_v27 }
 0x3ea   :  { %v3331_v62 = vpop.eup %3330  ;;  %3350 = vrcp.f32 %v1663_v38 }
 0x3eb   :  { %v3240_v26 = vpop.permute.xlu0 %3239  ;;  %v712_v47 = vmul.f32 %v3331_v62, %v4173_v5  ;;  %v3333_v59 = vpop.eup %3332  ;;  %3352 = vrcp.f32 %v1152_v35  ;;  %v3237_v62 = vunpack.i.h.bf16 %v4276_v54 }
 0x3ec   :  { %v3242_v33 = vunpack.i.h.bf16 %v3240_v26  ;;  %v3241_v53 = vunpack.i.l.bf16 %v3240_v26  ;;  %v4282_v39 = vpop.xlane.xlu1 %2177  ;;  %v3335_v16 = vpop.eup %3334  ;;  %v1170_v45 = vmul.f32 %v3333_v59, %v4051_v58 }
 0x3ed   :  { %2911 = vmatprep.mubr.msk.f32.mxu0 %vm617_vm5, %v712_v47  ;;  %v3337_v27 = vpop.eup %3336  ;;  %v1171_v38 = vmul.f32 %v3335_v16, %v4112_v2 }
 0x3ee   :  { %v3122_v49 = vpack.c.bf16 %v3242_v33, %v3241_v53  ;;  %2912 = vmatmul.mubr.msk.f32.gmra.mrb[22].mxu0 %vm617_vm5, %v713_v9  ;;  %v3339_v5 = vpop.eup %3338  ;;  %v1687_v30 = vmul.f32 %v3337_v27, %v4057_v52 }
 0x3ef   :  { %2930 = vmatprep.mubr.msk.f32.mxu0 %vm617_vm5, %v1169_v37  ;;  %v3341_v60 = vpop.eup %3340  ;;  %v1688_v58 = vmul.f32 %v3339_v5, %v4117_v43 }
 0x3f0   :  { %3123 = vmatprep.subr.bf16.mxu1 %v3122_v49  ;;  %v1149_v36 = vpop.xlane.xlu1 %1148  ;;  %v3343_v28 = vpop.eup %3342  ;;  %v1172_v2 = vmul.f32 %v3341_v60, %v4091_v11 }
 0x3f1   :  { %3354 = vrcp.f32 %v1149_v36  ;;  %3125 = vmatpush3.bf16.msra.mxu1 %v3122_v49  ;;  %v3345_v55 = vpop.eup %3344 }
 0x3f2   :  { %3356 = vrcp.f32 %v4222_v24  ;;  %2931 = vmatmul.mubr.msk.f32.vlgmr.msra.gmra.mrb[24].mxu0 %vm617_vm5, %v1170_v45  ;;  %v3347_v35 = vpop.eup %3346  ;;  %v1173_v24 = vmul.f32 %v3343_v28, %v4143_v31  ;;  %v1689_v43 = vmul.f32 %v3345_v55, %v4096_v19 }
 0x3f3   :  { %3129 = vmatpush3.bf16.msra.mxu0 %v4240_v61  ;;  %2933 = vmatprep.mubr.msk.f32.mxu0 %vm617_vm5, %v1171_v38  ;;  %v3349_v40 = vpop.eup %3348  ;;  %v3236_v61 = vunpack.i.l.bf16 %v4276_v54  ;;  %v1690_v11 = vmul.f32 %v3347_v35, %v4152_v41  ;;  %3358 = vrcp.f32 %v4278_v34 }
 0x3f4   :  { %2959 = vmatmul.mubr.msk.f32.vlgmr.msra.gmra.mrb[10].mxu1 %vm617_vm5, %v1687_v30  ;;  %v3225_v18 = vpop.permute.xlu1 %3224  ;;  %v3351_v26 = vpop.eup %3350  ;;  %v1174_v33 = vmul.f32 %v3349_v40, %v4134_v57 }
 0x3f5   :  { %v3227_v50 = vunpack.i.h.bf16 %v3225_v18  ;;  %v3226_v52 = vunpack.i.l.bf16 %v3225_v18  ;;  %2961 = vmatprep.mubr.msk.f32.mxu1 %vm617_vm5, %v1688_v58  ;;  %v3353_v31 = vpop.eup %3352  ;;  %v3134_v53 = vpack.c.bf16 %v3237_v62, %v3236_v61  ;;  %v1691_v54 = vmul.f32 %v3351_v26, %v4139_v4  ;;  %v4322_v4 = vld [vmem:[%s5122_s8] ss:$0 sm:$0xff]  ;;  %s3482_s8 = smov 16  }
 0x3f6   :  { %2934 = vmatmul.mubr.msk.f32.gmra.mrb[26].mxu0 %vm617_vm5, %v1172_v2  ;;  %v1176_v57 = vmul.f32 %v3353_v31, %v4177_v21  ;;  %1411 = vrot.lane.b32.xlu0 %v4322_v4, %s3479_s4  ;;  %v4331_v21 = vld [vmem:[%s5123_s9] ss:$0 sm:$0xff]  ;;  %s3483_s9 = smov 8  }
 0x3f7   :  { %v3130_v47 = vpack.c.bf16 %v3227_v50, %v3226_v52  ;;  %2936 = vmatprep.mubr.msk.f32.mxu0 %vm617_vm5, %v1173_v24  ;;  %1920 = vrot.lane.b32.xlu1 %v4322_v4, %s3480_s13 }
 0x3f8   :  { %2962 = vmatmul.mubr.msk.f32.gmra.mrb[12].mxu1 %vm617_vm5, %v1689_v43 }
 0x3f9   :  { %2964 = vmatprep.mubr.msk.f32.mxu1 %vm617_vm5, %v1690_v11  ;;  %3131 = vmatprep.subr.bf16.mxu0 %v3130_v47 }
 0x3fa   :  { %2937 = vmatmul.mubr.msk.f32.gmra.mrb[28].mxu0 %vm617_vm5, %v1174_v33  ;;  %1422 = vrot.lane.b32.xlu0 %v4331_v21, %s3479_s4 }
 0x3fb   :  { %v3355_v19 = vpop.eup %3354  ;;  %3133 = vmatpush3.bf16.msra.mxu0 %v3130_v47  ;;  %2429 = vrot.lane.b32.xlu1 %v4322_v4, %s3481_s6 }
 0x3fc   :  { %v3357_v9 = vpop.eup %3356  ;;  %3135 = vmatprep.subr.bf16.mxu0 %v3134_v53  ;;  %2965 = vmatmul.mubr.msk.f32.gmra.mrb[14].mxu1 %vm617_vm5, %v1691_v54  ;;  %v1175_v41 = vmul.f32 %v3355_v19, %v4189_v23 }
 0x3fd   :  { %v2195_v59 = vmul.f32 %v3357_v9, %v4086_v51  ;;  %v3359_v27 = vpop.eup %3358 }
 0x3fe   :  { %2939 = vmatprep.mubr.msk.f32.mxu0 %vm617_vm5, %v1175_v41  ;;  %1931 = vrot.lane.b32.xlu0 %v4331_v21, %s3480_s13 }
 0x3ff   :  { %3137 = vmatpush3.bf16.msra.mxu0 %v3134_v53  ;;  %2440 = vrot.lane.b32.xlu1 %v4331_v21, %s3481_s6 }
 0x400   :  { %2940 = vmatmul.mubr.msk.f32.gmra.mrb[30].mxu0 %vm617_vm5, %v1176_v57  ;;  %v4402_v57 = vpop.permute.xlu1 %1209 }
 0x401   :  { %2986 = vmatprep.mubr.msk.f32.mxu0 %vm617_vm5, %v2195_v59 }
 0x41c   :  { %v1666_v51 = vpop.xlane.xlu0 %1665 }
 0x41d   :  { %3360 = vrcp.f32 %v1666_v51 }
 0x41e   :  { %3362 = vrcp.f32 %v4197_v32 }
 0x41f   :  { %3364 = vrcp.f32 %v4246_v22  ;;  %v1693_v22 = vmul.f32 %v3359_v27, %v4181_v29 }
 0x420   :  { %v2175_v23 = vpop.xlane.xlu0 %2174  ;;  %3366 = vrcp.f32 %v4234_v56 }
 0x421   :  { %3368 = vrcp.f32 %v4270_v14 }
 0x422   :  { %3370 = vrcp.f32 %v4268_v44 }
 0x423   :  { %3372 = vrcp.f32 %v2175_v23 }
 0x424   :  { %v3245_v37 = vpop.permute.xlu0 %3244  ;;  %3374 = vrcp.f32 %v4282_v39 }
 0x425   :  { %v3247_v16 = vunpack.i.h.bf16 %v3245_v37  ;;  %v3246_v49 = vunpack.i.l.bf16 %v3245_v37 }
 0x427   :  { %v3361_v5 = vpop.eup %3360  ;;  %v3138_v34 = vpack.c.bf16 %v3247_v16, %v3246_v49 }
 0x428   :  { %v3363_v45 = vpop.eup %3362  ;;  %v1692_v36 = vmul.f32 %v3361_v5, %v4230_v7  ;;  %v4406_v23 = vpop.permute.xlu0 %1718 }
 0x429   :  { %v3365_v32 = vpop.eup %3364  ;;  %3139 = vmatprep.subr.bf16.mxu0 %v3138_v34  ;;  %v2196_v56 = vmul.f32 %v3363_v45, %v4059_v25 }
 0x42a   :  { %2967 = vmatprep.mubr.msk.f32.mxu1 %vm617_vm5, %v1692_v36  ;;  %3141 = vmatpush3.bf16.msra.mxu0 %v3138_v34  ;;  %v3367_v44 = vpop.eup %3366  ;;  %v2197_v14 = vmul.f32 %v3365_v32, %v4123_v12 }
 0x42b   :  { %2968 = vmatmul.mubr.msk.f32.gmra.mrb[16].mxu1 %vm617_vm5, %v1693_v22  ;;  %v3369_v60 = vpop.eup %3368  ;;  %v2198_v7 = vmul.f32 %v3367_v44, %v4104_v48 }
 0x42c   :  { %v3371_v29 = vpop.eup %3370  ;;  %v2199_v39 = vmul.f32 %v3369_v60, %v4158_v63 }
 0x42d   :  { %2987 = vmatmul.mubr.msk.f32.vlgmr.msra.gmra.mrb[32].mxu0 %vm617_vm5, %v2196_v56  ;;  %v3373_v38 = vpop.eup %3372  ;;  %v2200_v25 = vmul.f32 %v3371_v29, %v4150_v42 }
 0x42e   :  { %2989 = vmatprep.mubr.msk.f32.mxu0 %vm617_vm5, %v2197_v14  ;;  %v3375_v28 = vpop.eup %3374  ;;  %v2201_v12 = vmul.f32 %v3373_v38, %v4238_v0 }
 0x42f   :  { %v2202_v30 = vmul.f32 %v3375_v28, %v4185_v20 }
 0x431   :  { %2990 = vmatmul.mubr.msk.f32.gmra.mrb[34].mxu0 %vm617_vm5, %v2198_v7 }
 0x432   :  { %2992 = vmatprep.mubr.msk.f32.mxu0 %vm617_vm5, %v2199_v39 }
 0x435   :  { %2993 = vmatmul.mubr.msk.f32.gmra.mrb[36].mxu0 %vm617_vm5, %v2200_v25 }
 0x436   :  { %2995 = vmatprep.mubr.msk.f32.mxu0 %vm617_vm5, %v2201_v12 }
 0x439   :  { %2996 = vmatmul.mubr.msk.f32.gmra.mrb[38].mxu0 %vm617_vm5, %v2202_v30 }
 0x456   :  { %v2904_v48 = vpop.f32.mrb[16].mxu0 }
 0x457   :  { %v4367_v63 = vadd.f32 %v2904_v48, %v4260_v46  ;;  %v810_v55 = vpop.f32.mrb[17].mxu0 }
 0x458   :  { %v4370_v58 = vadd.f32 %v4260_v46, %v810_v55 }
 0x459   :  { %v851_v42 = vsel %vm849_vm13, %v4367_v63, 0.0 }
 0x45a   :  { %v850_v0 = vsel %vm849_vm13, %v4370_v58, 0.0 }
 0x45b   :  { %v852_v35 = vadd.f32 %v851_v42, %v850_v0 }
 0x46b   :  { %v2907_v18 = vpop.f32.mrb[18].mxu0 }
 0x46c   :  { %v820_v20 = vpop.f32.mrb[19].mxu0  ;;  %v4377_v2 = vadd.f32 %v2907_v18, %v4260_v46 }
 0x46d   :  { %v4380_v40 = vadd.f32 %v4260_v46, %v820_v20 }
 0x46e   :  { %v855_v24 = vsel %vm849_vm13, %v4377_v2, 0.0 }
 0x46f   :  { %v853_v50 = vsel %vm849_vm13, %v4380_v40, 0.0 }
 0x470   :  { %v854_v52 = vadd.f32 %v853_v50, %v852_v35 }
 0x472   :  { %v856_v62 = vadd.f32 %v855_v24, %v854_v52 }
 0x47d   :  { %v2910_v61 = vpop.f32.mrb[20].mxu0 }
 0x47e   :  { %v830_v43 = vpop.f32.mrb[21].mxu0  ;;  %v4387_v26 = vadd.f32 %v2910_v61, %v4260_v46 }
 0x47f   :  { %v4390_v47 = vadd.f32 %v4260_v46, %v830_v43 }
 0x480   :  { %v859_v31 = vsel %vm849_vm13, %v4387_v26, 0.0 }
 0x481   :  { %v857_v11 = vsel %vm849_vm13, %v4390_v47, 0.0 }
 0x482   :  { %v858_v33 = vadd.f32 %v857_v11, %v856_v62 }
 0x484   :  { %v860_v53 = vadd.f32 %v859_v31, %v858_v33 }
 0x4c1   :  { %v2913_v54 = vpop.f32.mrb[22].mxu0 }
 0x4c2   :  { %v840_v19 = vpop.f32.mrb[23].mxu0  ;;  %v4397_v9 = vadd.f32 %v2913_v54, %v4260_v46 }
 0x4c3   :  { %v4400_v41 = vadd.f32 %v4260_v46, %v840_v19 }
 0x4c4   :  { %v863_v27 = vsel %vm849_vm13, %v4397_v9, 0.0 }
 0x4c5   :  { %v861_v59 = vsel %vm849_vm13, %v4400_v41, 0.0  ;;  %v2932_v51 = vpop.f32.mrb[24].mxu0 }
 0x4c6   :  { %v862_v37 = vadd.f32 %v861_v59, %v860_v53  ;;  %v1302_v16 = vpop.f32.mrb[25].mxu0  ;;  %v4409_v49 = vadd.f32 %v2932_v51, %v4402_v57 }
 0x4c7   :  { %v4414_v5 = vadd.f32 %v1302_v16, %v4402_v57  ;;  %v2960_v46 = vpop.f32.mrb[10].mxu1 }
 0x4c8   :  { %v864_v34 = vadd.f32 %v863_v27, %v862_v37  ;;  %v1342_v45 = vsel %vm849_vm13, %v4409_v49, 0.0  ;;  %v4419_v36 = vadd.f32 %v2960_v46, %v4406_v23  ;;  %v1811_v32 = vpop.f32.mrb[11].mxu1 }
 0x4c9   :  { %v1341_v22 = vsel %vm849_vm13, %v4414_v5, 0.0  ;;  %v4424_v56 = vadd.f32 %v1811_v32, %v4406_v23  ;;  %v2935_v44 = vpop.f32.mrb[26].mxu0 }
 0x4ca   :  { %v865_v14 = vrot.slane %v864_v34, 4  ;;  %v1343_v60 = vadd.f32 %v1342_v45, %v1341_v22  ;;  %v1851_v7 = vsel %vm849_vm13, %v4419_v36, 0.0  ;;  %v1312_v29 = vpop.f32.mrb[27].mxu0  ;;  %v4431_v38 = vadd.f32 %v2935_v44, %v4402_v57 }
 0x4cb   :  { %v1850_v39 = vsel %vm849_vm13, %v4424_v56, 0.0  ;;  %v4434_v25 = vadd.f32 %v1312_v29, %v4402_v57  ;;  %v2963_v28 = vpop.f32.mrb[12].mxu1 }
 0x4cc   :  { %v866_v12 = vadd.f32 %v865_v14, %v864_v34  ;;  %v1852_v30 = vadd.f32 %v1851_v7, %v1850_v39  ;;  %v1821_v48 = vpop.f32.mrb[13].mxu1  ;;  %v4439_v42 = vadd.f32 %v2963_v28, %v4406_v23  ;;  %v1346_v52 = vsel %vm849_vm13, %v4431_v38, 0.0 }
 0x4cd   :  { %v1344_v55 = vsel %vm849_vm13, %v4434_v25, 0.0  ;;  %v4442_v0 = vadd.f32 %v1821_v48, %v4406_v23  ;;  %v2938_v35 = vpop.f32.mrb[28].mxu0 }
 0x4ce   :  { %v867_v18 = vrot.slane %v866_v12, 2  ;;  %v1345_v20 = vadd.f32 %v1344_v55, %v1343_v60  ;;  %v1322_v50 = vpop.f32.mrb[29].mxu0  ;;  %v4449_v62 = vadd.f32 %v2938_v35, %v4402_v57  ;;  %v1855_v54 = vsel %vm849_vm13, %v4439_v42, 0.0 }
 0x4cf   :  { %v1853_v24 = vsel %vm849_vm13, %v4442_v0, 0.0  ;;  %v4452_v61 = vadd.f32 %v1322_v50, %v4402_v57  ;;  %v2966_v43 = vpop.f32.mrb[14].mxu1 }
 0x4d0   :  { %v868_v11 = vadd.f32 %v867_v18, %v866_v12  ;;  %v1854_v33 = vadd.f32 %v1853_v24, %v1852_v30  ;;  %v1347_v31 = vadd.f32 %v1346_v52, %v1345_v20  ;;  %v1831_v53 = vpop.f32.mrb[15].mxu1  ;;  %v4459_v59 = vadd.f32 %v2966_v43, %v4406_v23 }
 0x4d1   :  { %v1348_v19 = vsel %vm849_vm13, %v4452_v61, 0.0  ;;  %v4462_v51 = vadd.f32 %v1831_v53, %v4406_v23  ;;  %v1350_v46 = vsel %vm849_vm13, %v4449_v62, 0.0 }
 0x4d2   :  { %v869_v37 = vrot.slane %v868_v11, 1  ;;  %v1349_v16 = vadd.f32 %v1348_v19, %v1347_v31  ;;  %v1856_v27 = vadd.f32 %v1855_v54, %v1854_v33  ;;  %v1859_v60 = vsel %vm849_vm13, %v4459_v59, 0.0 }
 0x4d3   :  { %v1857_v34 = vsel %vm849_vm13, %v4462_v51, 0.0  ;;  %v2941_v45 = vpop.f32.mrb[30].mxu0 }
 0x4d4   :  { %v870_v32 = vadd.f32 %v869_v37, %v868_v11  ;;  %v1858_v22 = vadd.f32 %v1857_v34, %v1856_v27  ;;  %v1332_v44 = vpop.f32.mrb[31].mxu0  ;;  %v1351_v14 = vadd.f32 %v1350_v46, %v1349_v16 }
 0x4d5   :  { %v1333_v39 = vadd.f32 %v1332_v44, %v4402_v57 }
 0x4d6   :  { %v872_v7 = vmul.f32 0.015625, %v870_v32  ;;  %v4470_v29 = vadd.f32 %v1859_v60, %v1858_v22 }
 0x4d8   :  { %v4474_v28 = vsub.f32 %v4370_v58, %v872_v7  ;;  %v4477_v12 = vsub.f32 %v4367_v63, %v872_v7  ;;  %v4480_v30 = vsub.f32 %v4380_v40, %v872_v7  ;;  %v4483_v48 = vsub.f32 %v4377_v2, %v872_v7 }
 0x4d9   :  { %v4486_v55 = vsub.f32 %v4390_v47, %v872_v7  ;;  %v4489_v35 = vsub.f32 %v4387_v26, %v872_v7  ;;  %v4492_v18 = vsub.f32 %v4400_v41, %v872_v7  ;;  %v4495_v58 = vsub.f32 %v4397_v9, %v872_v7 }
 0x4da   :  { %v881_v63 = vmul.f32 %v4474_v28, %v4474_v28  ;;  %v882_v40 = vmul.f32 %v4477_v12, %v4477_v12  ;;  %v883_v2 = vmul.f32 %v4480_v30, %v4480_v30  ;;  %v1338_v47 = vadd.f32 %v2941_v45, %v4402_v57 }
 0x4db   :  { %v1352_v26 = vsel %vm849_vm13, %v1333_v39, 0.0  ;;  %v884_v41 = vmul.f32 %v4483_v48, %v4483_v48  ;;  %v885_v52 = vmul.f32 %v4486_v55, %v4486_v55  ;;  %v886_v57 = vmul.f32 %v4489_v35, %v4489_v35 }
 0x4dc   :  { %v889_v20 = vsel %vm849_vm13, %v881_v63, 0.0  ;;  %v890_v9 = vsel %vm849_vm13, %v882_v40, 0.0  ;;  %v892_v24 = vsel %vm849_vm13, %v883_v2, 0.0  ;;  %v1353_v43 = vadd.f32 %v1352_v26, %v1351_v14 }
 0x4dd   :  { %v891_v50 = vadd.f32 %v890_v9, %v889_v20  ;;  %v1354_v33 = vsel %vm849_vm13, %v1338_v47, 0.0  ;;  %v894_v31 = vsel %vm849_vm13, %v884_v41, 0.0  ;;  %v887_v19 = vmul.f32 %v4492_v18, %v4492_v18 }
 0x4de   :  { %v1355_v53 = vadd.f32 %v1354_v33, %v1353_v43  ;;  %v896_v37 = vsel %vm849_vm13, %v885_v52, 0.0  ;;  %v888_v46 = vmul.f32 %v4495_v58, %v4495_v58  ;;  %v898_v34 = vsel %vm849_vm13, %v886_v57, 0.0 }
 0x4df   :  { %v893_v11 = vadd.f32 %v892_v24, %v891_v50  ;;  %v900_v22 = vsel %vm849_vm13, %v887_v19, 0.0 }
 0x4e0   :  { %v1356_v16 = vrot.slane %v1355_v53, 4  ;;  %v902_v60 = vsel %vm849_vm13, %v888_v46, 0.0 }
 0x4e1   :  { %v895_v54 = vadd.f32 %v894_v31, %v893_v11 }
 0x4e2   :  { %v1357_v45 = vadd.f32 %v1356_v16, %v1355_v53 }
 0x4e3   :  { %v897_v27 = vadd.f32 %v896_v37, %v895_v54 }
 0x4e4   :  { %v1358_v44 = vrot.slane %v1357_v45, 2 }
 0x4e5   :  { %v899_v32 = vadd.f32 %v898_v34, %v897_v27 }
 0x4e6   :  { %v1359_v7 = vadd.f32 %v1358_v44, %v1357_v45 }
 0x4e7   :  { %v901_v14 = vadd.f32 %v900_v22, %v899_v32 }
 0x4e8   :  { %v1360_v40 = vrot.slane %v1359_v7, 1 }
 0x4e9   :  { %v903_v63 = vadd.f32 %v902_v60, %v901_v14 }
 0x4ea   :  { %v1361_v26 = vadd.f32 %v1360_v40, %v1359_v7 }
 0x4eb   :  { %v904_v2 = vrot.slane %v903_v63, 4 }
 0x4ec   :  { %v1362_v20 = vmul.f32 0.015625, %v1361_v26  ;;  %v4569_v26 = vpop.permute.xlu1 %2227 }
 0x4ed   :  { %v905_v41 = vadd.f32 %v904_v2, %v903_v63 }
 0x4ee   :  { %v4525_v50 = vsub.f32 %v4414_v5, %v1362_v20  ;;  %v4528_v52 = vsub.f32 %v4409_v49, %v1362_v20  ;;  %v4531_v24 = vsub.f32 %v4434_v25, %v1362_v20  ;;  %v4534_v43 = vsub.f32 %v4431_v38, %v1362_v20 }
 0x4ef   :  { %v906_v9 = vrot.slane %v905_v41, 2  ;;  %v4537_v33 = vsub.f32 %v4452_v61, %v1362_v20  ;;  %v4540_v57 = vsub.f32 %v4449_v62, %v1362_v20  ;;  %v4542_v31 = vsub.f32 %v1333_v39, %v1362_v20 }
 0x4f0   :  { %v4544_v5 = vsub.f32 %v1338_v47, %v1362_v20  ;;  %v1371_v49 = vmul.f32 %v4525_v50, %v4525_v50  ;;  %v1372_v25 = vmul.f32 %v4528_v52, %v4528_v52  ;;  %v1373_v38 = vmul.f32 %v4531_v24, %v4531_v24 }
 0x4f1   :  { %v907_v11 = vadd.f32 %v906_v9, %v905_v41  ;;  %v1374_v61 = vmul.f32 %v4534_v43, %v4534_v43  ;;  %v1375_v19 = vmul.f32 %v4537_v33, %v4537_v33  ;;  %v1376_v46 = vmul.f32 %v4540_v57, %v4540_v57 }
 0x4f2   :  { %v1379_v62 = vsel %vm849_vm13, %v1371_v49, 0.0  ;;  %v1380_v39 = vsel %vm849_vm13, %v1372_v25, 0.0  ;;  %v1382_v37 = vsel %vm849_vm13, %v1373_v38, 0.0  ;;  %v1377_v22 = vmul.f32 %v4542_v31, %v4542_v31 }
 0x4f3   :  { %v908_v53 = vrot.slane %v907_v11, 1  ;;  %v1381_v47 = vadd.f32 %v1380_v39, %v1379_v62  ;;  %v1384_v34 = vsel %vm849_vm13, %v1374_v61, 0.0  ;;  %v1386_v44 = vsel %vm849_vm13, %v1375_v19, 0.0 }
 0x4f4   :  { %v1378_v60 = vmul.f32 %v4544_v5, %v4544_v5  ;;  %v1388_v7 = vsel %vm849_vm13, %v1376_v46, 0.0  ;;  %v1390_v40 = vsel %vm849_vm13, %v1377_v22, 0.0 }
 0x4f5   :  { %v909_v54 = vadd.f32 %v908_v53, %v907_v11  ;;  %v1383_v27 = vadd.f32 %v1382_v37, %v1381_v47 }
 0x4f6   :  { %v1392_v9 = vsel %vm849_vm13, %v1378_v60, 0.0 }
 0x4f7   :  { %v910_v16 = vmul.f32 0.015625, %v909_v54  ;;  %v1385_v32 = vadd.f32 %v1384_v34, %v1383_v27 }
 0x4f9   :  { %v911_v45 = vadd.f32 1e-05, %v910_v16  ;;  %v1387_v14 = vadd.f32 %v1386_v44, %v1385_v32 }
 0x4fb   :  { %3376 = vrsqrt.f32 %v911_v45  ;;  %v1389_v63 = vadd.f32 %v1388_v7, %v1387_v14 }
 0x4fd   :  { %v1391_v41 = vadd.f32 %v1390_v40, %v1389_v63 }
 0x4fe   :  { %v2969_v2 = vpop.f32.mrb[16].mxu1 }
 0x4ff   :  { %v1841_v20 = vpop.f32.mrb[17].mxu1  ;;  %v4573_v11 = vadd.f32 %v2969_v2, %v4406_v23  ;;  %v1393_v38 = vadd.f32 %v1392_v9, %v1391_v41 }
 0x500   :  { %v4576_v49 = vadd.f32 %v1841_v20, %v4406_v23  ;;  %v2988_v25 = vpop.f32.mrb[32].mxu0 }
 0x501   :  { %v4579_v53 = vadd.f32 %v2988_v25, %v4569_v26  ;;  %v2320_v61 = vpop.f32.mrb[33].mxu0  ;;  %v1394_v54 = vrot.slane %v1393_v38, 4  ;;  %v1863_v23 = vsel %vm849_vm13, %v4573_v11, 0.0 }
 0x502   :  { %v1861_v62 = vsel %vm849_vm13, %v4576_v49, 0.0  ;;  %v4584_v39 = vadd.f32 %v2320_v61, %v4569_v26 }
 0x503   :  { %v1862_v47 = vadd.f32 %v1861_v62, %v4470_v29  ;;  %v2360_v19 = vsel %vm849_vm13, %v4579_v53, 0.0  ;;  %v1395_v46 = vadd.f32 %v1394_v54, %v1393_v38 }
 0x504   :  { %v2359_v37 = vsel %vm849_vm13, %v4584_v39, 0.0  ;;  %v2991_v16 = vpop.f32.mrb[34].mxu0 }
 0x505   :  { %v3377_v27 = vpop.eup %3376  ;;  %v1864_v34 = vadd.f32 %v1863_v23, %v1862_v47  ;;  %v2361_v45 = vadd.f32 %v2360_v19, %v2359_v37  ;;  %v2330_v32 = vpop.f32.mrb[35].mxu0  ;;  %v1396_v7 = vrot.slane %v1395_v46, 2  ;;  %v4607_v40 = vadd.f32 %v2991_v16, %v4569_v26 }
 0x506   :  { %v4594_v22 = vmul.f32 %v3377_v27, %v4483_v48  ;;  %v4597_v29 = vmul.f32 %v3377_v27, %v4486_v55  ;;  %v4600_v44 = vmul.f32 %v3377_v27, %v4489_v35  ;;  %v919_v14 = vmul.f32 %v3377_v27, %v4492_v18 }
 0x507   :  { %v4604_v60 = vmul.f32 %v3377_v27, %v4495_v58  ;;  %v1865_v63 = vrot.slane %v1864_v34, 4  ;;  %v4610_v2 = vadd.f32 %v2330_v32, %v4569_v26  ;;  %v914_v55 = vmul.f32 %v3377_v27, %v4477_v12 }
 0x508   :  { %v2994_v48 = vpop.f32.mrb[36].mxu0  ;;  %v1397_v41 = vadd.f32 %v1396_v7, %v1395_v46  ;;  %v2364_v62 = vsel %vm849_vm13, %v4607_v40, 0.0 }
 0x509   :  { %v1866_v20 = vadd.f32 %v1865_v63, %v1864_v34  ;;  %v2340_v35 = vpop.f32.mrb[37].mxu0  ;;  %v2362_v18 = vsel %vm849_vm13, %v4610_v2, 0.0  ;;  %v928_v9 = vmul.f32 %v4322_v4, %v914_v55  ;;  %v4622_v54 = vadd.f32 %v2994_v48, %v4569_v26 }
 0x50a   :  { %v4616_v58 = vadd.f32 %v2340_v35, %v4569_v26  ;;  %v1398_v25 = vrot.slane %v1397_v41, 1  ;;  %v2363_v61 = vadd.f32 %v2362_v18, %v2361_v45  ;;  %v4638_v35 = vmul.f32 %v3377_v27, %v4474_v28 }
 0x50b   :  { %v1867_v38 = vrot.slane %v1866_v20, 2  ;;  %v4627_v19 = vadd.f32 %v4331_v21, %v928_v9  ;;  %v2368_v63 = vsel %vm849_vm13, %v4622_v54, 0.0  ;;  %v4641_v9 = vmul.f32 %v3377_v27, %v4480_v30 }
 0x50c   :  { %v2366_v12 = vsel %vm849_vm13, %v4616_v58, 0.0  ;;  %v2997_v47 = vpop.f32.mrb[38].mxu0  ;;  %v1399_v23 = vadd.f32 %v1398_v25, %v1397_v41  ;;  %v2365_v16 = vadd.f32 %v2364_v62, %v2363_v61 }
 0x50d   :  { %v1868_v37 = vadd.f32 %v1867_v38, %v1866_v20  ;;  %v2350_v46 = vpop.f32.mrb[39].mxu0  ;;  %v959_v55 = vmul.f32 1.442695, %v4627_v19  ;;  %v4644_v61 = vadd.f32 %v2997_v47, %v4569_v26  ;;  %vm950_vm5 = vcmp.gt.f32.partialorder %v4627_v19, 0.0 }
 0x50e   :  { %v4630_v34 = vadd.f32 %v2350_v46, %v4569_v26  ;;  %v1400_v45 = vmul.f32 0.015625, %v1399_v23  ;;  %v2367_v7 = vadd.f32 %v2366_v12, %v2365_v16 }
 0x50f   :  { %v1869_v32 = vrot.slane %v1868_v37, 1 }
 0x510   :  { %v2370_v48 = vsel %vm849_vm13, %v4630_v34, 0.0  ;;  %v1401_v41 = vadd.f32 1e-05, %v1400_v45  ;;  %v2369_v18 = vadd.f32 %v2368_v63, %v2367_v7  ;;  %v933_v45 = vmul.f32 %v4322_v4, %v919_v14 }
 0x511   :  { %v1870_v20 = vadd.f32 %v1869_v32, %v1868_v37  ;;  %v2372_v37 = vsel %vm849_vm13, %v4644_v61, 0.0  ;;  %v930_v63 = vmul.f32 %v4322_v4, %v4594_v22 }
 0x512   :  { %3378 = vrsqrt.f32 %v1401_v41  ;;  %v2371_v38 = vadd.f32 %v2370_v48, %v2369_v18 }
 0x513   :  { %v1871_v25 = vmul.f32 0.015625, %v1870_v20  ;;  %3380 = vpow2.f32 %v959_v55 }
 0x514   :  { %v2373_v46 = vadd.f32 %v2372_v37, %v2371_v38 }
 0x515   :  { %v4647_v62 = vsub.f32 %v4424_v56, %v1871_v25  ;;  %v4650_v12 = vsub.f32 %v4419_v36, %v1871_v25  ;;  %v4653_v28 = vsub.f32 %v4442_v0, %v1871_v25  ;;  %v4656_v23 = vsub.f32 %v4439_v42, %v1871_v25 }
 0x516   :  { %v4659_v30 = vsub.f32 %v4462_v51, %v1871_v25  ;;  %v4662_v27 = vsub.f32 %v4459_v59, %v1871_v25  ;;  %v4665_v26 = vsub.f32 %v4576_v49, %v1871_v25  ;;  %v4668_v56 = vsub.f32 %v4573_v11, %v1871_v25 }
 0x517   :  { %v1880_v36 = vmul.f32 %v4647_v62, %v4647_v62  ;;  %v1881_v0 = vmul.f32 %v4650_v12, %v4650_v12  ;;  %v1882_v42 = vmul.f32 %v4653_v28, %v4653_v28  ;;  %v1883_v51 = vmul.f32 %v4656_v23, %v4656_v23 }
 0x518   :  { %v1884_v59 = vmul.f32 %v4659_v30, %v4659_v30  ;;  %v1885_v32 = vmul.f32 %v4662_v27, %v4662_v27  ;;  %v1886_v55 = vmul.f32 %v4665_v26, %v4665_v26  ;;  %v2374_v18 = vrot.slane %v2373_v46, 4 }
 0x519   :  { %v1888_v49 = vsel %vm849_vm13, %v1880_v36, 0.0  ;;  %v1889_v11 = vsel %vm849_vm13, %v1881_v0, 0.0  ;;  %v1891_v16 = vsel %vm849_vm13, %v1882_v42, 0.0  ;;  %v1893_v41 = vsel %vm849_vm13, %v1883_v51, 0.0 }
 0x51a   :  { %v1890_v47 = vadd.f32 %v1889_v11, %v1888_v49  ;;  %v1895_v20 = vsel %vm849_vm13, %v1884_v59, 0.0  ;;  %v2375_v22 = vadd.f32 %v2374_v18, %v2373_v46  ;;  %v1897_v11 = vsel %vm849_vm13, %v1885_v32, 0.0 }
 0x51c   :  { %v1892_v7 = vadd.f32 %v1891_v16, %v1890_v47  ;;  %v3379_v48 = vpop.eup %3378 }
 0x51d   :  { %v3381_v25 = vpop.eup %3380  ;;  %v4695_v38 = vmul.f32 %v3379_v48, %v4542_v31  ;;  %v4698_v36 = vmul.f32 %v3379_v48, %v4528_v52  ;;  %v4701_v0 = vmul.f32 %v3379_v48, %v4525_v50  ;;  %v4704_v42 = vmul.f32 %v3379_v48, %v4534_v43 }
 0x51e   :  { %v1894_v14 = vadd.f32 %v1893_v41, %v1892_v7  ;;  %v4707_v51 = vmul.f32 %v3379_v48, %v4531_v24  ;;  %v4710_v59 = vmul.f32 %v3379_v48, %v4540_v57  ;;  %v4713_v31 = vmul.f32 %v3379_v48, %v4537_v33 }
 0x51f   :  { %v4716_v52 = vadd.f32 %v4331_v21, %v933_v45  ;;  %v1887_v50 = vmul.f32 %v4668_v56, %v4668_v56  ;;  %v2376_v43 = vrot.slane %v2375_v22, 2  ;;  %v2577_v37 = vadd.f32 -1.0, %v3381_v25 }
 0x520   :  { %v1896_v49 = vadd.f32 %v1895_v20, %v1894_v14  ;;  %v4722_v24 = vadd.f32 %v4331_v21, %v930_v63  ;;  %v1899_v57 = vsel %vm849_vm13, %v1886_v55, 0.0  ;;  %v4731_v63 = vmul.f32 %v3379_v48, %v4544_v5 }
 0x521   :  { %v2377_v16 = vadd.f32 %v2376_v43, %v2375_v22  ;;  %v969_v33 = vmul.f32 1.442695, %v4716_v52  ;;  %v1901_v45 = vsel %vm849_vm13, %v1887_v50, 0.0  ;;  %v982_v32 = vsel %vm950_vm5, %v4627_v19, %v2577_v37 }
 0x522   :  { %v1898_v47 = vadd.f32 %v1897_v11, %v1896_v49  ;;  %v963_v20 = vmul.f32 1.442695, %v4722_v24  ;;  %v990_v14 = vadd.f32 %v982_v32, %v3681_v1  ;;  %v932_v32 = vmul.f32 %v4322_v4, %v4600_v44  ;;  %v4786_v44 = vpop.permute.xlu0 %1411 }
 0x523   :  { %v2378_v7 = vrot.slane %v2377_v16, 1  ;;  %3382 = vpow2.f32 %v969_v33  ;;  %v927_v33 = vmul.f32 %v4322_v4, %v4638_v35  ;;  %vm955_vm14 = vcmp.gt.f32.partialorder %v4716_v52, 0.0 }
 0x524   :  { %v1900_v46 = vadd.f32 %v1899_v57, %v1898_v47  ;;  %3384 = vpow2.f32 %v963_v20  ;;  %998 = vst.msk [vmem:[#allocation2 + $0x8] sm:$0xff] %vm849_vm13, %v990_v14  ;;  %v934_v14 = vmul.f32 %v4322_v4, %v4604_v60  ;;  %vm952_vm15 = vcmp.gt.f32.partialorder %v4722_v24, 0.0 }
 0x525   :  { %v2379_v18 = vadd.f32 %v2378_v7, %v2377_v16 }
 0x526   :  { %v1902_v41 = vadd.f32 %v1901_v45, %v1900_v46 }
 0x527   :  { %v2380_v55 = vmul.f32 0.015625, %v2379_v18 }
 0x528   :  { %v1903_v25 = vrot.slane %v1902_v41, 4 }
 0x529   :  { %v4735_v49 = vsub.f32 %v4584_v39, %v2380_v55  ;;  %v4738_v50 = vsub.f32 %v4579_v53, %v2380_v55  ;;  %v4741_v19 = vsub.f32 %v4610_v2, %v2380_v55  ;;  %v4744_v11 = vsub.f32 %v4607_v40, %v2380_v55 }
 0x52a   :  { %v1904_v22 = vadd.f32 %v1903_v25, %v1902_v41  ;;  %v4748_v48 = vsub.f32 %v4616_v58, %v2380_v55  ;;  %v4751_v43 = vsub.f32 %v4622_v54, %v2380_v55  ;;  %v4754_v39 = vsub.f32 %v4630_v34, %v2380_v55 }
 0x52b   :  { %v4757_v53 = vsub.f32 %v4644_v61, %v2380_v55  ;;  %v2389_v2 = vmul.f32 %v4735_v49, %v4735_v49  ;;  %v2390_v40 = vmul.f32 %v4738_v50, %v4738_v50  ;;  %v2391_v47 = vmul.f32 %v4741_v19, %v4741_v19 }
 0x52c   :  { %v1905_v5 = vrot.slane %v1904_v22, 2  ;;  %v2392_v54 = vmul.f32 %v4744_v11, %v4744_v11  ;;  %v2393_v16 = vmul.f32 %v4748_v48, %v4748_v48  ;;  %v2394_v20 = vmul.f32 %v4751_v43, %v4751_v43 }
 0x52d   :  { %v2397_v37 = vsel %vm849_vm13, %v2389_v2, 0.0  ;;  %v2398_v34 = vsel %vm849_vm13, %v2390_v40, 0.0  ;;  %v2400_v46 = vsel %vm849_vm13, %v2391_v47, 0.0  ;;  %v3383_v41 = vpop.eup %3382  ;;  %v929_v25 = vmul.f32 %v4322_v4, %v4641_v9 }
 0x52e   :  { %v1906_v58 = vadd.f32 %v1905_v5, %v1904_v22  ;;  %v2399_v61 = vadd.f32 %v2398_v34, %v2397_v37  ;;  %v2402_v18 = vsel %vm849_vm13, %v2392_v54, 0.0  ;;  %v3385_v55 = vpop.eup %3384  ;;  %v2395_v5 = vmul.f32 %v4754_v39, %v4754_v39 }
 0x52f   :  { %v2404_v2 = vsel %vm849_vm13, %v2393_v16, 0.0  ;;  %v4789_v40 = vadd.f32 %v4331_v21, %v927_v33  ;;  %v931_v47 = vmul.f32 %v4322_v4, %v4597_v29  ;;  %v2582_v9 = vadd.f32 -1.0, %v3383_v41 }
 0x530   :  { %v1907_v57 = vrot.slane %v1906_v58, 1  ;;  %v2401_v7 = vadd.f32 %v2400_v46, %v2399_v61  ;;  %v2396_v54 = vmul.f32 %v4757_v53, %v4757_v53  ;;  %v2406_v37 = vsel %vm849_vm13, %v2394_v20, 0.0 }
 0x531   :  { %v4798_v34 = vadd.f32 %v4331_v21, %v929_v25  ;;  %v2579_v4 = vadd.f32 -1.0, %v3385_v55  ;;  %v2408_v29 = vsel %vm849_vm13, %v2395_v5, 0.0  ;;  %v1415_v16 = vmul.f32 %v4786_v44, %v4698_v36 }
 0x532   :  { %v1908_v45 = vadd.f32 %v1907_v57, %v1906_v58  ;;  %v2403_v35 = vadd.f32 %v2402_v18, %v2401_v7  ;;  %v4801_v57 = vadd.f32 %v4331_v21, %v932_v32  ;;  %v957_v46 = vmul.f32 1.442695, %v4789_v40  ;;  %v4819_v18 = vpop.permute.xlu0 %1422 }
 0x533   :  { %v4809_v33 = vadd.f32 %v4331_v21, %v931_v47  ;;  %v984_v7 = vsel %vm952_vm15, %v4722_v24, %v2579_v4  ;;  %v4813_v41 = vadd.f32 %v4331_v21, %v934_v14  ;;  %v987_v32 = vsel %vm955_vm14, %v4716_v52, %v2582_v9 }
 0x534   :  { %v1909_v22 = vmul.f32 0.015625, %v1908_v45  ;;  %v2405_v60 = vadd.f32 %v2404_v2, %v2403_v35  ;;  %v2410_v20 = vsel %vm849_vm13, %v2396_v54, 0.0  ;;  %v992_v36 = vadd.f32 %v984_v7, %v3691_v6 }
 0x535   :  { %v961_v25 = vmul.f32 1.442695, %v4798_v34  ;;  %v965_v21 = vmul.f32 1.442695, %v4809_v33  ;;  %v995_v24 = vadd.f32 %v987_v32, %v3711_v17  ;;  %v4828_v52 = vadd.f32 %v4819_v18, %v1415_v16 }
 0x536   :  { %v1910_v58 = vadd.f32 1e-05, %v1909_v22  ;;  %v2407_v61 = vadd.f32 %v2406_v37, %v2405_v60  ;;  %v967_v22 = vmul.f32 1.442695, %v4801_v57  ;;  %1000 = vst.msk [vmem:[#allocation2 + $0x18] sm:$0xff] %vm849_vm13, %v992_v36  ;;  %v1414_v2 = vmul.f32 %v4786_v44, %v4701_v0  ;;  %v1921_v60 = vpop.permute.xlu1 %1920 }
 0x537   :  { %v971_v35 = vmul.f32 1.442695, %v4813_v41  ;;  %1003 = vst.msk [vmem:[#allocation2 + $0x30] sm:$0xff] %vm849_vm13, %v995_v24  ;;  %v1417_v47 = vmul.f32 %v4786_v44, %v4704_v42  ;;  %v1443_v54 = vmul.f32 1.442695, %v4828_v52  ;;  %v1416_v37 = vmul.f32 %v4786_v44, %v4707_v51  ;;  %v1932_v42 = vpop.permute.xlu0 %1931 }
 0x538   :  { %3386 = vrsqrt.f32 %v1910_v58  ;;  %v2409_v45 = vadd.f32 %v2408_v29, %v2407_v61  ;;  %vm949_vm0 = vcmp.gt.f32.partialorder %v4789_v40, 0.0  ;;  %v4861_v24 = vadd.f32 %v4819_v18, %v1414_v2 }
 0x539   :  { %3388 = vpow2.f32 %v957_v46  ;;  %vm954_vm1 = vcmp.gt.f32.partialorder %v4801_v57, 0.0  ;;  %vm951_vm2 = vcmp.gt.f32.partialorder %v4798_v34, 0.0  ;;  %vm953_vm3 = vcmp.gt.f32.partialorder %v4809_v33, 0.0 }
 0x53a   :  { %v2411_v55 = vadd.f32 %v2410_v20, %v2409_v45  ;;  %3390 = vpow2.f32 %v961_v25  ;;  %vm956_vm4 = vcmp.gt.f32.partialorder %v4813_v41, 0.0  ;;  %vm1434_vm5 = vcmp.gt.f32.partialorder %v4828_v52, 0.0 }
 0x53b   :  { %3392 = vpow2.f32 %v967_v22  ;;  %vm1433_vm14 = vcmp.gt.f32.partialorder %v4861_v24, 0.0 }
 0x53c   :  { %v2412_v14 = vrot.slane %v2411_v55, 4  ;;  %3394 = vpow2.f32 %v965_v21 }
 0x53d   :  { %3396 = vpow2.f32 %v971_v35 }
 0x53e   :  { %v2413_v5 = vadd.f32 %v2412_v14, %v2411_v55  ;;  %3398 = vpow2.f32 %v1443_v54 }
 0x540   :  { %v2414_v58 = vrot.slane %v2413_v5, 2 }
 0x542   :  { %v3387_v9 = vpop.eup %3386  ;;  %v2415_v16 = vadd.f32 %v2414_v58, %v2413_v5 }
 0x543   :  { %v1918_v61 = vmul.f32 %v3387_v9, %v4665_v26  ;;  %v1913_v4 = vmul.f32 %v3387_v9, %v4650_v12  ;;  %v1912_v29 = vmul.f32 %v3387_v9, %v4647_v62  ;;  %v1915_v0 = vmul.f32 %v3387_v9, %v4656_v23 }
 0x544   :  { %v1914_v46 = vmul.f32 %v3387_v9, %v4653_v28  ;;  %v1917_v45 = vmul.f32 %v3387_v9, %v4662_v27  ;;  %v1916_v7 = vmul.f32 %v3387_v9, %v4659_v30  ;;  %v1919_v36 = vmul.f32 %v3387_v9, %v4668_v56  ;;  %v3389_v30 = vpop.eup %3388 }
 0x545   :  { %v1924_v32 = vmul.f32 %v1921_v60, %v1913_v4  ;;  %v1923_v20 = vmul.f32 %v1921_v60, %v1912_v29  ;;  %v1926_v51 = vmul.f32 %v1921_v60, %v1915_v0  ;;  %v2416_v26 = vrot.slane %v2415_v16, 1  ;;  %v3391_v14 = vpop.eup %3390 }
 0x546   :  { %v1925_v25 = vmul.f32 %v1921_v60, %v1914_v46  ;;  %v1928_v12 = vmul.f32 %v1921_v60, %v1917_v45  ;;  %v1927_v55 = vmul.f32 %v1921_v60, %v1916_v7  ;;  %v1419_v28 = vmul.f32 %v4786_v44, %v4710_v59  ;;  %v3393_v59 = vpop.eup %3392 }
 0x547   :  { %v4847_v62 = vadd.f32 %v1932_v42, %v1924_v32  ;;  %v4849_v23 = vadd.f32 %v1932_v42, %v1923_v20  ;;  %v4851_v22 = vadd.f32 %v1932_v42, %v1926_v51  ;;  %v2417_v27 = vadd.f32 %v2416_v26, %v2415_v16  ;;  %v3395_v16 = vpop.eup %3394 }
 0x548   :  { %v4856_v21 = vadd.f32 %v1932_v42, %v1925_v25  ;;  %v4858_v56 = vadd.f32 %v1932_v42, %v1928_v12  ;;  %v4865_v9 = vadd.f32 %v1932_v42, %v1927_v55  ;;  %v1930_v58 = vmul.f32 %v1921_v60, %v1919_v36  ;;  %v3397_v7 = vpop.eup %3396 }
 0x549   :  { %v1952_v35 = vmul.f32 1.442695, %v4847_v62  ;;  %v1950_v5 = vmul.f32 1.442695, %v4849_v23  ;;  %v2418_v4 = vmul.f32 0.015625, %v2417_v27  ;;  %v1418_v0 = vmul.f32 %v4786_v44, %v4713_v31 }
 0x54a   :  { %v1956_v29 = vmul.f32 1.442695, %v4851_v22  ;;  %v1954_v2 = vmul.f32 1.442695, %v4856_v21  ;;  %v4872_v46 = vadd.f32 %v4819_v18, %v1417_v47  ;;  %v4875_v45 = vadd.f32 %v4819_v18, %v1416_v37 }
 0x54b   :  { %3400 = vpow2.f32 %v1952_v35  ;;  %v2419_v32 = vadd.f32 1e-05, %v2418_v4  ;;  %v1960_v54 = vmul.f32 1.442695, %v4858_v56  ;;  %v4880_v20 = vadd.f32 %v4819_v18, %v1419_v28  ;;  %v4906_v4 = vpop.eup %3398 }
 0x54c   :  { %3402 = vpow2.f32 %v1950_v5  ;;  %v1958_v31 = vmul.f32 1.442695, %v4865_v9  ;;  %v4883_v51 = vadd.f32 %v1932_v42, %v1930_v58  ;;  %v1929_v47 = vmul.f32 %v1921_v60, %v1918_v61 }
 0x54d   :  { %3404 = vpow2.f32 %v1956_v29  ;;  %v1441_v37 = vmul.f32 1.442695, %v4861_v24  ;;  %v2576_v36 = vadd.f32 -1.0, %v3389_v30  ;;  %v2578_v26 = vadd.f32 -1.0, %v3391_v14 }
 0x54e   :  { %3406 = vrsqrt.f32 %v2419_v32  ;;  %v1964_v25 = vmul.f32 1.442695, %v4883_v51  ;;  %v4887_v12 = vadd.f32 %v1932_v42, %v1929_v47  ;;  %v1447_v55 = vmul.f32 1.442695, %v4872_v46 }
 0x54f   :  { %3408 = vpow2.f32 %v1954_v2  ;;  %v1445_v28 = vmul.f32 1.442695, %v4875_v45  ;;  %v4892_v27 = vadd.f32 %v4819_v18, %v1418_v0  ;;  %v981_v60 = vsel %vm949_vm0, %v4789_v40, %v2576_v36 }
 0x550   :  { %3410 = vpow2.f32 %v1960_v54  ;;  %v1962_v61 = vmul.f32 1.442695, %v4887_v12  ;;  %v989_v30 = vadd.f32 %v981_v60, %v3683_v3  ;;  %v1421_v42 = vmul.f32 %v4786_v44, %v4731_v63 }
 0x551   :  { %3412 = vpow2.f32 %v1958_v31  ;;  %v983_v14 = vsel %vm951_vm2, %v4798_v34, %v2578_v26  ;;  %v2581_v35 = vadd.f32 -1.0, %v3393_v59  ;;  %v2580_v5 = vadd.f32 -1.0, %v3395_v16 }
 0x552   :  { %3414 = vpow2.f32 %v1964_v25  ;;  %997 = vst.msk [vmem:[#allocation2] sm:$0xff] %vm849_vm13, %v989_v30  ;;  %v991_v58 = vadd.f32 %v983_v14, %v3693_v8  ;;  %v2583_v40 = vadd.f32 -1.0, %v3397_v7  ;;  %v4917_v7 = vpop.permute.xlu1 %2429  ;;  %vm1943_vm6 = vcmp.gt.f32.partialorder %v4847_v62, 0.0 }
 0x553   :  { %3416 = vpow2.f32 %v1962_v61  ;;  %v986_v29 = vsel %vm954_vm1, %v4801_v57, %v2581_v35  ;;  %v985_v63 = vsel %vm953_vm3, %v4809_v33, %v2580_v5  ;;  %v1451_v57 = vmul.f32 1.442695, %v4880_v20 }
 0x554   :  { %3418 = vpow2.f32 %v1441_v37  ;;  %999 = vst.msk [vmem:[#allocation2 + $0x10] sm:$0xff] %vm849_vm13, %v991_v58  ;;  %v994_v59 = vadd.f32 %v986_v29, %v3699_v10  ;;  %v993_v0 = vadd.f32 %v985_v63, %v3703_v13  ;;  %v988_v16 = vsel %vm956_vm4, %v4813_v41, %v2583_v40 }
 0x555   :  { %v3401_v34 = vpop.eup %3400  ;;  %v1420_v33 = vmul.f32 %v4786_v44, %v4695_v38  ;;  %v996_v54 = vadd.f32 %v988_v16, %v3709_v15  ;;  %3420 = vpow2.f32 %v1447_v55  ;;  %v1449_v37 = vmul.f32 1.442695, %v4892_v27 }
 0x556   :  { %v3403_v2 = vpop.eup %3402  ;;  %v2609_v32 = vadd.f32 -1.0, %v3401_v34  ;;  %1002 = vst.msk [vmem:[#allocation2 + $0x28] sm:$0xff] %vm849_vm13, %v994_v59  ;;  %1001 = vst.msk [vmem:[#allocation2 + $0x20] sm:$0xff] %vm849_vm13, %v993_v0  ;;  %vm1942_vm7 = vcmp.gt.f32.partialorder %v4849_v23, 0.0  ;;  %v4930_v38 = vadd.f32 %v4819_v18, %v1421_v42  ;;  %vm1945_vm8 = vcmp.gt.f32.partialorder %v4851_v22, 0.0 }
 0x557   :  { %v3405_v31 = vpop.eup %3404  ;;  %v2608_v47 = vadd.f32 -1.0, %v3403_v2  ;;  %1004 = vst.msk [vmem:[#allocation2 + $0x38] sm:$0xff] %vm849_vm13, %v996_v54  ;;  %v4942_v42 = vadd.f32 %v4819_v18, %v1420_v33  ;;  %3422 = vpow2.f32 %v1445_v28  ;;  %vm1944_vm9 = vcmp.gt.f32.partialorder %v4856_v21, 0.0 }
 0x558   :  { %v3407_v41 = vpop.eup %3406  ;;  %v1975_v36 = vsel %vm1943_vm6, %v4847_v62, %v2609_v32  ;;  %v2611_v26 = vadd.f32 -1.0, %v3405_v31  ;;  %3424 = vpow2.f32 %v1451_v57  ;;  %v1455_v28 = vmul.f32 1.442695, %v4930_v38 }
 0x559   :  { %v3409_v44 = vpop.eup %3408  ;;  %v4934_v25 = vmul.f32 %v3407_v41, %v4754_v39  ;;  %1992 = vrot.lane.b32.xlu1 %v1975_v36, %s3482_s8  ;;  %v1974_v55 = vsel %vm1942_vm7, %v4849_v23, %v2608_v47  ;;  %v2422_v60 = vmul.f32 %v3407_v41, %v4738_v50  ;;  %v2421_v62 = vmul.f32 %v3407_v41, %v4735_v49  ;;  %v4949_v49 = vpop.permute.xlu1 %2440 }
 0x55a   :  { %v3411_v61 = vpop.eup %3410  ;;  %1990 = vrot.lane.b32.xlu0 %v1974_v55, %s3482_s8  ;;  %v2610_v30 = vadd.f32 -1.0, %v3409_v44  ;;  %v2424_v14 = vmul.f32 %v3407_v41, %v4744_v11  ;;  %v2423_v39 = vmul.f32 %v3407_v41, %v4741_v19  ;;  %v2426_v50 = vmul.f32 %v3407_v41, %v4751_v43 }
 0x55b   :  { %v3413_v35 = vpop.eup %3412  ;;  %v2433_v23 = vmul.f32 %v4917_v7, %v2422_v60  ;;  %v1977_v5 = vsel %vm1945_vm8, %v4851_v22, %v2611_v26  ;;  %v2613_v18 = vadd.f32 -1.0, %v3411_v61  ;;  %v2432_v58 = vmul.f32 %v4917_v7, %v2421_v62 }
 0x55c   :  { %v3415_v11 = vpop.eup %3414  ;;  %v1976_v19 = vsel %vm1944_vm9, %v4856_v21, %v2610_v30  ;;  %v2612_v40 = vadd.f32 -1.0, %v3413_v35  ;;  %3426 = vpow2.f32 %v1449_v37  ;;  %v1453_v43 = vmul.f32 1.442695, %v4942_v42 }
 0x55d   :  { %1996 = vrot.lane.b32.xlu1 %v1977_v5, %s3482_s8  ;;  %v3417_v29 = vpop.eup %3416  ;;  %vm1947_vm10 = vcmp.gt.f32.partialorder %v4858_v56, 0.0  ;;  %vm1946_vm11 = vcmp.gt.f32.partialorder %v4865_v9, 0.0  ;;  %v4962_v63 = vadd.f32 %v4949_v49, %v2433_v23  ;;  %v2435_v21 = vmul.f32 %v4917_v7, %v2424_v14 }
 0x55e   :  { %1994 = vrot.lane.b32.xlu0 %v1976_v19, %s3482_s8  ;;  %v3419_v22 = vpop.eup %3418  ;;  %v1979_v34 = vsel %vm1947_vm10, %v4858_v56, %v2613_v18  ;;  %v2615_v59 = vadd.f32 -1.0, %v3415_v11  ;;  %v4967_v0 = vadd.f32 %v4949_v49, %v2432_v58  ;;  %v2434_v16 = vmul.f32 %v4917_v7, %v2423_v39 }
 0x55f   :  { %v3421_v2 = vpop.eup %3420  ;;  %v1978_v32 = vsel %vm1946_vm11, %v4865_v9, %v2612_v40  ;;  %v2614_v57 = vadd.f32 -1.0, %v3417_v29  ;;  %v2593_v33 = vadd.f32 -1.0, %v4906_v4  ;;  %3428 = vpow2.f32 %v1455_v28 }
 0x560   :  { %vm1949_vm12 = vcmp.gt.f32.partialorder %v4883_v51, 0.0  ;;  %3430 = vpow2.f32 %v1453_v43  ;;  %v2425_v56 = vmul.f32 %v3407_v41, %v4748_v48  ;;  %v2428_v54 = vmul.f32 %v3407_v41, %v4757_v53 }
 0x561   :  { %2000 = vrot.lane.b32.xlu1 %v1979_v34, %s3482_s8  ;;  %vm1948_vm13 = vcmp.gt.f32.partialorder %v4887_v12, 0.0  ;;  %v2461_v31 = vmul.f32 1.442695, %v4962_v63  ;;  %v4980_v47 = vadd.f32 %v4949_v49, %v2435_v21  ;;  %v2437_v9 = vmul.f32 %v4917_v7, %v2426_v50  ;;  %v3423_v26 = vpop.eup %3422 }
 0x562   :  { %1998 = vrot.lane.b32.xlu0 %v1978_v32, %s3482_s8  ;;  %v1981_v4 = vsel %vm1949_vm12, %v4883_v51, %v2615_v59  ;;  %v2459_v37 = vmul.f32 1.442695, %v4967_v0  ;;  %v4986_v36 = vadd.f32 %v4949_v49, %v2434_v16  ;;  %v2436_v48 = vmul.f32 %v4917_v7, %v2425_v56  ;;  %v3425_v55 = vpop.eup %3424 }
 0x563   :  { %v1980_v53 = vsel %vm1948_vm13, %v4887_v12, %v2614_v57  ;;  %v2592_v41 = vadd.f32 -1.0, %v3419_v22  ;;  %v1466_v44 = vsel %vm1434_vm5, %v4828_v52, %v2593_v33  ;;  %v2595_v51 = vadd.f32 -1.0, %v3421_v2 }
 0x564   :  { %3432 = vpow2.f32 %v2461_v31  ;;  %v2465_v60 = vmul.f32 1.442695, %v4980_v47  ;;  %v4997_v62 = vadd.f32 %v4949_v49, %v2437_v9  ;;  %v2439_v61 = vmul.f32 %v4917_v7, %v2428_v54 }
 0x565   :  { %2004 = vrot.lane.b32.xlu1 %v1981_v4, %s3482_s8  ;;  %3434 = vpow2.f32 %v2459_v37  ;;  %v2463_v30 = vmul.f32 1.442695, %v4986_v36  ;;  %v5002_v14 = vadd.f32 %v4949_v49, %v2436_v48  ;;  %v2438_v52 = vmul.f32 %v4917_v7, %v4934_v25 }
 0x566   :  { %2002 = vrot.lane.b32.xlu0 %v1980_v53, %s3482_s8  ;;  %v3427_v12 = vpop.eup %3426  ;;  %v1465_v39 = vsel %vm1433_vm14, %v4861_v24, %v2592_v41  ;;  %v2594_v35 = vadd.f32 -1.0, %v3423_v26  ;;  %vm1436_vm15 = vcmp.gt.f32.partialorder %v4872_v46, 0.0  ;;  %vm1435_vm0 = vcmp.gt.f32.partialorder %v4875_v45, 0.0 }
 0x567   :  { %v1468_v50 = vsel %vm1436_vm15, %v4872_v46, %v2595_v51  ;;  %3436 = vpow2.f32 %v2465_v60  ;;  %v2469_v5 = vmul.f32 1.442695, %v4997_v62  ;;  %v5014_v7 = vadd.f32 %v4949_v49, %v2439_v61 }
 0x568   :  { %v2597_v18 = vadd.f32 -1.0, %v3425_v55  ;;  %3438 = vpow2.f32 %v2463_v30  ;;  %v2467_v24 = vmul.f32 1.442695, %v5002_v14  ;;  %v5018_v58 = vadd.f32 %v4949_v49, %v2438_v52 }
 0x569   :  { %1483 = vrot.lane.b32.xlu1 %v1466_v44, %s3483_s9  ;;  %v3429_v23 = vpop.eup %3428  ;;  %v1467_v11 = vsel %vm1435_vm0, %v4875_v45, %v2594_v35  ;;  %v2596_v19 = vadd.f32 -1.0, %v3427_v12  ;;  %vm1438_vm1 = vcmp.gt.f32.partialorder %v4880_v20, 0.0  ;;  %vm1437_vm2 = vcmp.gt.f32.partialorder %v4892_v27, 0.0 }
 0x56a   :  { %1481 = vrot.lane.b32.xlu0 %v1465_v39, %s3483_s9  ;;  %v3431_v25 = vpop.eup %3430  ;;  %3440 = vpow2.f32 %v2469_v5  ;;  %v2473_v46 = vmul.f32 1.442695, %v5014_v7  ;;  %v1470_v40 = vsel %vm1438_vm1, %v4880_v20, %v2597_v18  ;;  %v2599_v28 = vadd.f32 -1.0, %v3429_v23 }
 0x56b   :  { %3442 = vpow2.f32 %v2467_v24  ;;  %v2471_v49 = vmul.f32 1.442695, %v5018_v58  ;;  %v1469_v45 = vsel %vm1437_vm2, %v4892_v27, %v2596_v19  ;;  %v2598_v43 = vadd.f32 -1.0, %v3431_v25 }
 0x56c   :  { %vm1440_vm3 = vcmp.gt.f32.partialorder %v4930_v38, 0.0  ;;  %3444 = vpow2.f32 %v2473_v46  ;;  %vm1439_vm4 = vcmp.gt.f32.partialorder %v4942_v42, 0.0  ;;  %vm2452_vm6 = vcmp.gt.f32.partialorder %v4962_v63, 0.0 }
 0x56d   :  { %1487 = vrot.lane.b32.xlu1 %v1468_v50, %s3483_s9  ;;  %v1472_v21 = vsel %vm1440_vm3, %v4930_v38, %v2599_v28  ;;  %3446 = vpow2.f32 %v2471_v49  ;;  %v1471_v59 = vsel %vm1439_vm4, %v4942_v42, %v2598_v43  ;;  %vm2451_vm7 = vcmp.gt.f32.partialorder %v4967_v0, 0.0 }
 0x56e   :  { %1485 = vrot.lane.b32.xlu0 %v1467_v11, %s3483_s9  ;;  %v3433_v29 = vpop.eup %3432  ;;  %vm2454_vm8 = vcmp.gt.f32.partialorder %v4980_v47, 0.0  ;;  %vm2453_vm9 = vcmp.gt.f32.partialorder %v4986_v36, 0.0  ;;  %vm2456_vm10 = vcmp.gt.f32.partialorder %v4997_v62, 0.0  ;;  %vm2455_vm11 = vcmp.gt.f32.partialorder %v5002_v14, 0.0 }
 0x56f   :  { %v3435_v22 = vpop.eup %3434  ;;  %v2625_v20 = vadd.f32 -1.0, %v3433_v29  ;;  %vm2458_vm12 = vcmp.gt.f32.partialorder %v5014_v7, 0.0  ;;  %vm2457_vm13 = vcmp.gt.f32.partialorder %v5018_v58, 0.0  ;;  %vm1513_vm5 = vcmask 130112  }
 0x570   :  { %v2624_v16 = vadd.f32 -1.0, %v3435_v22  ;;  %vm2022_vm14 = vcmask 195712   ;;  %vm2531_vm15 = vcmask 261312  }
 0x571   :  { %1491 = vrot.lane.b32.xlu1 %v1470_v40, %s3483_s9  ;;  %v3437_v34 = vpop.eup %3436  ;;  %v2484_v2 = vsel %vm2452_vm6, %v4962_v63, %v2625_v20 }
 0x572   :  { %1489 = vrot.lane.b32.xlu0 %v1469_v45, %s3483_s9  ;;  %v3439_v27 = vpop.eup %3438  ;;  %v2627_v38 = vadd.f32 -1.0, %v3437_v34  ;;  %v2483_v57 = vsel %vm2451_vm7, %v4967_v0, %v2624_v16 }
 0x573   :  { %v2626_v33 = vadd.f32 -1.0, %v3439_v27 }
 0x574   :  { %v3441_v32 = vpop.eup %3440  ;;  %v2486_v42 = vsel %vm2454_vm8, %v4980_v47, %v2627_v38 }
 0x575   :  { %1495 = vrot.lane.b32.xlu1 %v1472_v21, %s3483_s9  ;;  %v3443_v56 = vpop.eup %3442  ;;  %v2629_v54 = vadd.f32 -1.0, %v3441_v32  ;;  %v2485_v63 = vsel %vm2453_vm9, %v4986_v36, %v2626_v33 }
 0x576   :  { %1493 = vrot.lane.b32.xlu0 %v1471_v59, %s3483_s9  ;;  %v3445_v31 = vpop.eup %3444  ;;  %v2628_v9 = vadd.f32 -1.0, %v3443_v56 }
 0x577   :  { %v3447_v4 = vpop.eup %3446  ;;  %v2488_v0 = vsel %vm2456_vm10, %v4997_v62, %v2629_v54  ;;  %v2631_v37 = vadd.f32 -1.0, %v3445_v31 }
 0x578   :  { %v2487_v47 = vsel %vm2455_vm11, %v5002_v14, %v2628_v9  ;;  %v2630_v48 = vadd.f32 -1.0, %v3447_v4 }
 0x579   :  { %2501 = vrot.lane.b32.xlu1 %v2484_v2, %s3484_s22  ;;  %v2490_v26 = vsel %vm2458_vm12, %v5014_v7, %v2631_v37 }
 0x57a   :  { %2499 = vrot.lane.b32.xlu0 %v2483_v57, %s3484_s22  ;;  %v2489_v36 = vsel %vm2457_vm13, %v5018_v58, %v2630_v48 }
 0x57d   :  { %2505 = vrot.lane.b32.xlu1 %v2486_v42, %s3484_s22 }
 0x57e   :  { %2503 = vrot.lane.b32.xlu0 %v2485_v63, %s3484_s22 }
 0x581   :  { %2509 = vrot.lane.b32.xlu1 %v2488_v0, %s3484_s22 }
 0x582   :  { %2507 = vrot.lane.b32.xlu0 %v2487_v47, %s3484_s22 }
 0x585   :  { %2513 = vrot.lane.b32.xlu1 %v2490_v26, %s3484_s22 }
 0x586   :  { %2511 = vrot.lane.b32.xlu0 %v2489_v36, %s3484_s22 }
 0x5cb   :  { %v1993_v53 = vpop.permute.xlu1 %1992 }
 0x5cc   :  { %v1991_v41 = vpop.permute.xlu0 %1990  ;;  %v2015_v52 = vadd.f32 %v1993_v53, %v3681_v1 }
 0x5cd   :  { %v2014_v35 = vadd.f32 %v1991_v41, %v3683_v3 }
 0x5cf   :  { %v1997_v44 = vpop.permute.xlu1 %1996 }
 0x5d0   :  { %v1995_v51 = vpop.permute.xlu0 %1994  ;;  %v2017_v7 = vadd.f32 %v1997_v44, %v3691_v6 }
 0x5d1   :  { %v2016_v18 = vadd.f32 %v1995_v51, %v3693_v8 }
 0x5d3   :  { %v2001_v55 = vpop.permute.xlu1 %2000 }
 0x5d4   :  { %v1999_v60 = vpop.permute.xlu0 %1998  ;;  %v2019_v19 = vadd.f32 %v2001_v55, %v3699_v10 }
 0x5d5   :  { %v2018_v40 = vadd.f32 %v1999_v60, %v3703_v13 }
 0x5d7   :  { %v2005_v62 = vpop.permute.xlu1 %2004 }
 0x5d8   :  { %v2003_v61 = vpop.permute.xlu0 %2002  ;;  %v2021_v45 = vadd.f32 %v2005_v62, %v3709_v15 }
 0x5d9   :  { %v2020_v22 = vadd.f32 %v2003_v61, %v3711_v17 }
 0x5db   :  { %v1484_v12 = vpop.permute.xlu1 %1483 }
 0x5dc   :  { %v1506_v30 = vadd.f32 %v1484_v12, %v3681_v1  ;;  %v1482_v14 = vpop.permute.xlu0 %1481 }
 0x5dd   :  { %v1505_v39 = vadd.f32 %v1482_v14, %v3683_v3 }
 0x5de   :  { %1515 = vst.msk [vmem:[#allocation2 + $0x8] sm:$0xff] %vm1513_vm5, %v1506_v30 }
 0x5df   :  { %1514 = vst.msk [vmem:[#allocation2] sm:$0xff] %vm1513_vm5, %v1505_v39  ;;  %v1488_v23 = vpop.permute.xlu1 %1487 }
 0x5e0   :  { %2024 = vst.msk [vmem:[#allocation2 + $0x8] sm:$0xff] %vm2022_vm14, %v2015_v52  ;;  %v1508_v50 = vadd.f32 %v1488_v23, %v3691_v6  ;;  %v1486_v5 = vpop.permute.xlu0 %1485  ;;  %2023 = vst.msk [vmem:[#allocation2] sm:$0xff] %vm2022_vm14, %v2014_v35 }
 0x5e1   :  { %v1507_v25 = vadd.f32 %v1486_v5, %v3693_v8 }
 0x5e2   :  { %1517 = vst.msk [vmem:[#allocation2 + $0x18] sm:$0xff] %vm1513_vm5, %v1508_v50 }
 0x5e3   :  { %1516 = vst.msk [vmem:[#allocation2 + $0x10] sm:$0xff] %vm1513_vm5, %v1507_v25  ;;  %v1492_v24 = vpop.permute.xlu1 %1491 }
 0x5e4   :  { %2026 = vst.msk [vmem:[#allocation2 + $0x18] sm:$0xff] %vm2022_vm14, %v2017_v7  ;;  %v1510_v58 = vadd.f32 %v1492_v24, %v3699_v10  ;;  %v1490_v11 = vpop.permute.xlu0 %1489  ;;  %2025 = vst.msk [vmem:[#allocation2 + $0x10] sm:$0xff] %vm2022_vm14, %v2016_v18 }
 0x5e5   :  { %v1509_v46 = vadd.f32 %v1490_v11, %v3703_v13 }
 0x5e6   :  { %1519 = vst.msk [vmem:[#allocation2 + $0x28] sm:$0xff] %vm1513_vm5, %v1510_v58 }
 0x5e7   :  { %1518 = vst.msk [vmem:[#allocation2 + $0x20] sm:$0xff] %vm1513_vm5, %v1509_v46  ;;  %v1496_v28 = vpop.permute.xlu1 %1495 }
 0x5e8   :  { %2028 = vst.msk [vmem:[#allocation2 + $0x28] sm:$0xff] %vm2022_vm14, %v2019_v19  ;;  %v1512_v49 = vadd.f32 %v1496_v28, %v3709_v15  ;;  %v1494_v29 = vpop.permute.xlu0 %1493  ;;  %2027 = vst.msk [vmem:[#allocation2 + $0x20] sm:$0xff] %vm2022_vm14, %v2018_v40 }
 0x5e9   :  { %v1511_v43 = vadd.f32 %v1494_v29, %v3711_v17 }
 0x5ea   :  { %1521 = vst.msk [vmem:[#allocation2 + $0x38] sm:$0xff] %vm1513_vm5, %v1512_v49 }
 0x5eb   :  { %1520 = vst.msk [vmem:[#allocation2 + $0x30] sm:$0xff] %vm1513_vm5, %v1511_v43  ;;  %v2502_v21 = vpop.permute.xlu1 %2501 }
 0x5ec   :  { %2030 = vst.msk [vmem:[#allocation2 + $0x38] sm:$0xff] %vm2022_vm14, %v2021_v45  ;;  %v2524_v20 = vadd.f32 %v2502_v21, %v3681_v1  ;;  %2029 = vst.msk [vmem:[#allocation2 + $0x30] sm:$0xff] %vm2022_vm14, %v2020_v22  ;;  %v2500_v34 = vpop.permute.xlu0 %2499 }
 0x5ed   :  { %v2523_v59 = vadd.f32 %v2500_v34, %v3683_v3 }
 0x5ee   :  { %2533 = vst.msk [vmem:[#allocation2 + $0x8] sm:$0xff] %vm2531_vm15, %v2524_v20 }
 0x5ef   :  { %2532 = vst.msk [vmem:[#allocation2] sm:$0xff] %vm2531_vm15, %v2523_v59  ;;  %v2506_v16 = vpop.permute.xlu1 %2505 }
 0x5f0   :  { %v2526_v27 = vadd.f32 %v2506_v16, %v3691_v6  ;;  %v2504_v2 = vpop.permute.xlu0 %2503 }
 0x5f1   :  { %v2525_v38 = vadd.f32 %v2504_v2, %v3693_v8 }
 0x5f2   :  { %2535 = vst.msk [vmem:[#allocation2 + $0x18] sm:$0xff] %vm2531_vm15, %v2526_v27 }
 0x5f3   :  { %2534 = vst.msk [vmem:[#allocation2 + $0x10] sm:$0xff] %vm2531_vm15, %v2525_v38  ;;  %v2510_v1 = vpop.permute.xlu1 %2509 }
 0x5f4   :  { %v2528_v32 = vadd.f32 %v2510_v1, %v3699_v10  ;;  %v2508_v57 = vpop.permute.xlu0 %2507 }
 0x5f5   :  { %v2527_v3 = vadd.f32 %v2508_v57, %v3703_v13 }
 0x5f6   :  { %2537 = vst.msk [vmem:[#allocation2 + $0x28] sm:$0xff] %vm2531_vm15, %v2528_v32 }
 0x5f7   :  { %2536 = vst.msk [vmem:[#allocation2 + $0x20] sm:$0xff] %vm2531_vm15, %v2527_v3  ;;  %v2514_v6 = vpop.permute.xlu1 %2513 }
 0x5f8   :  { %v2530_v33 = vadd.f32 %v2514_v6, %v3709_v15  ;;  %v2512_v8 = vpop.permute.xlu0 %2511 }
 0x5f9   :  { %v2529_v56 = vadd.f32 %v2512_v8, %v3711_v17 }
 0x5fa   :  { %2539 = vst.msk [vmem:[#allocation2 + $0x38] sm:$0xff] %vm2531_vm15, %v2530_v33 }
 0x5fb   :  { %2538 = vst.msk [vmem:[#allocation2 + $0x30] sm:$0xff] %vm2531_vm15, %v2529_v56 }
 0x5fc   :  { %3459 = shalt.err (!%p3456_p4)
}
 0x5fd   :  { %s3460_s27 = scalar_lea.hbm %s5124_s10, 1024 }
 0x5fe   :  { %p3461_p5 = scmp.ne.s32.totalorder %s5124_s10, %s3460_s27  ;;  %p3464_p6 = scmp.lt.u32.totalorder %s3460_s27, %s5124_s10 }
 0x600   :  { %p3466_p7 = pnand %p3464_p6, %p3461_p5 }
 0x602   :  { %3469 = shalt.err (!%p3466_p7)
}
 0x603   :  { %s3486_s3 = smov 128  }
 0x604   :  { %2551 = dma.vmem_to_hbm [thread:$0]  %s2546_s24, 1024, %s5124_s10, [#allocation3], %s3486_s3, %s3486_s3, %s3483_s9  }
 0x605   :  { %3470 = dma.done.wait [#allocation3], 1024  }
 0x606   :  { %3471 = vsyncadd [#allocation3], 4294966272 }
 0x607   :  { %2555 = vsyncpa [#allocation3], 1 }

</bundles_post_ra>
